<compile_context>
chip_gen: v5e
topology: v5e:2x2
jax: 0.10.0
libtpu: 0.0.40
codegen_flags: <defaults>
</compile_context>

<pallas_src>
import jax
import jax.numpy as jnp
from jax import lax
from jax.experimental import pallas as pl
from jax.experimental.pallas import tpu as pltpu

_EPS = 1e-5


def _round_up(x, m):
    return ((x + m - 1) // m) * m


def _divisor_at_most(n, target):
    """Largest divisor of n that is <= max(target, 1)."""
    d = max(1, min(int(target), n))
    while n % d != 0:
        d -= 1
    return d


# ----------------------------- Pallas kernels -----------------------------

def _maxpool_kernel(x_ref, o_ref):
    """2x2 max pool on a row tile.

    x_ref: (1, 2*th, W2, 2, C)   free reshape view of 2*th input rows
    o_ref: (1, th, W2, C)
    """
    x = x_ref[0]                                   # (2*th, W2, 2, C)
    m = jnp.max(x, axis=2)                         # pool along W -> (2*th, W2, C)
    th = o_ref.shape[1]
    m = m.reshape(th, 2, m.shape[1], m.shape[2])   # split row pairs (leading dim)
    o_ref[0] = jnp.max(m, axis=1).astype(o_ref.dtype)   # pool along H


def _conv_stats_kernel(xp_ref, w_ref, z_ref, stats_ref):
    """3x3 conv (one fused MXU dot per row tile) + per-tile BN partial sums.

    xp_ref:    (1, H+2, W+2, Cin)  resident zero-padded image (bf16)
    w_ref:     (9*Cin, Cp)         resident weight matrix (bf16)
    z_ref:     (1, th, W, Cp)      conv output tile (bf16)
    stats_ref: (1, 1, 2, Cp)       [sum(z), sum(z*z)] for this tile (f32)
    """
    th, W, Cp = z_ref.shape[1], z_ref.shape[2], z_ref.shape[3]
    Cin = xp_ref.shape[3]
    row0 = pl.program_id(1) * th

    # In-VMEM im2col: nine shifted (th, W, Cin) views -> (th*W, 9*Cin) patches.
    views = []
    for ky in range(3):
        for kx in range(3):
            views.append(xp_ref[0, pl.ds(row0 + ky, th), pl.ds(kx, W), :])
    patches = jnp.concatenate(views, axis=-1).reshape(th * W, 9 * Cin)

    # Single bf16 x bf16 -> f32 MXU matmul for the whole tile.
    z = jnp.dot(patches, w_ref[...], preferred_element_type=jnp.float32)
    z_ref[0] = z.reshape(th, W, Cp).astype(z_ref.dtype)

    # BN partials from the f32 accumulator (before the bf16 cast); direct row
    # stores (no concatenate), sublane reductions land on the XLU.
    stats_ref[0, 0, 0:1, :] = jnp.sum(z, axis=0, keepdims=True)
    stats_ref[0, 0, 1:2, :] = jnp.sum(z * z, axis=0, keepdims=True)


def _affine_relu_kernel(z_ref, scale_ref, shift_ref, o_ref):
    """Fused BN (precomputed scale/shift) + ReLU: y = max(z*scale + shift, 0)."""
    z = z_ref[...].astype(jnp.float32)
    o_ref[...] = jnp.maximum(z * scale_ref[...] + shift_ref[...], 0.0).astype(o_ref.dtype)


# ----------------------------- wrappers -----------------------------------

def _maxpool2x2(x_nhwc, out_dtype=jnp.bfloat16):
    """MaxPool2d(kernel=2, stride=2) on NHWC (H, W even), tiled over output rows."""
    N, H, W, C = x_nhwc.shape
    H2, W2 = H // 2, W // 2
    xv = x_nhwc.reshape(N, H, W2, 2, C)            # free view, no HBM copy
    th = _divisor_at_most(H2, max(1, 32768 // max(W2 * C, 1)))
    return pl.pallas_call(
        _maxpool_kernel,
        out_shape=jax.ShapeDtypeStruct((N, H2, W2, C), out_dtype),
        grid=(N, H2 // th),
        in_specs=[pl.BlockSpec((1, 2 * th, W2, 2, C), lambda n, i: (n, i, 0, 0, 0))],
        out_specs=pl.BlockSpec((1, th, W2, C), lambda n, i: (n, i, 0, 0)),
        compiler_params=pltpu.CompilerParams(
            dimension_semantics=("parallel", "parallel")),
    )(xv)


def _conv_bn_relu(x_nhwc, w_hwio, gamma, beta):
    """3x3 conv (SAME, bias-free) + BatchNorm (batch stats, biased var) + ReLU.

    x_nhwc may carry zero-padded trailing channels (Cin >= w_hwio.shape[2]); the
    result carries Cp = round_up(Cout, 128) channels whose padding is exactly 0.
    """
    N, H, W, Cin = x_nhwc.shape
    kin, Cout = w_hwio.shape[2], w_hwio.shape[3]
    Cp = _round_up(Cout, 128)
    M = N * H * W

    # Weight matrix (HWIO -> (9*Cin, Cp)): zero rows for x's zero-padded input
    # channels, zero columns for padded output channels; bf16 MXU operand.
    w = jnp.pad(w_hwio, ((0, 0), (0, 0), (0, Cin - kin), (0, Cp - Cout)))
    w_mat = w.reshape(9 * Cin, Cp).astype(jnp.bfloat16)

    # SAME spatial padding (single copy; the 9 tap views are built in-kernel).
    xp = jnp.pad(x_nhwc.astype(jnp.bfloat16), ((0, 0), (1, 1), (1, 1), (0, 0)))

    th = _divisor_at_most(H, max(1, 512 // max(W, 1)))   # M-tile = th*W rows
    nh = H // th

    # Pass 1: fused im2col matmul + per-tile BN partials (parallel over (n, row-tile)).
    z, stats = pl.pallas_call(
        _conv_stats_kernel,
        out_shape=(jax.ShapeDtypeStruct((N, H, W, Cp), jnp.bfloat16),
                   jax.ShapeDtypeStruct((N, nh, 2, Cp), jnp.float32)),
        grid=(N, nh),
        in_specs=[pl.BlockSpec((1, H + 2, W + 2, Cin), lambda n, i: (n, 0, 0, 0)),
                  pl.BlockSpec((9 * Cin, Cp), lambda n, i: (0, 0))],   # resident weights
        out_specs=(pl.BlockSpec((1, th, W, Cp), lambda n, i: (n, i, 0, 0)),
                   pl.BlockSpec((1, 1, 2, Cp), lambda n, i: (n, i, 0, 0))),
        compiler_params=pltpu.CompilerParams(
            dimension_semantics=("parallel", "parallel")),
    )(xp, w_mat)

    # Global BN statistics from the per-tile partials (tiny per-channel math).
    total = jnp.sum(stats, axis=(0, 1))                    # (2, Cp)
    mean = total[0] / M
    var = jnp.maximum(total[1] / M - mean * mean, 0.0)     # biased var, clamped >= 0
    rstd = lax.rsqrt(var + _EPS)
    gamma_p = jnp.pad(gamma, (0, Cp - Cout))
    beta_p = jnp.pad(beta, (0, Cp - Cout))
    scale = (gamma_p * rstd).reshape(1, Cp)
    shift = (beta_p - mean * gamma_p * rstd).reshape(1, Cp)

    # Pass 2: normalize + ReLU (memory-bound; bf16 in/out, lane-dense Cp).
    th2 = _divisor_at_most(H, max(1, 2048 // max(W, 1)))
    y = pl.pallas_call(
        _affine_relu_kernel,
        out_shape=jax.ShapeDtypeStruct((N, H, W, Cp), jnp.bfloat16),
        grid=(N, H // th2),
        in_specs=[pl.BlockSpec((1, th2, W, Cp), lambda n, i: (n, i, 0, 0)),
                  pl.BlockSpec((1, Cp), lambda n, i: (0, 0)),
                  pl.BlockSpec((1, Cp), lambda n, i: (0, 0))],
        out_specs=pl.BlockSpec((1, th2, W, Cp), lambda n, i: (n, i, 0, 0)),
        compiler_params=pltpu.CompilerParams(
            dimension_semantics=("parallel", "parallel")),
    )(z, scale, shift)
    return y


def down_forward(x_nchw, params):
    """Forward pass of `down(in_ch, out_ch)`; x is NCHW like PyTorch."""
    w1, _b1, g1, be1, w2, _b2, g2, be2 = params   # conv biases cancel exactly under BN
    out_ch = w2.shape[-1]
    x = jnp.transpose(x_nchw, (0, 2, 3, 1))       # NCHW -> NHWC
    x = _maxpool2x2(x)                            # bf16, (N, H2, W2, Cin)
    y = _conv_bn_relu(x, w1, g1, be1)             # bf16, padded channels stay (all zero)
    y = _conv_bn_relu(y, w2, g2, be2)
    y = y[..., :out_ch].astype(jnp.float32)       # drop channel padding once, back to f32
    return jnp.transpose(y, (0, 3, 1, 2))         # NHWC -> NCHW


# ----------------------------- reference -----------------------------------

def _reference(x_nchw, params):
    """Pure-JAX f32 reference replicating the PyTorch module (training-mode BN, with bias)."""
    w1, b1, g1, be1, w2, b2, g2, be2 = params

    def block(x, w, b, g, be):
        y = lax.conv_general_dilated(
            x, w, (1, 1), "SAME",
            dimension_numbers=("NHWC", "HWIO", "NHWC"))
        y = y + b.reshape(1, 1, 1, -1)
        mean = jnp.mean(y, axis=(0, 1, 2), keepdims=True)
        var = jnp.mean((y - mean) ** 2, axis=(0, 1, 2), keepdims=True)
        y = (y - mean) * lax.rsqrt(var + _EPS)
        y = y * g.reshape(1, 1, 1, -1) + be.reshape(1, 1, 1, -1)
        return jnp.maximum(y, 0.0)

    x = jnp.transpose(x_nchw, (0, 2, 3, 1))
    N, H, W, C = x.shape
    x = x.reshape(N, H // 2, 2, W // 2, 2, C).max(axis=(2, 4))    # MaxPool2d(2)
    y = block(x, w1, b1, g1, be1)
    y = block(y, w2, b2, g2, be2)
    return jnp.transpose(y, (0, 3, 1, 2))


if __name__ == "__main__":
    N, Cin, Cout, H, W = 2, 4, 8, 16, 16
    key = jax.random.PRNGKey(0)
    ks = jax.random.split(key, 9)

    x = jax.random.normal(ks[0], (N, Cin, H, W), jnp.float32)

    # Deterministic synthetic parameters (shapes match nn.Conv2d / nn.BatchNorm2d).
    w1 = 0.1 * jax.random.normal(ks[1], (3, 3, Cin, Cout), jnp.float32)   # HWIO
    b1 = 0.1 * jax.random.normal(ks[2], (Cout,), jnp.float32)
    g1 = 1.0 + 0.1 * jax.random.normal(ks[3], (Cout,), jnp.float32)
    be1 = 0.1 * jax.random.normal(ks[4], (Cout,), jnp.float32)
    w2 = 0.1 * jax.random.normal(ks[5], (3, 3, Cout, Cout), jnp.float32)  # HWIO
    b2 = 0.1 * jax.random.normal(ks[6], (Cout,), jnp.float32)
    g2 = 1.0 + 0.1 * jax.random.normal(ks[7], (Cout,), jnp.float32)
    be2 = 0.1 * jax.random.normal(ks[8], (Cout,), jnp.float32)
    params = (w1, b1, g1, be1, w2, b2, g2, be2)

    out = jax.block_until_ready(jax.jit(down_forward)(x, params))
    assert out.shape == (N, Cout, H // 2, W // 2), out.shape

    ref = _reference(x, params)
    # bf16 matmul operands / bf16 activations vs the f32 reference: values are
    # BatchNorm-normalized O(1), so allow a loose-but-meaningful absolute bound.
    max_err = float(jnp.max(jnp.abs(out - ref)))
    assert max_err < 1.5e-1, f"mismatch vs reference: max abs err {max_err}"

    print("KERNEL_OK")
</pallas_src>

<mosaic_0001>
module attributes {stable_mosaic.version = 11 : i64} {
  func.func @_maxpool_kernel(%arg0: i32, %arg1: i32, %arg2: memref<1x16x8x2x4xf32, #tpu.memory_space<vmem>>, %arg3: memref<1x8x8x4xbf16, #tpu.memory_space<vmem>>) attributes {dimension_semantics = [#tpu.dimension_semantics<parallel>, #tpu.dimension_semantics<parallel>], iteration_bounds = array<i64: 2, 1>, scalar_prefetch = 0 : i64, scratch_operands = 0 : i64, tpu.core_type = #tpu.core_type<tc>, window_params = [{transform_indices = @transform_0, window_bounds = array<i64: 1, 16, 8, 2, 4>}, {transform_indices = @transform_1, window_bounds = array<i64: 1, 8, 8, 4>}]} {
    %c0 = arith.constant 0 : index
    %c0_0 = arith.constant 0 : index
    %c0_1 = arith.constant 0 : index
    %c0_2 = arith.constant 0 : index
    %c0_3 = arith.constant 0 : index
    %0 = vector.load %arg2[%c0, %c0_0, %c0_1, %c0_2, %c0_3] : memref<1x16x8x2x4xf32, #tpu.memory_space<vmem>>, vector<1x16x8x2x4xf32>
    %1 = vector.shape_cast %0 : vector<1x16x8x2x4xf32> to vector<16x8x2x4xf32>
    %cst = arith.constant dense<0xFF800000> : vector<16x8x4xf32>
    %2 = vector.multi_reduction <maximumf>, %1, %cst [2] : vector<16x8x2x4xf32> to vector<16x8x4xf32>
    %3 = vector.shape_cast %2 : vector<16x8x4xf32> to vector<8x2x8x4xf32>
    %cst_4 = arith.constant dense<0xFF800000> : vector<8x8x4xf32>
    %4 = vector.multi_reduction <maximumf>, %3, %cst_4 [1] : vector<8x2x8x4xf32> to vector<8x8x4xf32>
    %5 = arith.truncf %4 : vector<8x8x4xf32> to vector<8x8x4xbf16>
    %c0_5 = arith.constant 0 : index
    %c0_6 = arith.constant 0 : index
    %c0_7 = arith.constant 0 : index
    %c0_8 = arith.constant 0 : index
    %6 = vector.load %arg3[%c0_5, %c0_6, %c0_7, %c0_8] : memref<1x8x8x4xbf16, #tpu.memory_space<vmem>>, vector<1x8x8x4xbf16>
    %7 = vector.shape_cast %6 : vector<1x8x8x4xbf16> to vector<8x8x4xbf16>
    %8 = vector.shape_cast %5 : vector<8x8x4xbf16> to vector<1x8x8x4xbf16>
    tpu.vector_store %arg3[%c0_5, %c0_6, %c0_7, %c0_8], %8 {strides = array<i32>} : memref<1x8x8x4xbf16, #tpu.memory_space<vmem>>, vector<1x8x8x4xbf16>,
    return
  }
  func.func @transform_0(%arg0: i32, %arg1: i32) -> (i32, i32, i32, i32, i32) {
    %c0_i32 = arith.constant 0 : i32
    %c0_i32_0 = arith.constant 0 : i32
    %c0_i32_1 = arith.constant 0 : i32
    %c0_i32_2 = arith.constant 0 : i32
    return %arg0, %arg1, %c0_i32, %c0_i32_0, %c0_i32_1 : i32, i32, i32, i32, i32
  }
  func.func @transform_1(%arg0: i32, %arg1: i32) -> (i32, i32, i32, i32) {
    %c0_i32 = arith.constant 0 : i32
    %c0_i32_0 = arith.constant 0 : i32
    %c0_i32_1 = arith.constant 0 : i32
    return %arg0, %arg1, %c0_i32, %c0_i32_0 : i32, i32, i32, i32
  }
}

module attributes {stable_mosaic.version = 11 : i64} {
  func.func @_conv_stats_kernel(%arg0: i32, %arg1: i32, %arg2: memref<1x10x10x4xbf16, #tpu.memory_space<vmem>>, %arg3: memref<36x128xbf16, #tpu.memory_space<vmem>>, %arg4: memref<1x8x8x128xbf16, #tpu.memory_space<vmem>>, %arg5: memref<1x1x2x128xf32, #tpu.memory_space<vmem>>) attributes {dimension_semantics = [#tpu.dimension_semantics<parallel>, #tpu.dimension_semantics<parallel>], iteration_bounds = array<i64: 2, 1>, scalar_prefetch = 0 : i64, scratch_operands = 0 : i64, tpu.core_type = #tpu.core_type<tc>, window_params = [{transform_indices = @transform_0, window_bounds = array<i64: 1, 10, 10, 4>}, {pipeline_mode = #tpu.pipeline_mode<synchronous>, transform_indices = @transform_1, window_bounds = array<i64: 36, 128>}, {transform_indices = @transform_2, window_bounds = array<i64: 1, 8, 8, 128>}, {transform_indices = @transform_3, window_bounds = array<i64: 1, 1, 2, 128>}]} {
    %c8_i32 = arith.constant 8 : i32
    %0 = arith.muli %arg1, %c8_i32 : i32
    %c0_i32 = arith.constant 0 : i32
    %1 = arith.addi %0, %c0_i32 : i32
    %c0 = arith.constant 0 : index
    %2 = arith.index_cast %1 : i32 to index
    %c0_0 = arith.constant 0 : index
    %c0_1 = arith.constant 0 : index
    %3 = vector.load %arg2[%c0, %2, %c0_0, %c0_1] : memref<1x10x10x4xbf16, #tpu.memory_space<vmem>>, vector<1x8x8x4xbf16>
    %4 = vector.shape_cast %3 : vector<1x8x8x4xbf16> to vector<8x8x4xbf16>
    %c0_i32_2 = arith.constant 0 : i32
    %5 = arith.addi %0, %c0_i32_2 : i32
    %c0_3 = arith.constant 0 : index
    %6 = arith.index_cast %5 : i32 to index
    %c1 = arith.constant 1 : index
    %c0_4 = arith.constant 0 : index
    %7 = vector.load %arg2[%c0_3, %6, %c1, %c0_4] : memref<1x10x10x4xbf16, #tpu.memory_space<vmem>>, vector<1x8x8x4xbf16>
    %8 = vector.shape_cast %7 : vector<1x8x8x4xbf16> to vector<8x8x4xbf16>
    %c0_i32_5 = arith.constant 0 : i32
    %9 = arith.addi %0, %c0_i32_5 : i32
    %c0_6 = arith.constant 0 : index
    %10 = arith.index_cast %9 : i32 to index
    %c2 = arith.constant 2 : index
    %c0_7 = arith.constant 0 : index
    %11 = vector.load %arg2[%c0_6, %10, %c2, %c0_7] : memref<1x10x10x4xbf16, #tpu.memory_space<vmem>>, vector<1x8x8x4xbf16>
    %12 = vector.shape_cast %11 : vector<1x8x8x4xbf16> to vector<8x8x4xbf16>
    %c1_i32 = arith.constant 1 : i32
    %13 = arith.addi %0, %c1_i32 : i32
    %c0_8 = arith.constant 0 : index
    %14 = arith.index_cast %13 : i32 to index
    %c0_9 = arith.constant 0 : index
    %c0_10 = arith.constant 0 : index
    %15 = vector.load %arg2[%c0_8, %14, %c0_9, %c0_10] : memref<1x10x10x4xbf16, #tpu.memory_space<vmem>>, vector<1x8x8x4xbf16>
    %16 = vector.shape_cast %15 : vector<1x8x8x4xbf16> to vector<8x8x4xbf16>
    %c1_i32_11 = arith.constant 1 : i32
    %17 = arith.addi %0, %c1_i32_11 : i32
    %c0_12 = arith.constant 0 : index
    %18 = arith.index_cast %17 : i32 to index
    %c1_13 = arith.constant 1 : index
    %c0_14 = arith.constant 0 : index
    %19 = vector.load %arg2[%c0_12, %18, %c1_13, %c0_14] : memref<1x10x10x4xbf16, #tpu.memory_space<vmem>>, vector<1x8x8x4xbf16>
    %20 = vector.shape_cast %19 : vector<1x8x8x4xbf16> to vector<8x8x4xbf16>
    %c1_i32_15 = arith.constant 1 : i32
    %21 = arith.addi %0, %c1_i32_15 : i32
    %c0_16 = arith.constant 0 : index
    %22 = arith.index_cast %21 : i32 to index
    %c2_17 = arith.constant 2 : index
    %c0_18 = arith.constant 0 : index
    %23 = vector.load %arg2[%c0_16, %22, %c2_17, %c0_18] : memref<1x10x10x4xbf16, #tpu.memory_space<vmem>>, vector<1x8x8x4xbf16>
    %24 = vector.shape_cast %23 : vector<1x8x8x4xbf16> to vector<8x8x4xbf16>
    %c2_i32 = arith.constant 2 : i32
    %25 = arith.addi %0, %c2_i32 : i32
    %c0_19 = arith.constant 0 : index
    %26 = arith.index_cast %25 : i32 to index
    %c0_20 = arith.constant 0 : index
    %c0_21 = arith.constant 0 : index
    %27 = vector.load %arg2[%c0_19, %26, %c0_20, %c0_21] : memref<1x10x10x4xbf16, #tpu.memory_space<vmem>>, vector<1x8x8x4xbf16>
    %28 = vector.shape_cast %27 : vector<1x8x8x4xbf16> to vector<8x8x4xbf16>
    %c2_i32_22 = arith.constant 2 : i32
    %29 = arith.addi %0, %c2_i32_22 : i32
    %c0_23 = arith.constant 0 : index
    %30 = arith.index_cast %29 : i32 to index
    %c1_24 = arith.constant 1 : index
    %c0_25 = arith.constant 0 : index
    %31 = vector.load %arg2[%c0_23, %30, %c1_24, %c0_25] : memref<1x10x10x4xbf16, #tpu.memory_space<vmem>>, vector<1x8x8x4xbf16>
    %32 = vector.shape_cast %31 : vector<1x8x8x4xbf16> to vector<8x8x4xbf16>
    %c2_i32_26 = arith.constant 2 : i32
    %33 = arith.addi %0, %c2_i32_26 : i32
    %c0_27 = arith.constant 0 : index
    %34 = arith.index_cast %33 : i32 to index
    %c2_28 = arith.constant 2 : index
    %c0_29 = arith.constant 0 : index
    %35 = vector.load %arg2[%c0_27, %34, %c2_28, %c0_29] : memref<1x10x10x4xbf16, #tpu.memory_space<vmem>>, vector<1x8x8x4xbf16>
    %36 = vector.shape_cast %35 : vector<1x8x8x4xbf16> to vector<8x8x4xbf16>
    %37 = tpu.concatenate %4, %8, %12, %16, %20, %24, %28, %32, %36 in 2 : vector<8x8x4xbf16>, vector<8x8x4xbf16>, vector<8x8x4xbf16>, vector<8x8x4xbf16>, vector<8x8x4xbf16>, vector<8x8x4xbf16>, vector<8x8x4xbf16>, vector<8x8x4xbf16>, vector<8x8x4xbf16> -> vector<8x8x36xbf16>
    %38 = vector.shape_cast %37 : vector<8x8x36xbf16> to vector<64x36xbf16>
    %c0_30 = arith.constant 0 : index
    %c0_31 = arith.constant 0 : index
    %39 = vector.load %arg3[%c0_30, %c0_31] : memref<36x128xbf16, #tpu.memory_space<vmem>>, vector<36x128xbf16>
    %cst = arith.constant dense<0.000000e+00> : vector<64x128xf32>
    %40 = tpu.matmul %38, %39, %cst {dimension_numbers = #tpu.dot_dimension_numbers<[1], [0], [0], [1], [0, 0, 1, 1], [], []>} : vector<64x36xbf16>, vector<36x128xbf16>, vector<64x128xf32> -> vector<64x128xf32>
    %41 = vector.shape_cast %40 : vector<64x128xf32> to vector<8x8x128xf32>
    %42 = arith.truncf %41 : vector<8x8x128xf32> to vector<8x8x128xbf16>
    %c0_32 = arith.constant 0 : index
    %c0_33 = arith.constant 0 : index
    %c0_34 = arith.constant 0 : index
    %c0_35 = arith.constant 0 : index
    %43 = vector.load %arg4[%c0_32, %c0_33, %c0_34, %c0_35] : memref<1x8x8x128xbf16, #tpu.memory_space<vmem>>, vector<1x8x8x128xbf16>
    %44 = vector.shape_cast %43 : vector<1x8x8x128xbf16> to vector<8x8x128xbf16>
    %45 = vector.shape_cast %42 : vector<8x8x128xbf16> to vector<1x8x8x128xbf16>
    tpu.vector_store %arg4[%c0_32, %c0_33, %c0_34, %c0_35], %45 {strides = array<i32>} : memref<1x8x8x128xbf16, #tpu.memory_space<vmem>>, vector<1x8x8x128xbf16>,
    %cst_36 = arith.constant dense<0.000000e+00> : vector<128xf32>
    %46 = vector.multi_reduction <add>, %40, %cst_36 [0] : vector<64x128xf32> to vector<128xf32>
    %47 = vector.shape_cast %46 : vector<128xf32> to vector<1x128xf32>
    %c0_37 = arith.constant 0 : index
    %c0_38 = arith.constant 0 : index
    %c0_39 = arith.constant 0 : index
    %c0_40 = arith.constant 0 : index
    %48 = vector.load %arg5[%c0_37, %c0_38, %c0_39, %c0_40] : memref<1x1x2x128xf32, #tpu.memory_space<vmem>>, vector<1x1x1x128xf32>
    %49 = vector.shape_cast %48 : vector<1x1x1x128xf32> to vector<1x128xf32>
    %50 = vector.shape_cast %47 : vector<1x128xf32> to vector<1x1x1x128xf32>
    tpu.vector_store %arg5[%c0_37, %c0_38, %c0_39, %c0_40], %50 {strides = array<i32>} : memref<1x1x2x128xf32, #tpu.memory_space<vmem>>, vector<1x1x1x128xf32>,
    %51 = arith.mulf %40, %40 : vector<64x128xf32>
    %cst_41 = arith.constant dense<0.000000e+00> : vector<128xf32>
    %52 = vector.multi_reduction <add>, %51, %cst_41 [0] : vector<64x128xf32> to vector<128xf32>
    %53 = vector.shape_cast %52 : vector<128xf32> to vector<1x128xf32>
    %c0_42 = arith.constant 0 : index
    %c0_43 = arith.constant 0 : index
    %c1_44 = arith.constant 1 : index
    %c0_45 = arith.constant 0 : index
    %54 = vector.load %arg5[%c0_42, %c0_43, %c1_44, %c0_45] : memref<1x1x2x128xf32, #tpu.memory_space<vmem>>, vector<1x1x1x128xf32>
    %55 = vector.shape_cast %54 : vector<1x1x1x128xf32> to vector<1x128xf32>
    %56 = vector.shape_cast %53 : vector<1x128xf32> to vector<1x1x1x128xf32>
    tpu.vector_store %arg5[%c0_42, %c0_43, %c1_44, %c0_45], %56 {strides = array<i32>} : memref<1x1x2x128xf32, #tpu.memory_space<vmem>>, vector<1x1x1x128xf32>,
    return
  }
  func.func @transform_0(%arg0: i32, %arg1: i32) -> (i32, i32, i32, i32) {
    %c0_i32 = arith.constant 0 : i32
    %c0_i32_0 = arith.constant 0 : i32
    %c0_i32_1 = arith.constant 0 : i32
    %c0_i32_2 = arith.constant 0 : i32
    return %arg0, %c0_i32, %c0_i32_0, %c0_i32_1 : i32, i32, i32, i32
  }
  func.func @transform_1(%arg0: i32, %arg1: i32) -> (i32, i32) {
    %c0_i32 = arith.constant 0 : i32
    %c0_i32_0 = arith.constant 0 : i32
    %c0_i32_1 = arith.constant 0 : i32
    return %c0_i32, %c0_i32_0 : i32, i32
  }
  func.func @transform_2(%arg0: i32, %arg1: i32) -> (i32, i32, i32, i32) {
    %c0_i32 = arith.constant 0 : i32
    %c0_i32_0 = arith.constant 0 : i32
    %c0_i32_1 = arith.constant 0 : i32
    return %arg0, %arg1, %c0_i32, %c0_i32_0 : i32, i32, i32, i32
  }
  func.func @transform_3(%arg0: i32, %arg1: i32) -> (i32, i32, i32, i32) {
    %c0_i32 = arith.constant 0 : i32
    %c0_i32_0 = arith.constant 0 : i32
    %c0_i32_1 = arith.constant 0 : i32
    return %arg0, %arg1, %c0_i32, %c0_i32_0 : i32, i32, i32, i32
  }
}

module attributes {stable_mosaic.version = 11 : i64} {
  func.func @_affine_relu_kernel(%arg0: i32, %arg1: i32, %arg2: memref<1x8x8x128xbf16, #tpu.memory_space<vmem>>, %arg3: memref<1x128xf32, #tpu.memory_space<vmem>>, %arg4: memref<1x128xf32, #tpu.memory_space<vmem>>, %arg5: memref<1x8x8x128xbf16, #tpu.memory_space<vmem>>) attributes {dimension_semantics = [#tpu.dimension_semantics<parallel>, #tpu.dimension_semantics<parallel>], iteration_bounds = array<i64: 2, 1>, scalar_prefetch = 0 : i64, scratch_operands = 0 : i64, tpu.core_type = #tpu.core_type<tc>, window_params = [{transform_indices = @transform_0, window_bounds = array<i64: 1, 8, 8, 128>}, {pipeline_mode = #tpu.pipeline_mode<synchronous>, transform_indices = @transform_1, window_bounds = array<i64: 1, 128>}, {pipeline_mode = #tpu.pipeline_mode<synchronous>, transform_indices = @transform_2, window_bounds = array<i64: 1, 128>}, {transform_indices = @transform_3, window_bounds = array<i64: 1, 8, 8, 128>}]} {
    %c0 = arith.constant 0 : index
    %c0_0 = arith.constant 0 : index
    %c0_1 = arith.constant 0 : index
    %c0_2 = arith.constant 0 : index
    %0 = vector.load %arg2[%c0, %c0_0, %c0_1, %c0_2] : memref<1x8x8x128xbf16, #tpu.memory_space<vmem>>, vector<1x8x8x128xbf16>
    %1 = arith.extf %0 : vector<1x8x8x128xbf16> to vector<1x8x8x128xf32>
    %c0_3 = arith.constant 0 : index
    %c0_4 = arith.constant 0 : index
    %2 = vector.load %arg3[%c0_3, %c0_4] : memref<1x128xf32, #tpu.memory_space<vmem>>, vector<1x128xf32>
    %3 = vector.shape_cast %2 : vector<1x128xf32> to vector<1x1x1x128xf32>
    %4 = vector.broadcast %3 : vector<1x1x1x128xf32> to vector<1x8x8x128xf32>
    %5 = arith.mulf %1, %4 : vector<1x8x8x128xf32>
    %c0_5 = arith.constant 0 : index
    %c0_6 = arith.constant 0 : index
    %6 = vector.load %arg4[%c0_5, %c0_6] : memref<1x128xf32, #tpu.memory_space<vmem>>, vector<1x128xf32>
    %7 = vector.shape_cast %6 : vector<1x128xf32> to vector<1x1x1x128xf32>
    %8 = vector.broadcast %7 : vector<1x1x1x128xf32> to vector<1x8x8x128xf32>
    %9 = arith.addf %5, %8 : vector<1x8x8x128xf32>
    %cst = arith.constant 0.000000e+00 : f32
    %10 = vector.broadcast %cst : f32 to vector<1x8x8x128xf32>
    %11 = arith.maximumf %9, %10 : vector<1x8x8x128xf32>
    %12 = arith.truncf %11 : vector<1x8x8x128xf32> to vector<1x8x8x128xbf16>
    %c0_7 = arith.constant 0 : index
    %c0_8 = arith.constant 0 : index
    %c0_9 = arith.constant 0 : index
    %c0_10 = arith.constant 0 : index
    %13 = vector.load %arg5[%c0_7, %c0_8, %c0_9, %c0_10] : memref<1x8x8x128xbf16, #tpu.memory_space<vmem>>, vector<1x8x8x128xbf16>
    tpu.vector_store %arg5[%c0_7, %c0_8, %c0_9, %c0_10], %12 {strides = array<i32>} : memref<1x8x8x128xbf16, #tpu.memory_space<vmem>>, vector<1x8x8x128xbf16>,
    return
  }
  func.func @transform_0(%arg0: i32, %arg1: i32) -> (i32, i32, i32, i32) {
    %c0_i32 = arith.constant 0 : i32
    %c0_i32_0 = arith.constant 0 : i32
    %c0_i32_1 = arith.constant 0 : i32
    return %arg0, %arg1, %c0_i32, %c0_i32_0 : i32, i32, i32, i32
  }
  func.func @transform_1(%arg0: i32, %arg1: i32) -> (i32, i32) {
    %c0_i32 = arith.constant 0 : i32
    %c0_i32_0 = arith.constant 0 : i32
    %c0_i32_1 = arith.constant 0 : i32
    return %c0_i32, %c0_i32_0 : i32, i32
  }
  func.func @transform_2(%arg0: i32, %arg1: i32) -> (i32, i32) {
    %c0_i32 = arith.constant 0 : i32
    %c0_i32_0 = arith.constant 0 : i32
    %c0_i32_1 = arith.constant 0 : i32
    return %c0_i32, %c0_i32_0 : i32, i32
  }
  func.func @transform_3(%arg0: i32, %arg1: i32) -> (i32, i32, i32, i32) {
    %c0_i32 = arith.constant 0 : i32
    %c0_i32_0 = arith.constant 0 : i32
    %c0_i32_1 = arith.constant 0 : i32
    return %arg0, %arg1, %c0_i32, %c0_i32_0 : i32, i32, i32, i32
  }
}

module attributes {stable_mosaic.version = 11 : i64} {
  func.func @_conv_stats_kernel(%arg0: i32, %arg1: i32, %arg2: memref<1x10x10x128xbf16, #tpu.memory_space<vmem>>, %arg3: memref<1152x128xbf16, #tpu.memory_space<vmem>>, %arg4: memref<1x8x8x128xbf16, #tpu.memory_space<vmem>>, %arg5: memref<1x1x2x128xf32, #tpu.memory_space<vmem>>) attributes {dimension_semantics = [#tpu.dimension_semantics<parallel>, #tpu.dimension_semantics<parallel>], iteration_bounds = array<i64: 2, 1>, scalar_prefetch = 0 : i64, scratch_operands = 0 : i64, tpu.core_type = #tpu.core_type<tc>, window_params = [{transform_indices = @transform_0, window_bounds = array<i64: 1, 10, 10, 128>}, {pipeline_mode = #tpu.pipeline_mode<synchronous>, transform_indices = @transform_1, window_bounds = array<i64: 1152, 128>}, {transform_indices = @transform_2, window_bounds = array<i64: 1, 8, 8, 128>}, {transform_indices = @transform_3, window_bounds = array<i64: 1, 1, 2, 128>}]} {
    %c8_i32 = arith.constant 8 : i32
    %0 = arith.muli %arg1, %c8_i32 : i32
    %c0_i32 = arith.constant 0 : i32
    %1 = arith.addi %0, %c0_i32 : i32
    %c0 = arith.constant 0 : index
    %2 = arith.index_cast %1 : i32 to index
    %c0_0 = arith.constant 0 : index
    %c0_1 = arith.constant 0 : index
    %3 = vector.load %arg2[%c0, %2, %c0_0, %c0_1] : memref<1x10x10x128xbf16, #tpu.memory_space<vmem>>, vector<1x8x8x128xbf16>
    %4 = vector.shape_cast %3 : vector<1x8x8x128xbf16> to vector<8x8x128xbf16>
    %c0_i32_2 = arith.constant 0 : i32
    %5 = arith.addi %0, %c0_i32_2 : i32
    %c0_3 = arith.constant 0 : index
    %6 = arith.index_cast %5 : i32 to index
    %c1 = arith.constant 1 : index
    %c0_4 = arith.constant 0 : index
    %7 = vector.load %arg2[%c0_3, %6, %c1, %c0_4] : memref<1x10x10x128xbf16, #tpu.memory_space<vmem>>, vector<1x8x8x128xbf16>
    %8 = vector.shape_cast %7 : vector<1x8x8x128xbf16> to vector<8x8x128xbf16>
    %c0_i32_5 = arith.constant 0 : i32
    %9 = arith.addi %0, %c0_i32_5 : i32
    %c0_6 = arith.constant 0 : index
    %10 = arith.index_cast %9 : i32 to index
    %c2 = arith.constant 2 : index
    %c0_7 = arith.constant 0 : index
    %11 = vector.load %arg2[%c0_6, %10, %c2, %c0_7] : memref<1x10x10x128xbf16, #tpu.memory_space<vmem>>, vector<1x8x8x128xbf16>
    %12 = vector.shape_cast %11 : vector<1x8x8x128xbf16> to vector<8x8x128xbf16>
    %c1_i32 = arith.constant 1 : i32
    %13 = arith.addi %0, %c1_i32 : i32
    %c0_8 = arith.constant 0 : index
    %14 = arith.index_cast %13 : i32 to index
    %c0_9 = arith.constant 0 : index
    %c0_10 = arith.constant 0 : index
    %15 = vector.load %arg2[%c0_8, %14, %c0_9, %c0_10] : memref<1x10x10x128xbf16, #tpu.memory_space<vmem>>, vector<1x8x8x128xbf16>
    %16 = vector.shape_cast %15 : vector<1x8x8x128xbf16> to vector<8x8x128xbf16>
    %c1_i32_11 = arith.constant 1 : i32
    %17 = arith.addi %0, %c1_i32_11 : i32
    %c0_12 = arith.constant 0 : index
    %18 = arith.index_cast %17 : i32 to index
    %c1_13 = arith.constant 1 : index
    %c0_14 = arith.constant 0 : index
    %19 = vector.load %arg2[%c0_12, %18, %c1_13, %c0_14] : memref<1x10x10x128xbf16, #tpu.memory_space<vmem>>, vector<1x8x8x128xbf16>
    %20 = vector.shape_cast %19 : vector<1x8x8x128xbf16> to vector<8x8x128xbf16>
    %c1_i32_15 = arith.constant 1 : i32
    %21 = arith.addi %0, %c1_i32_15 : i32
    %c0_16 = arith.constant 0 : index
    %22 = arith.index_cast %21 : i32 to index
    %c2_17 = arith.constant 2 : index
    %c0_18 = arith.constant 0 : index
    %23 = vector.load %arg2[%c0_16, %22, %c2_17, %c0_18] : memref<1x10x10x128xbf16, #tpu.memory_space<vmem>>, vector<1x8x8x128xbf16>
    %24 = vector.shape_cast %23 : vector<1x8x8x128xbf16> to vector<8x8x128xbf16>
    %c2_i32 = arith.constant 2 : i32
    %25 = arith.addi %0, %c2_i32 : i32
    %c0_19 = arith.constant 0 : index
    %26 = arith.index_cast %25 : i32 to index
    %c0_20 = arith.constant 0 : index
    %c0_21 = arith.constant 0 : index
    %27 = vector.load %arg2[%c0_19, %26, %c0_20, %c0_21] : memref<1x10x10x128xbf16, #tpu.memory_space<vmem>>, vector<1x8x8x128xbf16>
    %28 = vector.shape_cast %27 : vector<1x8x8x128xbf16> to vector<8x8x128xbf16>
    %c2_i32_22 = arith.constant 2 : i32
    %29 = arith.addi %0, %c2_i32_22 : i32
    %c0_23 = arith.constant 0 : index
    %30 = arith.index_cast %29 : i32 to index
    %c1_24 = arith.constant 1 : index
    %c0_25 = arith.constant 0 : index
    %31 = vector.load %arg2[%c0_23, %30, %c1_24, %c0_25] : memref<1x10x10x128xbf16, #tpu.memory_space<vmem>>, vector<1x8x8x128xbf16>
    %32 = vector.shape_cast %31 : vector<1x8x8x128xbf16> to vector<8x8x128xbf16>
    %c2_i32_26 = arith.constant 2 : i32
    %33 = arith.addi %0, %c2_i32_26 : i32
    %c0_27 = arith.constant 0 : index
    %34 = arith.index_cast %33 : i32 to index
    %c2_28 = arith.constant 2 : index
    %c0_29 = arith.constant 0 : index
    %35 = vector.load %arg2[%c0_27, %34, %c2_28, %c0_29] : memref<1x10x10x128xbf16, #tpu.memory_space<vmem>>, vector<1x8x8x128xbf16>
    %36 = vector.shape_cast %35 : vector<1x8x8x128xbf16> to vector<8x8x128xbf16>
    %37 = tpu.concatenate %4, %8, %12, %16, %20, %24, %28, %32, %36 in 2 : vector<8x8x128xbf16>, vector<8x8x128xbf16>, vector<8x8x128xbf16>, vector<8x8x128xbf16>, vector<8x8x128xbf16>, vector<8x8x128xbf16>, vector<8x8x128xbf16>, vector<8x8x128xbf16>, vector<8x8x128xbf16> -> vector<8x8x1152xbf16>
    %38 = vector.shape_cast %37 : vector<8x8x1152xbf16> to vector<64x1152xbf16>
    %c0_30 = arith.constant 0 : index
    %c0_31 = arith.constant 0 : index
    %39 = vector.load %arg3[%c0_30, %c0_31] : memref<1152x128xbf16, #tpu.memory_space<vmem>>, vector<1152x128xbf16>
    %cst = arith.constant dense<0.000000e+00> : vector<64x128xf32>
    %40 = tpu.matmul %38, %39, %cst {dimension_numbers = #tpu.dot_dimension_numbers<[1], [0], [0], [1], [0, 0, 1, 1], [], []>} : vector<64x1152xbf16>, vector<1152x128xbf16>, vector<64x128xf32> -> vector<64x128xf32>
    %41 = vector.shape_cast %40 : vector<64x128xf32> to vector<8x8x128xf32>
    %42 = arith.truncf %41 : vector<8x8x128xf32> to vector<8x8x128xbf16>
    %c0_32 = arith.constant 0 : index
    %c0_33 = arith.constant 0 : index
    %c0_34 = arith.constant 0 : index
    %c0_35 = arith.constant 0 : index
    %43 = vector.load %arg4[%c0_32, %c0_33, %c0_34, %c0_35] : memref<1x8x8x128xbf16, #tpu.memory_space<vmem>>, vector<1x8x8x128xbf16>
    %44 = vector.shape_cast %43 : vector<1x8x8x128xbf16> to vector<8x8x128xbf16>
    %45 = vector.shape_cast %42 : vector<8x8x128xbf16> to vector<1x8x8x128xbf16>
    tpu.vector_store %arg4[%c0_32, %c0_33, %c0_34, %c0_35], %45 {strides = array<i32>} : memref<1x8x8x128xbf16, #tpu.memory_space<vmem>>, vector<1x8x8x128xbf16>,
    %cst_36 = arith.constant dense<0.000000e+00> : vector<128xf32>
    %46 = vector.multi_reduction <add>, %40, %cst_36 [0] : vector<64x128xf32> to vector<128xf32>
    %47 = vector.shape_cast %46 : vector<128xf32> to vector<1x128xf32>
    %c0_37 = arith.constant 0 : index
    %c0_38 = arith.constant 0 : index
    %c0_39 = arith.constant 0 : index
    %c0_40 = arith.constant 0 : index
    %48 = vector.load %arg5[%c0_37, %c0_38, %c0_39, %c0_40] : memref<1x1x2x128xf32, #tpu.memory_space<vmem>>, vector<1x1x1x128xf32>
    %49 = vector.shape_cast %48 : vector<1x1x1x128xf32> to vector<1x128xf32>
    %50 = vector.shape_cast %47 : vector<1x128xf32> to vector<1x1x1x128xf32>
    tpu.vector_store %arg5[%c0_37, %c0_38, %c0_39, %c0_40], %50 {strides = array<i32>} : memref<1x1x2x128xf32, #tpu.memory_space<vmem>>, vector<1x1x1x128xf32>,
    %51 = arith.mulf %40, %40 : vector<64x128xf32>
    %cst_41 = arith.constant dense<0.000000e+00> : vector<128xf32>
    %52 = vector.multi_reduction <add>, %51, %cst_41 [0] : vector<64x128xf32> to vector<128xf32>
    %53 = vector.shape_cast %52 : vector<128xf32> to vector<1x128xf32>
    %c0_42 = arith.constant 0 : index
    %c0_43 = arith.constant 0 : index
    %c1_44 = arith.constant 1 : index
    %c0_45 = arith.constant 0 : index
    %54 = vector.load %arg5[%c0_42, %c0_43, %c1_44, %c0_45] : memref<1x1x2x128xf32, #tpu.memory_space<vmem>>, vector<1x1x1x128xf32>
    %55 = vector.shape_cast %54 : vector<1x1x1x128xf32> to vector<1x128xf32>
    %56 = vector.shape_cast %53 : vector<1x128xf32> to vector<1x1x1x128xf32>
    tpu.vector_store %arg5[%c0_42, %c0_43, %c1_44, %c0_45], %56 {strides = array<i32>} : memref<1x1x2x128xf32, #tpu.memory_space<vmem>>, vector<1x1x1x128xf32>,
    return
  }
  func.func @transform_0(%arg0: i32, %arg1: i32) -> (i32, i32, i32, i32) {
    %c0_i32 = arith.constant 0 : i32
    %c0_i32_0 = arith.constant 0 : i32
    %c0_i32_1 = arith.constant 0 : i32
    %c0_i32_2 = arith.constant 0 : i32
    return %arg0, %c0_i32, %c0_i32_0, %c0_i32_1 : i32, i32, i32, i32
  }
  func.func @transform_1(%arg0: i32, %arg1: i32) -> (i32, i32) {
    %c0_i32 = arith.constant 0 : i32
    %c0_i32_0 = arith.constant 0 : i32
    %c0_i32_1 = arith.constant 0 : i32
    return %c0_i32, %c0_i32_0 : i32, i32
  }
  func.func @transform_2(%arg0: i32, %arg1: i32) -> (i32, i32, i32, i32) {
    %c0_i32 = arith.constant 0 : i32
    %c0_i32_0 = arith.constant 0 : i32
    %c0_i32_1 = arith.constant 0 : i32
    return %arg0, %arg1, %c0_i32, %c0_i32_0 : i32, i32, i32, i32
  }
  func.func @transform_3(%arg0: i32, %arg1: i32) -> (i32, i32, i32, i32) {
    %c0_i32 = arith.constant 0 : i32
    %c0_i32_0 = arith.constant 0 : i32
    %c0_i32_1 = arith.constant 0 : i32
    return %arg0, %arg1, %c0_i32, %c0_i32_0 : i32, i32, i32, i32
  }
}

</mosaic_0001>

<bundles_post_ra>
// kernel: down_forward.7
= control target key start
LH: loop header
LB: loop body
LE: loop exit
PB: predicated region body
PF: predicated region fallthrough
CT: control target
= control target key end

     0   :  { %s486_s12 = smov 0   ;;  %s488_s13 = smov 0   ;;  %s532_s0 = inlined_call_operand.vmem [shape: bf16[2,8,8,128], index: 0, kind: input, shape index: {}]   ;;  %s533_s1 = inlined_call_operand.vmem [shape: f32[1,128], index: 1, kind: input, shape index: {}]   ;;  %s534_s2 = inlined_call_operand.vmem [shape: f32[1,128], index: 2, kind: input, shape index: {}]   ;;  %s535_s3 = inlined_call_operand.vmem [shape: bf16[2,8,8,128], index: 3, kind: output, shape index: {}]  }
   0x1   :  { %s490_s14 = smov 0  }
   0x2 LB: > { %s25_s15 = sadd.s32 1, %s460_s13  ;;  %p365_p0 = scmp.ge.s32.totalorder %s464_s14, 1  ;;  %s464_s14 = sphi %s490_s14, %s13_s14   ;;  %s460_s13 = sphi %s488_s13, %s537_s13   ;;  %s456_s12 = sphi %s486_s12, %s536_s12  }
   0x3   : > { %p27_p1 = scmp.ge.s32.totalorder %s25_s15, 2  ;;  %p158_p2 = scmp.lt.s32.totalorder %s464_s14, 3 }
   0x5   : > { %s539_s15 = smov (%p27_p1, %s25_s15), 0  ;;  %p159_p3 = pnand %p365_p0, %p158_p2 }
   0x6   : > { %p191_p4 = scmp.lt.s32.totalorder (!%p159_p3), %s456_s12, 1 }
   0x7   : > { %162 = sbr.rel (%p159_p3) target bundleno = 30 (0x1e), region = 32 }
   0xc   : > { %s541_s12 = smov (!%p191_p4, %s456_s12), 1  ;;  %v440_v0 = vld [vmem:[%s533_s1] ss:$0 sm:$0xff] }
   0xd   : > { %s372_s16 = sshll.u32 %s541_s12, 5  ;;  %v441_v6 = vld [vmem:[%s534_s2] ss:$0 sm:$0xff] }
   0xe   : > { %s198_s19 = scalar_lea.vmem %s532_s0, %s372_s16  ;;  %s208_s26 = scalar_lea.vmem %s535_s3, %s372_s16 }
   0xf   : > { %v375_v1 = vld [vmem:[%s198_s19] sm:$0xff]   ;;  %v410_v2 = vld [vmem:[%s198_s19 + $0x8] sm:$0xff]   ;;  %v411_v3 = vld [vmem:[%s198_s19 + $0x10] sm:$0xff]  }
  0x10   : > { %v376_v4 = vunpack.c.l.bf16 %v375_v1  ;;  %v377_v5 = vunpack.c.h.bf16 %v375_v1  ;;  %v380_v7 = vunpack.c.l.bf16 %v410_v2  ;;  %v381_v8 = vunpack.c.h.bf16 %v410_v2  ;;  %v412_v9 = vld [vmem:[%s198_s19 + $0x18] sm:$0xff]  }
  0x11   : > { %v384_v10 = vunpack.c.l.bf16 %v411_v3  ;;  %v385_v11 = vunpack.c.h.bf16 %v411_v3  ;;  %v388_v12 = vunpack.c.l.bf16 %v412_v9  ;;  %v389_v13 = vunpack.c.h.bf16 %v412_v9 }
  0x12   : > { %v230_v14 = vmul.f32 %v440_v0, %v376_v4  ;;  %v231_v15 = vmul.f32 %v440_v0, %v377_v5  ;;  %v232_v16 = vmul.f32 %v440_v0, %v380_v7  ;;  %v233_v17 = vmul.f32 %v440_v0, %v381_v8 }
  0x13   : > { %v234_v18 = vmul.f32 %v440_v0, %v384_v10  ;;  %v235_v19 = vmul.f32 %v440_v0, %v385_v11  ;;  %v236_v20 = vmul.f32 %v440_v0, %v388_v12  ;;  %v237_v21 = vmul.f32 %v440_v0, %v389_v13 }
  0x14   : > { %v242_v22 = vadd.f32 %v441_v6, %v230_v14  ;;  %v243_v23 = vadd.f32 %v441_v6, %v231_v15  ;;  %v244_v24 = vadd.f32 %v441_v6, %v232_v16  ;;  %v245_v25 = vadd.f32 %v441_v6, %v233_v17 }
  0x15   : > { %v246_v26 = vadd.f32 %v441_v6, %v234_v18  ;;  %v247_v27 = vadd.f32 %v441_v6, %v235_v19  ;;  %v248_v28 = vadd.f32 %v441_v6, %v236_v20  ;;  %v249_v29 = vadd.f32 %v441_v6, %v237_v21 }
  0x16   : > { %v250_v30 = vmax.f32 %v242_v22, 0.0  ;;  %v251_v31 = vmax.f32 %v243_v23, 0.0  ;;  %v252_v32 = vmax.f32 %v244_v24, 0.0  ;;  %v253_v33 = vmax.f32 %v245_v25, 0.0 }
  0x17   : > { %v254_v34 = vmax.f32 %v246_v26, 0.0  ;;  %v255_v35 = vmax.f32 %v247_v27, 0.0  ;;  %v256_v36 = vmax.f32 %v248_v28, 0.0  ;;  %v257_v37 = vmax.f32 %v249_v29, 0.0 }
  0x18   : > { %v393_v38 = vpack.c.bf16 %v251_v31, %v250_v30  ;;  %v398_v39 = vpack.c.bf16 %v253_v33, %v252_v32 }
  0x19   : > { %v403_v40 = vpack.c.bf16 %v255_v35, %v254_v34  ;;  %v408_v41 = vpack.c.bf16 %v257_v37, %v256_v36 }
  0x1a   : > { %394 = vst [vmem:[%s208_s26] sm:$0xff] %v393_v38  }
  0x1b   : > { %413 = vst [vmem:[%s208_s26 + $0x8] sm:$0xff] %v398_v39  }
  0x1c   : > { %414 = vst [vmem:[%s208_s26 + $0x10] sm:$0xff] %v403_v40  }
  0x1d   : > { %415 = vst [vmem:[%s208_s26 + $0x18] sm:$0xff] %v408_v41  }
  0x1e PF: > { %s13_s14 = sadd.s32 1, %s464_s14   ;;  %s536_s12 = smov %s460_s13 }
  0x1f   : > { %p10_p5 = scmp.ge.s32.totalorder %s13_s14, 4   ;;  %s537_s13 = smov %s539_s15 }
  0x21   :  { %12 = sbr.rel (!%p10_p5) target bundleno = 2 (0x2), region = 62 }

// kernel: down_forward.6
= control target key start
LH: loop header
LB: loop body
LE: loop exit
PB: predicated region body
PF: predicated region fallthrough
CT: control target
= control target key end

     0   :  { %s1431_s12 = smov 0   ;;  %s1433_s13 = smov 0   ;;  %s1875_s0 = inlined_call_operand.vmem [shape: bf16[2,10,10,4], index: 0, kind: input, shape index: {}]   ;;  %s1876_s1 = inlined_call_operand.vmem [shape: bf16[36,128], index: 1, kind: input, shape index: {}]   ;;  %s1877_s2 = inlined_call_operand.vmem [shape: bf16[2,8,8,128], index: 2, kind: output, shape index: {0}]   ;;  %s1878_s3 = inlined_call_operand.vmem [shape: f32[2,1,2,128], index: 3, kind: output, shape index: {1}]  }
   0x1   :  { %s1435_s14 = smov 0  }
   0x2 LB: > { %s26_s15 = sadd.s32 1, %s1397_s13  ;;  %p1244_p0 = scmp.ge.s32.totalorder %s1401_s14, 1  ;;  %s1401_s14 = sphi %s1435_s14, %s14_s14   ;;  %s1397_s13 = sphi %s1433_s13, %s1880_s13   ;;  %s1393_s12 = sphi %s1431_s12, %s1879_s12  }
   0x3   : > { %p28_p1 = scmp.ge.s32.totalorder %s26_s15, 2  ;;  %p156_p2 = scmp.lt.s32.totalorder %s1401_s14, 3 }
   0x5   : > { %s1882_s15 = smov (%p28_p1, %s26_s15), 0  ;;  %p157_p3 = pnand %p1244_p0, %p156_p2 }
   0x6   : > { %p191_p4 = scmp.lt.s32.totalorder (!%p157_p3), %s1393_s12, 1  ;;  %s1403_s20 = smov (!%p157_p3), 12  }
   0x7   : > { %160 = sbr.rel (%p157_p3) target bundleno = 467 (0x1d3), region = 28  ;;  %s1404_s21 = smov (!%p157_p3), 8  }
   0x8   : > { %s1405_s22 = smov (!%p157_p3), 4   ;;  %s1406_s23 = smov (!%p157_p3), 16  }
   0x9   : > { %s1407_s24 = smov (!%p157_p3), 20   ;;  %s1408_s25 = smov (!%p157_p3), 24  }
   0xa   : > { %s1409_s26 = smov (!%p157_p3), 28   ;;  %s1410_s27 = smov (!%p157_p3), 32  }
   0xc   : > { %s1884_s12 = smov (!%p191_p4, %s1393_s12), 1  ;;  %vm826_vm0 = vcmask 31744   ;;  %vm851_vm1 = vcmask 64512   ;;  %vm868_vm2 = vcmask 97280   ;;  %vm885_vm3 = vcmask 130048  }
   0xd   : > { %s1346_s16 = smul.u32 80, %s1884_s12  ;;  %vm1023_vm4 = vcmask 1041408   ;;  %vm902_vm5 = vcmask 162816   ;;  %vm936_vm6 = vcmask 228352   ;;  %vm919_vm7 = vcmask 195584   ;;  %s1311_s7 = sshll.u32 %s1884_s12, 5 }
   0xe   : > { %vm953_vm8 = vcmask 261120   ;;  %vm1010_vm9 = vcmask 293888   ;;  %s1856_s10 = scalar_lea.vmem %s1877_s2, %s1311_s7  ;;  %s1248_s11 = sshll.u32 %s1884_s12, 1 }
   0xf   : > { %s1455_s19 = scalar_lea.vmem %s1875_s0, %s1346_s16  ;;  %s212_s18 = scalar_lea.vmem %s1878_s3, %s1248_s11 }
  0x10   : > { %v1249_v0 = vld [vmem:[%s1455_s19 + $0x8] sm:$0xf]  ;;  %v230_v1 = vld [vmem:[%s1455_s19 + $0x24] sm:$0x1]  ;;  %v238_v3 = vld [vmem:[%s1455_s19 + $0x20] sm:$0xe] }
  0x11   : > { %v466_v2 = vunpack.c.l.b16 %v1249_v0  ;;  %v323_v4 = vunpack.c.l.b16 %v230_v1  ;;  %v1461_v5 = vld [vmem:[%s1455_s19 + $0x20] sm:$0xf]  ;;  %v226_v6 = vld [vmem:[%s1455_s19 + $0x4] sm:$0x1]  ;;  %v422_v7 = vunpack.c.l.b16 %v238_v3  ;;  %v227_v12 = vld [vmem:[%s1455_s19 + $0xc] sm:$0x1] }
  0x12   : > { %v322_v8 = vunpack.c.l.b16 %v1461_v5  ;;  %v234_v9 = vld [vmem:[%s1455_s19] sm:$0xe]  ;;  %v315_v10 = vunpack.c.l.b16 %v226_v6  ;;  %v235_v16 = vld [vmem:[%s1455_s19 + $0x8] sm:$0xe]  ;;  %v317_v20 = vunpack.c.l.b16 %v227_v12  ;;  %v231_v28 = vld [vmem:[%s1455_s19 + $0x2c] sm:$0x1] }
  0x13   : > { %v1467_v11 = vld [vmem:[%s1455_s19] sm:$0xf]  ;;  %v474_v13 = vpack.c.b16 %v466_v2, %v466_v2  ;;  %v418_v14 = vunpack.c.l.b16 %v234_v9  ;;  %v1473_v17 = vld [vmem:[%s1455_s19 + $0x8] sm:$0xf]  ;;  %v430_v18 = vpack.c.b16 %v323_v4, %v422_v7  ;;  %v419_v23 = vunpack.c.l.b16 %v235_v16  ;;  %v1484_v36 = vld [vmem:[%s1455_s19 + $0xc] sm:$0x1] }
  0x14   : > { %v314_v15 = vunpack.c.l.b16 %v1467_v11  ;;  %v334_v19 = vpack.c.b16 %v323_v4, %v322_v8  ;;  %v316_v24 = vunpack.c.l.b16 %v1473_v17  ;;  %v1478_v25 = vld [vmem:[%s1455_s19 + $0x28] sm:$0xf]  ;;  %v325_v40 = vunpack.c.l.b16 %v231_v28  ;;  %v1488_v41 = vld [vmem:[%s1455_s19 + $0x14] sm:$0x1]  ;;  %v1250_v43 = vld [vmem:[%s1455_s19 + $0x10] sm:$0xf] }
  0x15   : > { %482 = vrot.lane.b32.xlu0 %v474_v13, %s1403_s20  ;;  %v426_v21 = vpack.c.b16 %v315_v10, %v418_v14  ;;  %v438_v26 = vrot.slane %v430_v18, 1  ;;  %v324_v35 = vunpack.c.l.b16 %v1478_v25  ;;  %v427_v38 = vpack.c.b16 %v317_v20, %v419_v23  ;;  %v239_v53 = vld [vmem:[%s1455_s19 + $0x28] sm:$0xe]  ;;  %v1496_v54 = vld [vmem:[%s1455_s19 + $0x10] sm:$0xf] }
  0x16   : > { %v330_v22 = vpack.c.b16 %v315_v10, %v314_v15  ;;  %v369_v27 = vshll.u32 %v334_v19, 16  ;;  %v331_v32 = vpack.c.b16 %v317_v20, %v316_v24  ;;  %v367_v33 = vshrl.u32 %v334_v19, 16  ;;  %v1499_v55 = vld [vmem:[%s1455_s19 + $0x14] sm:$0x1]  ;;  %v1510_v0 = vld [vmem:[%s1455_s19 + $0x18] sm:$0xf] }
  0x17   : > { %v434_v29 = vrot.slane %v426_v21, 1  ;;  %450 = vrot.lane.b32.xlu2 %v438_v26, %s1404_s21  ;;  %v335_v44 = vpack.c.b16 %v325_v40, %v324_v35  ;;  %v506_v45 = vunpack.c.l.b16 %v1484_v36  ;;  %v507_v47 = vunpack.c.l.b16 %v1488_v41  ;;  %v1513_v1 = vld [vmem:[%s1455_s19 + $0x1c] sm:$0x1]  ;;  %v1253_v24 = vld [vmem:[%s1455_s19 + $0x28] sm:$0xf] }
  0x18   : > { %v339_v30 = vshrl.u32 %v330_v22, 16  ;;  %v341_v31 = vshll.u32 %v330_v22, 16  ;;  %v371_v34 = vrot.slane %v369_v27, 1  ;;  %v348_v39 = vshll.u32 %v331_v32, 16  ;;  %v1553_v36 = vld [vmem:[%s1455_s19 + $0x34] sm:$0x1] }
  0x19   : > { %442 = vrot.lane.b32.xlu1 %v434_v29, %s1404_s21  ;;  %v435_v48 = vrot.slane %v427_v38, 1  ;;  %v346_v49 = vshrl.u32 %v331_v32, 16  ;;  %v376_v51 = vshll.u32 %v335_v44, 16  ;;  %v467_v52 = vunpack.c.l.b16 %v1250_v43  ;;  %v1526_v32 = vld [vmem:[%s1455_s19 + $0x2c] sm:$0x1] }
  0x1a   : > { %v343_v37 = vrot.slane %v341_v31, 1  ;;  %v372_v46 = vor.u32 %v371_v34, %v367_v33  ;;  %v350_v50 = vrot.slane %v348_v39, 1  ;;  %v514_v56 = vpack.c.b16 %v506_v45, %v466_v2  ;;  %v1266_v31 = vld [vmem:[%s1455_s19 + $0x10] sm:$0xe]  ;;  %v1265_v34 = vld [vmem:[%s1455_s19 + $0x8] sm:$0xe] }
  0x1b   : > { %v374_v57 = vshrl.u32 %v335_v44, 16  ;;  %v378_v58 = vrot.slane %v376_v51, 1  ;;  %v515_v59 = vpack.c.b16 %v507_v47, %v467_v52  ;;  %v423_v61 = vunpack.c.l.b16 %v239_v53  ;;  %v1254_v33 = vld [vmem:[%s1455_s19 + $0x30] sm:$0xf]  ;;  %v1534_v44 = vld [vmem:[%s1455_s19 + $0x34] sm:$0x1] }
  0x1c   : > { %v344_v42 = vor.u32 %v343_v37, %v339_v30  ;;  %v351_v60 = vor.u32 %v350_v50, %v346_v49  ;;  %v318_v62 = vunpack.c.l.b16 %v1496_v54  ;;  %v319_v63 = vunpack.c.l.b16 %v1499_v55  ;;  %v236_v43 = vld [vmem:[%s1455_s19 + $0x10] sm:$0xe] }
  0x1d   : > { %v475_v2 = vpack.c.b16 %v467_v52, %v467_v52  ;;  %v379_v3 = vor.u32 %v378_v58, %v374_v57  ;;  %v525_v4 = vshll.u32 %v514_v56, 16  ;;  %v532_v6 = vshll.u32 %v515_v59, 16  ;;  %v237_v52 = vld [vmem:[%s1455_s19 + $0x18] sm:$0xe] }
  0x1e   : > { %394 = vrot.lane.b32.xlu0 %v344_v42, %s1405_s22  ;;  %v431_v7 = vpack.c.b16 %v325_v40, %v423_v61  ;;  %v332_v8 = vpack.c.b16 %v319_v63, %v318_v62  ;;  %v320_v9 = vunpack.c.l.b16 %v1510_v0  ;;  %v321_v10 = vunpack.c.l.b16 %v1513_v1 }
  0x1f   : > { %402 = vrot.lane.b32.xlu2 %v372_v46, %s1405_s22  ;;  %v523_v12 = vshrl.u32 %v514_v56, 16  ;;  %v530_v13 = vshrl.u32 %v515_v59, 16  ;;  %v534_v14 = vrot.slane %v532_v6, 1  ;;  %v527_v16 = vrot.slane %v525_v4, 1  ;;  %v1550_v59 = vld [vmem:[%s1455_s19 + $0x30] sm:$0xf] }
  0x20   : > { %v439_v15 = vrot.slane %v431_v7, 1  ;;  %v355_v18 = vshll.u32 %v332_v8, 16  ;;  %v333_v19 = vpack.c.b16 %v321_v10, %v320_v9  ;;  %v353_v22 = vshrl.u32 %v332_v8, 16  ;;  %v1563_v4 = vld [vmem:[%s1455_s19 + $0x3c] sm:$0x1] }
  0x21   : > { %444 = vrot.lane.b32.xlu1 %v435_v48, %s1404_s21  ;;  %v535_v20 = vor.u32 %v534_v14, %v530_v13  ;;  %v528_v21 = vor.u32 %v527_v16, %v523_v12  ;;  %v470_v27 = vunpack.c.l.b16 %v1253_v24  ;;  %v603_v37 = vunpack.c.l.b16 %v1266_v31  ;;  %v1270_v31 = vld [vmem:[%s1455_s19 + $0x30] sm:$0xe] }
  0x22   : > { %v357_v23 = vrot.slane %v355_v18, 1  ;;  %v362_v26 = vshll.u32 %v333_v19, 16  ;;  %v360_v29 = vshrl.u32 %v333_v19, 16  ;;  %v510_v38 = vunpack.c.l.b16 %v1526_v32 }
  0x23   : > { %v478_v35 = vpack.c.b16 %v470_v27, %v470_v27  ;;  %v471_v40 = vunpack.c.l.b16 %v1254_v33  ;;  %v602_v42 = vunpack.c.l.b16 %v1265_v34  ;;  %v611_v46 = vpack.c.b16 %v507_v47, %v603_v37 }
  0x24   : > { %v358_v28 = vor.u32 %v357_v23, %v353_v22  ;;  %v364_v30 = vrot.slane %v362_v26, 1  ;;  %v518_v48 = vpack.c.b16 %v510_v38, %v470_v27  ;;  %v420_v51 = vunpack.c.l.b16 %v236_v43  ;;  %v1251_v27 = vld [vmem:[%s1455_s19 + $0x18] sm:$0xf] }
  0x25   : > { %v479_v49 = vpack.c.b16 %v471_v40, %v471_v40  ;;  %v610_v50 = vpack.c.b16 %v506_v45, %v602_v42  ;;  %v511_v53 = vunpack.c.l.b16 %v1534_v44  ;;  %v619_v55 = vrot.slane %v611_v46, 1  ;;  %v1588_v42 = vld [vmem:[%s1455_s19 + $0x1c] sm:$0x1] }
  0x26   : > { %396 = vrot.lane.b32.xlu0 %v351_v60, %s1405_s22  ;;  %v365_v39 = vor.u32 %v364_v30, %v360_v29  ;;  %v553_v56 = vshll.u32 %v518_v48, 16  ;;  %v421_v57 = vunpack.c.l.b16 %v237_v52  ;;  %v428_v47 = vpack.c.b16 %v319_v63, %v420_v51  ;;  %v1579_v29 = vld [vmem:[%s1455_s19 + $0x14] sm:$0x1] }
  0x27   : > { %404 = vrot.lane.b32.xlu2 %v379_v3, %s1405_s22  ;;  %v618_v41 = vrot.slane %v610_v50, 1  ;;  %v519_v58 = vpack.c.b16 %v511_v53, %v471_v40  ;;  %v551_v45 = vshrl.u32 %v518_v48, 16  ;;  %v326_v63 = vunpack.c.l.b16 %v1550_v59  ;;  %v1560_v3 = vld [vmem:[%s1455_s19 + $0x38] sm:$0xf]  ;;  %v1269_v40 = vld [vmem:[%s1455_s19 + $0x28] sm:$0xe] }
  0x28   : > { %v555_v60 = vrot.slane %v553_v56, 1  ;;  %v429_v61 = vpack.c.b16 %v321_v10, %v421_v57  ;;  %v436_v62 = vrot.slane %v428_v47, 1  ;;  %v1274_v10 = vld [vmem:[%s1455_s19 + $0x18] sm:$0xf]  ;;  %v328_v13 = vunpack.c.l.b16 %v1560_v3  ;;  %v240_v47 = vld [vmem:[%s1455_s19 + $0x30] sm:$0xe] }
  0x29   : > { %484 = vrot.lane.b32.xlu1 %v475_v2, %s1403_s20  ;;  %v560_v1 = vshll.u32 %v519_v58, 16  ;;  %v327_v2 = vunpack.c.l.b16 %v1553_v36  ;;  %v558_v8 = vshrl.u32 %v519_v58, 16  ;;  %v329_v14 = vunpack.c.l.b16 %v1563_v4 }
  0x2a   : > { %v556_v6 = vor.u32 %v555_v60, %v551_v45  ;;  %v437_v7 = vrot.slane %v429_v61, 1  ;;  %v651_v16 = vunpack.c.l.b16 %v1274_v10  ;;  %v468_v30 = vunpack.c.l.b16 %v1251_v27  ;;  %v1604_v45 = vld [vmem:[%s1455_s19 + $0x24] sm:$0x1]  ;;  %v1607_v60 = vld [vmem:[%s1455_s19 + $0x1c] sm:$0x1] }
  0x2b   : > { %v562_v9 = vrot.slane %v560_v1, 1  ;;  %v336_v12 = vpack.c.b16 %v327_v2, %v326_v63  ;;  %v690_v33 = vunpack.c.l.b16 %v1579_v29  ;;  %v607_v43 = vunpack.c.l.b16 %v1270_v31  ;;  %v1277_v27 = vld [vmem:[%s1455_s19 + $0x30] sm:$0xf]  ;;  %v1278_v31 = vld [vmem:[%s1455_s19 + $0x38] sm:$0xf] }
  0x2c   : > { %v659_v22 = vpack.c.b16 %v651_v16, %v651_v16  ;;  %v476_v46 = vpack.c.b16 %v468_v30, %v468_v30  ;;  %v606_v51 = vunpack.c.l.b16 %v1269_v40  ;;  %v691_v52 = vunpack.c.l.b16 %v1588_v42 }
  0x2d   : > { %v563_v18 = vor.u32 %v562_v9, %v558_v8  ;;  %v381_v23 = vshrl.u32 %v336_v12, 16  ;;  %v509_v1 = vunpack.c.l.b16 %v1604_v45  ;;  %v508_v32 = vunpack.c.l.b16 %v1607_v60 }
  0x2e   : > { %452 = vrot.lane.b32.xlu0 %v439_v15, %s1404_s21  ;;  %v1273_v15 = vld [vmem:[%s1455_s19 + $0x10] sm:$0xf]  ;;  %v699_v58 = vpack.c.b16 %v691_v52, %v651_v16 }
  0x2f   : > { %580 = vrot.lane.b32.xlu2 %v535_v20, %s1406_s23  ;;  %v650_v19 = vunpack.c.l.b16 %v1273_v15  ;;  %v383_v20 = vshll.u32 %v336_v12, 16  ;;  %v516_v15 = vpack.c.b16 %v508_v32, %v468_v30 }
  0x30   : > { %v714_v10 = vshrl.u32 %v699_v58, 16 }
  0x31   : > { %578 = vrot.lane.b32.xlu1 %v528_v21, %s1406_s23  ;;  %v337_v21 = vpack.c.b16 %v329_v14, %v328_v13  ;;  %v658_v24 = vpack.c.b16 %v650_v19, %v650_v19  ;;  %v385_v26 = vrot.slane %v383_v20, 1  ;;  %v698_v48 = vpack.c.b16 %v690_v33, %v650_v19 }
  0x32   : > { %v539_v19 = vshll.u32 %v516_v15, 16 }
  0x33   : > { %v386_v34 = vor.u32 %v385_v26, %v381_v23  ;;  %v709_v56 = vshll.u32 %v698_v48, 16  ;;  %v537_v23 = vshrl.u32 %v516_v15, 16  ;;  %v1289_v26 = vld [vmem:[%s1455_s19 + $0x10] sm:$0xe] }
  0x34   : > { %v786_v30 = vunpack.c.l.b16 %v1289_v26 }
  0x35   : > { %v711_v61 = vrot.slane %v709_v56, 1  ;;  %v1646_v56 = vld [vmem:[%s1455_s19 + $0x3c] sm:$0x1] }
  0x36   : > { %398 = vrot.lane.b32.xlu0 %v358_v28, %s1405_s22  ;;  %v390_v28 = vshll.u32 %v337_v21, 16 }
  0x37   : > { %490 = vrot.lane.b32.xlu2 %v478_v35, %s1403_s20  ;;  %v388_v35 = vshrl.u32 %v337_v21, 16 }
  0x38   : > { %v392_v37 = vrot.slane %v390_v28, 1 }
  0x39   : > { %400 = vrot.lane.b32.xlu1 %v365_v39, %s1405_s22  ;;  %v1252_v39 = vld [vmem:[%s1455_s19 + $0x20] sm:$0xf] }
  0x3a   : > { %v469_v50 = vunpack.c.l.b16 %v1252_v39  ;;  %v655_v39 = vunpack.c.l.b16 %v1278_v31  ;;  %v1293_v31 = vld [vmem:[%s1455_s19 + $0x30] sm:$0xe] }
  0x3c   : > { %v477_v57 = vpack.c.b16 %v469_v50, %v469_v50  ;;  %v517_v9 = vpack.c.b16 %v509_v1, %v469_v50 }
  0x3e   : > { %492 = vrot.lane.b32.xlu0 %v479_v49, %s1403_s20  ;;  %v393_v49 = vor.u32 %v392_v37, %v388_v35  ;;  %v544_v20 = vshrl.u32 %v517_v9, 16  ;;  %v794_v35 = vpack.c.b16 %v690_v33, %v786_v30  ;;  %v1255_v33 = vld [vmem:[%s1455_s19 + $0x38] sm:$0xf] }
  0x3f   : > { %628 = vrot.lane.b32.xlu2 %v619_v55, %s1407_s24  ;;  %v615_v55 = vpack.c.b16 %v511_v53, %v607_v43  ;;  %v707_v53 = vshrl.u32 %v698_v48, 16  ;;  %v1636_v43 = vld [vmem:[%s1455_s19 + $0x34] sm:$0x1] }
  0x40   : > { %v802_v48 = vrot.slane %v794_v35, 1  ;;  %v694_v50 = vunpack.c.l.b16 %v1636_v43 }
  0x41   : > { %626 = vrot.lane.b32.xlu1 %v618_v41, %s1407_s24  ;;  %v614_v41 = vpack.c.b16 %v510_v38, %v606_v51  ;;  %v623_v44 = vrot.slane %v615_v55, 1  ;;  %v241_v38 = vld [vmem:[%s1455_s19 + $0x38] sm:$0xe]  ;;  %v663_v51 = vpack.c.b16 %v655_v39, %v655_v39 }
  0x42   : > { %v425_v13 = vunpack.c.l.b16 %v241_v38  ;;  %v1267_v55 = vld [vmem:[%s1455_s19 + $0x18] sm:$0xe] }
  0x43   : > { %v622_v63 = vrot.slane %v614_v41, 1  ;;  %v472_v41 = vunpack.c.l.b16 %v1255_v33  ;;  %v604_v42 = vunpack.c.l.b16 %v1267_v55 }
  0x45   : > { %v480_v38 = vpack.c.b16 %v472_v41, %v472_v41 }
  0x46   : > { %446 = vrot.lane.b32.xlu0 %v436_v62, %s1404_s21  ;;  %v424_v62 = vunpack.c.l.b16 %v240_v47 }
  0x47   : > { %586 = vrot.lane.b32.xlu2 %v556_v6, %s1406_s23  ;;  %v716_v6 = vshll.u32 %v699_v58, 16 }
  0x48   : > { %v432_v8 = vpack.c.b16 %v327_v2, %v424_v62  ;;  %v433_v2 = vpack.c.b16 %v329_v14, %v425_v13  ;;  %v654_v14 = vunpack.c.l.b16 %v1277_v27  ;;  %v1658_v62 = vld [vmem:[%s1455_s19 + $0x3c] sm:$0x1] }
  0x49   : > { %448 = vrot.lane.b32.xlu1 %v437_v7, %s1404_s21  ;;  %v712_v7 = vor.u32 %v711_v61, %v707_v53  ;;  %v718_v12 = vrot.slane %v716_v6, 1  ;;  %v1268_v61 = vld [vmem:[%s1455_s19 + $0x20] sm:$0xe]  ;;  %v512_v15 = vunpack.c.l.b16 %v1658_v62 }
  0x4a   : > { %v440_v16 = vrot.slane %v432_v8, 1  ;;  %v662_v37 = vpack.c.b16 %v654_v14, %v654_v14  ;;  %v702_v47 = vpack.c.b16 %v694_v50, %v654_v14  ;;  %v1275_v14 = vld [vmem:[%s1455_s19 + $0x20] sm:$0xf] }
  0x4b   : > { %v719_v36 = vor.u32 %v718_v12, %v714_v10  ;;  %v612_v10 = vpack.c.b16 %v508_v32, %v604_v42  ;;  %v605_v12 = vunpack.c.l.b16 %v1268_v61  ;;  %v1272_v42 = vld [vmem:[%s1455_s19 + $0x40] sm:$0xe] }
  0x4d   : > { %v613_v60 = vpack.c.b16 %v509_v1, %v605_v12 }
  0x4e   : > { %588 = vrot.lane.b32.xlu0 %v563_v18, %s1406_s23  ;;  %v546_v18 = vshll.u32 %v517_v9, 16 }
  0x4f   : > { %668 = vrot.lane.b32.xlu2 %v659_v22, %s1408_s25  ;;  %v441_v22 = vrot.slane %v433_v2, 1  ;;  %v520_v2 = vpack.c.b16 %v512_v15, %v472_v41 }
  0x50   : > { %v548_v21 = vrot.slane %v546_v18, 1 }
  0x51   : > { %666 = vrot.lane.b32.xlu1 %v658_v24, %s1408_s25  ;;  %v541_v24 = vrot.slane %v539_v19, 1  ;;  %v567_v26 = vshll.u32 %v520_v2, 16  ;;  %v565_v30 = vshrl.u32 %v520_v2, 16 }
  0x52   : > { %v549_v28 = vor.u32 %v548_v21, %v544_v20 }
  0x53   : > { %v542_v4 = vor.u32 %v541_v24, %v537_v23 }
  0x56   : > { %406 = vrot.lane.b32.xlu0 %v386_v34, %s1405_s22  ;;  %v1290_v34 = vld [vmem:[%s1455_s19 + $0x18] sm:$0xe] }
  0x57   : > { %486 = vrot.lane.b32.xlu2 %v476_v46, %s1403_s20  ;;  %v787_v40 = vunpack.c.l.b16 %v1290_v34 }
  0x59   : > { %408 = vrot.lane.b32.xlu1 %v393_v49, %s1405_s22  ;;  %v1256_v49 = vld [vmem:[%s1455_s19 + $0x40] sm:$0xf]  ;;  %v795_v29 = vpack.c.b16 %v691_v52, %v787_v40  ;;  %v695_v52 = vunpack.c.l.b16 %v1646_v56  ;;  %v790_v40 = vunpack.c.l.b16 %v1293_v31 }
  0x5b   : > { %v803_v58 = vrot.slane %v795_v29, 1  ;;  %v703_v13 = vpack.c.b16 %v695_v52, %v655_v39  ;;  %v652_v39 = vunpack.c.l.b16 %v1275_v14  ;;  %v1292_v14 = vld [vmem:[%s1455_s19 + $0x28] sm:$0xe] }
  0x5d   : > { %v744_v32 = vshll.u32 %v703_v13, 16  ;;  %v742_v23 = vshrl.u32 %v703_v13, 16  ;;  %v660_v55 = vpack.c.b16 %v652_v39, %v652_v39 }
  0x5e   : > { %488 = vrot.lane.b32.xlu0 %v477_v57, %s1403_s20  ;;  %v473_v57 = vunpack.c.l.b16 %v1256_v49  ;;  %v1294_v49 = vld [vmem:[%s1455_s19 + $0x38] sm:$0xe] }
  0x5f   : > { %636 = vrot.lane.b32.xlu2 %v623_v44, %s1407_s24  ;;  %v1654_v44 = vld [vmem:[%s1455_s19 + $0x44] sm:$0x1]  ;;  %v746_v24 = vrot.slane %v744_v32, 1 }
  0x60   : > { %v481_v6 = vpack.c.b16 %v473_v57, %v473_v57  ;;  %v513_v8 = vunpack.c.l.b16 %v1654_v44 }
  0x61   : > { %634 = vrot.lane.b32.xlu1 %v622_v63, %s1407_s24 }
  0x62   : > { %v521_v18 = vpack.c.b16 %v513_v8, %v473_v57  ;;  %v798_v57 = vpack.c.b16 %v694_v50, %v790_v40  ;;  %v609_v50 = vunpack.c.l.b16 %v1272_v42 }
  0x64   : > { %v574_v21 = vshll.u32 %v521_v18, 16  ;;  %v572_v45 = vshrl.u32 %v521_v18, 16  ;;  %v806_v43 = vrot.slane %v798_v57, 1 }
  0x66   : > { %762 = vrot.lane.b32.xlu0 %v712_v7, %s1409_s26  ;;  %v737_v7 = vshll.u32 %v702_v47, 16  ;;  %v576_v1 = vrot.slane %v574_v21, 1 }
  0x67   : > { %454 = vrot.lane.b32.xlu2 %v440_v16, %s1404_s21 }
  0x68   : > { %v739_v16 = vrot.slane %v737_v7, 1 }
  0x69   : > { %764 = vrot.lane.b32.xlu1 %v719_v36, %s1409_s26  ;;  %v620_v36 = vrot.slane %v612_v10, 1 }
  0x6e   : > { %456 = vrot.lane.b32.xlu0 %v441_v22, %s1404_s21  ;;  %v621_v22 = vrot.slane %v613_v60, 1 }
  0x6f   : > { %584 = vrot.lane.b32.xlu2 %v549_v28, %s1406_s23  ;;  %v747_v28 = vor.u32 %v746_v24, %v742_v23 }
  0x71   : > { %582 = vrot.lane.b32.xlu1 %v542_v4, %s1406_s23  ;;  %v451_v46 = vpop.permute.xlu2 %450  ;;  %v569_v4 = vrot.slane %v567_v26, 1  ;;  %v1279_v26 = vld [vmem:[%s1455_s19 + $0x40] sm:$0xf] }
  0x76   : > { %674 = vrot.lane.b32.xlu0 %v662_v37, %s1408_s25  ;;  %v577_v37 = vor.u32 %v576_v1, %v572_v45 }
  0x77   : > { %810 = vrot.lane.b32.xlu2 %v802_v48, %s1410_s27  ;;  %v1276_v48 = vld [vmem:[%s1455_s19 + $0x28] sm:$0xf] }
  0x79   : > { %676 = vrot.lane.b32.xlu1 %v663_v51, %s1408_s25  ;;  %v403_v53 = vpop.permute.xlu2 %402  ;;  %v1689_v51 = vld [vmem:[%s1455_s19 + $0x24] sm:$0x1] }
  0x7a   : > { %v841_v63 = vsel %vm826_vm0, %v1461_v5, %v403_v53  ;;  %v735_v5 = vshrl.u32 %v702_v47, 16  ;;  %v653_v47 = vunpack.c.l.b16 %v1276_v48  ;;  %v1271_v53 = vld [vmem:[%s1455_s19 + $0x38] sm:$0xe]  ;;  %v692_v61 = vunpack.c.l.b16 %v1689_v51 }
  0x7b   : > { %v861_v9 = vsel %vm851_vm1, %v841_v63, %v451_v46  ;;  %v570_v46 = vor.u32 %v569_v4, %v565_v30  ;;  %v1702_v63 = vld [vmem:[%s1455_s19 + $0x2c] sm:$0x1]  ;;  %v608_v10 = vunpack.c.l.b16 %v1271_v53  ;;  %v656_v30 = vunpack.c.l.b16 %v1279_v26 }
  0x7c   : > { %v740_v20 = vor.u32 %v739_v16, %v735_v5  ;;  %v693_v12 = vunpack.c.l.b16 %v1702_v63  ;;  %v661_v13 = vpack.c.b16 %v653_v47, %v653_v47  ;;  %v700_v16 = vpack.c.b16 %v692_v61, %v652_v39 }
  0x7d   : > { %v616_v60 = vpack.c.b16 %v512_v15, %v608_v10 }
  0x7e   : > { %812 = vrot.lane.b32.xlu0 %v803_v58, %s1410_s27  ;;  %v791_v58 = vunpack.c.l.b16 %v1294_v49  ;;  %v701_v32 = vpack.c.b16 %v693_v12, %v653_v47  ;;  %v723_v2 = vshll.u32 %v700_v16, 16  ;;  %v721_v23 = vshrl.u32 %v700_v16, 16  ;;  %v1296_v16 = vld [vmem:[%s1455_s19 + $0x48] sm:$0xe] }
  0x7f   : > { %496 = vrot.lane.b32.xlu2 %v481_v6, %s1403_s20  ;;  %v664_v49 = vpack.c.b16 %v656_v30, %v656_v30 }
  0x80   : > { %v799_v5 = vpack.c.b16 %v695_v52, %v791_v58  ;;  %v725_v24 = vrot.slane %v723_v2, 1 }
  0x81   : > { %494 = vrot.lane.b32.xlu1 %v480_v38, %s1403_s20  ;;  %v1678_v19 = vpop.permute.xlu2 %404 }
  0x82   : > { %v807_v52 = vrot.slane %v799_v5, 1  ;;  %v844_v62 = vsel %vm826_vm0, %v1478_v25, %v1678_v19  ;;  %v726_v19 = vor.u32 %v725_v24, %v721_v23 }
  0x86   : > { %630 = vrot.lane.b32.xlu0 %v620_v36, %s1407_s24  ;;  %v617_v36 = vpack.c.b16 %v513_v8, %v609_v50  ;;  %v624_v8 = vrot.slane %v616_v60, 1 }
  0x87   : > { %v483_v27 = vpop.permute.xlu0 %482  ;;  %770 = vrot.lane.b32.xlu2 %v740_v20, %s1409_s26 }
  0x88   : > { %v625_v44 = vrot.slane %v617_v36, 1 }
  0x89   : > { %632 = vrot.lane.b32.xlu1 %v621_v22, %s1407_s24  ;;  %v581_v34 = vpop.permute.xlu2 %580  ;;  %v730_v22 = vshll.u32 %v701_v32, 16 }
  0x8b   : > { %v443_v35 = vpop.permute.xlu1 %442  ;;  %v732_v25 = vrot.slane %v730_v22, 1 }
  0x8e   : > { %772 = vrot.lane.b32.xlu0 %v747_v28, %s1409_s26  ;;  %v728_v28 = vshrl.u32 %v701_v32, 16  ;;  %v793_v32 = vunpack.c.l.b16 %v1296_v16 }
  0x8f   : > { %592 = vrot.lane.b32.xlu2 %v577_v37, %s1406_s23  ;;  %v1288_v37 = vld [vmem:[%s1455_s19 + $0x4c] sm:$0x1] }
  0x90   : > { %v395_v29 = vpop.permute.xlu0 %394  ;;  %v733_v48 = vor.u32 %v732_v25, %v728_v28 }
  0x91   : > { %v829_v33 = vsel %vm826_vm0, %v1467_v11, %v395_v29  ;;  %590 = vrot.lane.b32.xlu1 %v570_v46, %s1406_s23  ;;  %v491_v6 = vpop.permute.xlu2 %490  ;;  %v789_v29 = vunpack.c.l.b16 %v1292_v14 }
  0x92   : > { %v853_v41 = vsel %vm851_vm1, %v829_v33, %v443_v35  ;;  %v878_v7 = vsel %vm868_vm2, %v861_v9, %v491_v6  ;;  %v1291_v35 = vld [vmem:[%s1455_s19 + $0x20] sm:$0xe] }
  0x93   : > { %v870_v38 = vsel %vm868_vm2, %v853_v41, %v483_v27  ;;  %v445_v11 = vpop.permute.xlu1 %444  ;;  %v1287_v27 = vld [vmem:[%s1455_s19 + $0x44] sm:$0x1]  ;;  %v697_v41 = vunpack.c.l.b16 %v1288_v37  ;;  %v797_v58 = vpack.c.b16 %v693_v12, %v789_v29 }
  0x94   : > { %v696_v4 = vunpack.c.l.b16 %v1287_v27 }
  0x96   : > { %670 = vrot.lane.b32.xlu0 %v660_v55, %s1408_s25  ;;  %v788_v55 = vunpack.c.l.b16 %v1291_v35  ;;  %v704_v57 = vpack.c.b16 %v696_v4, %v656_v30 }
  0x97   : > { %818 = vrot.lane.b32.xlu2 %v806_v43, %s1410_s27  ;;  %v805_v43 = vrot.slane %v797_v58, 1 }
  0x98   : > { %v397_v18 = vpop.permute.xlu0 %396  ;;  %v796_v53 = vpack.c.b16 %v692_v61, %v788_v55  ;;  %v751_v63 = vshll.u32 %v704_v57, 16 }
  0x99   : > { %v832_v9 = vsel %vm826_vm0, %v1473_v17, %v397_v18  ;;  %672 = vrot.lane.b32.xlu1 %v661_v13, %s1408_s25  ;;  %v1721_v20 = vpop.permute.xlu2 %628  ;;  %v749_v13 = vshrl.u32 %v704_v57, 16 }
  0x9a   : > { %v855_v56 = vsel %vm851_vm1, %v832_v9, %v445_v11  ;;  %v804_v10 = vrot.slane %v796_v53, 1  ;;  %v753_v12 = vrot.slane %v751_v63, 1 }
  0x9b   : > { %v485_v21 = vpop.permute.xlu1 %484 }
  0x9c   : > { %v872_v17 = vsel %vm868_vm2, %v855_v56, %v485_v21  ;;  %v754_v61 = vor.u32 %v753_v12, %v749_v13 }
  0x9d   : > { %v1728_v15 = vsel %vm885_vm3, %v872_v17, %v581_v34  ;;  %v1280_v34 = vld [vmem:[%s1455_s19 + $0x48] sm:$0xf]  ;;  %v801_v17 = vpack.c.b16 %v697_v41, %v793_v32 }
  0x9e   : > { %820 = vrot.lane.b32.xlu0 %v807_v52, %s1410_s27  ;;  %v657_v33 = vunpack.c.l.b16 %v1280_v34  ;;  %v906_v12 = vsel %vm902_vm5, %v1728_v15, %v1721_v20 }
  0x9f   : > { %640 = vrot.lane.b32.xlu2 %v625_v44, %s1407_s24 }
  0xa0   : > { %v453_v45 = vpop.permute.xlu0 %452  ;;  %v665_v42 = vpack.c.b16 %v657_v33, %v657_v33  ;;  %v705_v6 = vpack.c.b16 %v697_v41, %v657_v33 }
  0xa1   : > { %v863_v1 = vsel %vm851_vm1, %v844_v62, %v453_v45  ;;  %638 = vrot.lane.b32.xlu1 %v624_v8, %s1407_s24  ;;  %v587_v31 = vpop.permute.xlu2 %586  ;;  %v809_v62 = vrot.slane %v801_v17, 1 }
  0xa2   : > { %v1741_v40 = vsel %vm885_vm3, %v878_v7, %v587_v31  ;;  %v758_v5 = vshll.u32 %v705_v6, 16  ;;  %v756_v36 = vshrl.u32 %v705_v6, 16 }
  0xa3   : > { %v579_v39 = vpop.permute.xlu1 %578 }
  0xa4   : > { %v1744_v46 = vsel %vm885_vm3, %v870_v38, %v579_v39  ;;  %v1295_v38 = vld [vmem:[%s1455_s19 + $0x40] sm:$0xe]  ;;  %v760_v60 = vrot.slane %v758_v5, 1 }
  0xa5   : > { %v792_v50 = vunpack.c.l.b16 %v1295_v38 }
  0xa6   : > { %766 = vrot.lane.b32.xlu0 %v726_v19, %s1409_s26  ;;  %v761_v21 = vor.u32 %v760_v60, %v756_v36  ;;  %v974_v19 = vld [vmem:[%s1876_s1 + $0x10] sm:$0x3] }
  0xa7   : > { %678 = vrot.lane.b32.xlu2 %v664_v49, %s1408_s25  ;;  %v800_v51 = vpack.c.b16 %v696_v4, %v792_v50  ;;  %v1004_v4 = vunpack.c.l.b16 %v974_v19 }
  0xa8   : > { %v399_v47 = vpop.permute.xlu0 %398 }
  0xa9   : > { %768 = vrot.lane.b32.xlu1 %v733_v48, %s1409_s26  ;;  %v1752_v11 = vpop.permute.xlu2 %668  ;;  %v808_v2 = vrot.slane %v800_v51, 1  ;;  %v835_v44 = vsel %vm826_vm0, %v1496_v54, %v399_v47  ;;  %v1007_v14 = vpack.c.b16 %v1004_v4, %v1004_v4  ;;  %v1313_v48 = vld [vmem:[%s1876_s1 + $0x8] sm:$0xff] }
  0xaa   : > { %v923_v5 = vsel %vm919_vm7, %v906_v12, %v1752_v11 }
  0xab   : > { %v401_v7 = vpop.permute.xlu1 %400  ;;  %v1025_v37 = vsel %vm1023_vm4, %v1007_v14, 0 }
  0xac   : > { %v838_v26 = vsel %vm826_vm0, %v1510_v0, %v401_v7  ;;  %1032 = vmatpush.bf16.msra.mxu0 %v1025_v37  ;;  %1338 = vmatpush.bf16.msra.mxu2 %v1025_v37 }
  0xad   : > { %1337 = vmatpush.bf16.msra.mxu1 %v1025_v37  ;;  %1339 = vmatpush.bf16.msra.mxu3 %v1025_v37 }
  0xae   : > { %680 = vrot.lane.b32.xlu0 %v665_v42, %s1408_s25 }
  0xaf   : > { %816 = vrot.lane.b32.xlu2 %v805_v43, %s1410_s27 }
  0xb0   : > { %v493_v18 = vpop.permute.xlu0 %492  ;;  %1033 = vmatpush.bf16.msra.mxu0 %v1313_v48  ;;  %1341 = vmatpush.bf16.msra.mxu2 %v1313_v48 }
  0xb1   : > { %v880_v9 = vsel %vm868_vm2, %v863_v1, %v493_v18  ;;  %814 = vrot.lane.b32.xlu1 %v804_v10, %s1410_s27  ;;  %v487_v56 = vpop.permute.xlu2 %486  ;;  %1340 = vmatpush.bf16.msra.mxu1 %v1313_v48 }
  0xb2   : > { %1342 = vmatpush.bf16.msra.mxu3 %v1313_v48 }
  0xb3   : > { %v1759_v52 = vpop.permute.xlu1 %626 }
  0xb4   : > { %v904_v38 = vsel %vm902_vm5, %v1744_v46, %v1759_v52 }
  0xb6   : > { %774 = vrot.lane.b32.xlu0 %v754_v61, %s1409_s26 }
  0xb7   : > { %822 = vrot.lane.b32.xlu2 %v808_v2, %s1410_s27 }
  0xb8   : > { %v447_v8 = vpop.permute.xlu0 %446 }
  0xb9   : > { %v857_v22 = vsel %vm851_vm1, %v835_v44, %v447_v8  ;;  %776 = vrot.lane.b32.xlu1 %v761_v21, %s1409_s26  ;;  %v1770_v24 = vpop.permute.xlu2 %636 }
  0xba   : > { %v1768_v23 = vsel %vm868_vm2, %v857_v22, %v487_v56 }
  0xbb   : > { %v449_v27 = vpop.permute.xlu1 %448 }
  0xbc   : > { %v859_v45 = vsel %vm851_vm1, %v838_v26, %v449_v27 }
  0xbe   : > { %824 = vrot.lane.b32.xlu0 %v809_v62, %s1410_s27 }
  0xc0   : > { %v589_v54 = vpop.permute.xlu0 %588 }
  0xc1   : > { %v1777_v1 = vsel %vm885_vm3, %v880_v9, %v589_v54  ;;  %v455_v28 = vpop.permute.xlu2 %454 }
  0xc2   : > { %v914_v26 = vsel %vm902_vm5, %v1777_v1, %v1770_v24 }
  0xc3   : > { %v667_v25 = vpop.permute.xlu1 %666 }
  0xc4   : > { %v921_v7 = vsel %vm919_vm7, %v904_v38, %v667_v25 }
  0xc8   : > { %v407_v30 = vpop.permute.xlu0 %406 }
  0xc9   : > { %v847_v0 = vsel %vm826_vm0, %v1550_v59, %v407_v30  ;;  %v1785_v34 = vpop.permute.xlu2 %584 }
  0xca   : > { %v865_v31 = vsel %vm851_vm1, %v847_v0, %v455_v28 }
  0xcb   : > { %v409_v35 = vpop.permute.xlu1 %408 }
  0xcc   : > { %v850_v39 = vsel %vm826_vm0, %v1560_v3, %v409_v35  ;;  %v1312_v3 = vld [vmem:[%s1876_s1] sm:$0xff] }
  0xcd   : > { %1034 = vmatpush.bf16.msra.mxu0 %v1312_v3  ;;  %1344 = vmatpush.bf16.msra.mxu2 %v1312_v3 }
  0xce   : > { %1343 = vmatpush.bf16.msra.mxu1 %v1312_v3  ;;  %1345 = vmatpush.bf16.msra.mxu3 %v1312_v3 }
  0xd0   : > { %v489_v59 = vpop.permute.xlu0 %488 }
  0xd1   : > { %v1793_v49 = vsel %vm868_vm2, %v859_v45, %v489_v59  ;;  %v811_v29 = vpop.permute.xlu2 %810 }
  0xd2   : > { %v893_v37 = vsel %vm885_vm3, %v1793_v49, %v1785_v34 }
  0xd3   : > { %v635_v33 = vpop.permute.xlu1 %634 }
  0xd4   : > { %v912_v8 = vsel %vm902_vm5, %v1741_v40, %v635_v33 }
  0xd8   : > { %v763_v55 = vpop.permute.xlu0 %762 }
  0xd9   : > { %v497_v57 = vpop.permute.xlu2 %496  ;;  %v938_v50 = vsel %vm936_vm6, %v921_v7, %v763_v55 }
  0xda   : > { %v955_v16 = vsel %vm953_vm8, %v938_v50, %v811_v29 }
  0xdb   : > { %v765_v41 = vpop.permute.xlu1 %764  ;;  %v983_v51 = vunpack.c.l.b16 %v955_v16 }
  0xdc   : > { %v940_v46 = vsel %vm936_vm6, %v923_v5, %v765_v41 }
  0xe0   : > { %v457_v47 = vpop.permute.xlu0 %456 }
  0xe1   : > { %v867_v58 = vsel %vm851_vm1, %v850_v39, %v457_v47  ;;  %v771_v53 = vpop.permute.xlu2 %770 }
  0xe2   : > { %v884_v42 = vsel %vm868_vm2, %v867_v58, %v497_v57 }
  0xe3   : > { %v583_v63 = vpop.permute.xlu1 %582 }
  0xe4   : > { %v891_v33 = vsel %vm885_vm3, %v1768_v23, %v583_v63 }
  0xe8   : > { %v675_v6 = vpop.permute.xlu0 %674 }
  0xe9   : > { %v593_v43 = vpop.permute.xlu2 %592  ;;  %v929_v22 = vsel %vm919_vm7, %v912_v8, %v675_v6 }
  0xea   : > { %v901_v10 = vsel %vm885_vm3, %v884_v42, %v593_v43  ;;  %v946_v27 = vsel %vm936_vm6, %v929_v22, %v771_v53 }
  0xeb   : > { %v677_v13 = vpop.permute.xlu1 %676 }
  0xec   : > { %v931_v45 = vsel %vm919_vm7, %v914_v26, %v677_v13 }
  0xf0   : > { %v813_v18 = vpop.permute.xlu0 %812 }
  0xf1   : > { %v957_v9 = vsel %vm953_vm8, %v940_v46, %v813_v18  ;;  %v819_v36 = vpop.permute.xlu2 %818 }
  0xf2   : > { %v984_v61 = vunpack.c.l.b16 %v957_v9  ;;  %v963_v54 = vsel %vm953_vm8, %v946_v27, %v819_v36 }
  0xf3   : > { %v495_v60 = vpop.permute.xlu1 %494  ;;  %v987_v30 = vunpack.c.l.b16 %v963_v54 }
  0xf4   : > { %v991_v32 = vpack.c.b16 %v984_v61, %v983_v51  ;;  %v882_v56 = vsel %vm868_vm2, %v865_v31, %v495_v60 }
  0xf6   : > { %1305 = vmatmul.msk.bf16.vlgmr.msra.gmra.mxu0 %vm1010_vm9, %v991_v32 }
  0xf8   : > { %v631_v20 = vpop.permute.xlu0 %630 }
  0xf9   : > { %v641_v15 = vpop.permute.xlu2 %640  ;;  %v908_v57 = vsel %vm902_vm5, %v891_v33, %v631_v20 }
  0xfa   : > { %v918_v11 = vsel %vm902_vm5, %v901_v10, %v641_v15 }
  0xfb   : > { %v633_v52 = vpop.permute.xlu1 %632 }
  0xfc   : > { %v910_v39 = vsel %vm902_vm5, %v893_v37, %v633_v52 }
 0x100   : > { %v773_v2 = vpop.permute.xlu0 %772 }
 0x101   : > { %v948_v28 = vsel %vm936_vm6, %v931_v45, %v773_v2  ;;  %v679_v4 = vpop.permute.xlu2 %678 }
 0x103   : > { %v591_v21 = vpop.permute.xlu1 %590 }
 0x104   : > { %v899_v17 = vsel %vm885_vm3, %v882_v56, %v591_v21 }
 0x108   : > { %v671_v44 = vpop.permute.xlu0 %670 }
 0x109   : > { %v817_v59 = vpop.permute.xlu2 %816  ;;  %v925_v41 = vsel %vm919_vm7, %v908_v57, %v671_v44 }
 0x10b   : > { %v673_v62 = vpop.permute.xlu1 %672 }
 0x10c   : > { %v927_v48 = vsel %vm919_vm7, %v910_v39, %v673_v62 }
 0x110   : > { %v821_v25 = vpop.permute.xlu0 %820 }
 0x111   : > { %v965_v19 = vsel %vm953_vm8, %v948_v28, %v821_v25  ;;  %v823_v6 = vpop.permute.xlu2 %822 }
 0x112   : > { %v988_v40 = vunpack.c.l.b16 %v965_v19 }
 0x113   : > { %v639_v0 = vpop.permute.xlu1 %638 }
 0x114   : > { %v993_v14 = vpack.c.b16 %v988_v40, %v987_v30  ;;  %v916_v31 = vsel %vm902_vm5, %v899_v17, %v639_v0 }
 0x115   : > { %v933_v24 = vsel %vm919_vm7, %v916_v31, %v679_v4 }
 0x116   : > { %1307 = vmatmul.msk.bf16.vlgmr.msra.gmra.mxu2 %vm1010_vm9, %v993_v14 }
 0x118   : > { %v767_v1 = vpop.permute.xlu0 %766 }
 0x119   : > { %v942_v34 = vsel %vm936_vm6, %v925_v41, %v767_v1 }
 0x11b   : > { %v769_v35 = vpop.permute.xlu1 %768 }
 0x11c   : > { %v944_v29 = vsel %vm936_vm6, %v927_v48, %v769_v35 }
 0x11d   : > { %v961_v47 = vsel %vm953_vm8, %v944_v29, %v817_v59 }
 0x11e   : > { %v986_v42 = vunpack.c.l.b16 %v961_v47 }
 0x120   : > { %v681_v3 = vpop.permute.xlu0 %680 }
 0x121   : > { %v935_v55 = vsel %vm919_vm7, %v918_v11, %v681_v3 }
 0x123   : > { %v815_v49 = vpop.permute.xlu1 %814 }
 0x124   : > { %v959_v58 = vsel %vm953_vm8, %v942_v34, %v815_v49 }
 0x125   : > { %v985_v53 = vunpack.c.l.b16 %v959_v58 }
 0x127   : > { %v992_v38 = vpack.c.b16 %v986_v42, %v985_v53 }
 0x128   : > { %v775_v7 = vpop.permute.xlu0 %774 }
 0x129   : > { %v950_v23 = vsel %vm936_vm6, %v933_v24, %v775_v7  ;;  %1306 = vmatmul.msk.bf16.vlgmr.msra.gmra.mxu1 %vm1010_vm9, %v992_v38 }
 0x12a   : > { %v967_v63 = vsel %vm953_vm8, %v950_v23, %v823_v6 }
 0x12b   : > { %v777_v43 = vpop.permute.xlu1 %776  ;;  %v989_v12 = vunpack.c.l.b16 %v967_v63 }
 0x12c   : > { %v952_v50 = vsel %vm936_vm6, %v935_v55, %v777_v43 }
 0x130   : > { %v825_v10 = vpop.permute.xlu0 %824 }
 0x131   : > { %v969_v13 = vsel %vm953_vm8, %v952_v50, %v825_v10 }
 0x132   : > { %v990_v5 = vunpack.c.l.b16 %v969_v13 }
 0x134   : > { %v994_v16 = vpack.c.b16 %v990_v5, %v989_v12 }
 0x136   : > { %1308 = vmatmul.msk.bf16.vlgmr.msra.gmra.mxu3 %vm1010_vm9, %v994_v16 }
 0x173   : > { %v1036_v46 = vpop.f32.mrf.mxu0 }
 0x174   : > { %v1086_v15 = vmul.f32 %v1036_v46, %v1036_v46 }
 0x17b   : > { %v1038_v18 = vpop.f32.mrf.mxu0 }
 0x17c   : > { %v1317_v9 = vpack.c.bf16 %v1038_v18, %v1036_v46  ;;  %v1087_v56 = vmul.f32 %v1038_v18, %v1038_v18  ;;  %v1072_v11 = vadd.f32 %v1038_v18, %v1036_v46 }
 0x17e   : > { %1318 = vst [vmem:[%s1856_s10] sm:$0xff] %v1317_v9   ;;  %v1094_v2 = vadd.f32 %v1087_v56, %v1086_v15 }
 0x199   : > { %v1046_v51 = vpop.f32.mrf.mxu2 }
 0x19a   : > { %v1090_v26 = vmul.f32 %v1046_v51, %v1046_v51 }
 0x1a1   : > { %v1048_v61 = vpop.f32.mrf.mxu2 }
 0x1a2   : > { %v1327_v36 = vpack.c.bf16 %v1048_v61, %v1046_v51  ;;  %v1091_v54 = vmul.f32 %v1048_v61, %v1048_v61 }
 0x1a4   : > { %1335 = vst [vmem:[%s1856_s10 + $0x10] sm:$0xff] %v1327_v36  }
 0x1a6   : > { %v1041_v60 = vpop.f32.mrf.mxu1 }
 0x1a7   : > { %v1088_v52 = vmul.f32 %v1041_v60, %v1041_v60  ;;  %v1073_v21 = vadd.f32 %v1072_v11, %v1041_v60 }
 0x1a9   : > { %v1095_v44 = vadd.f32 %v1094_v2, %v1088_v52 }
 0x1ae   : > { %v1043_v32 = vpop.f32.mrf.mxu1 }
 0x1af   : > { %v1322_v20 = vpack.c.bf16 %v1043_v32, %v1041_v60  ;;  %v1089_v17 = vmul.f32 %v1043_v32, %v1043_v32  ;;  %v1074_v8 = vadd.f32 %v1073_v21, %v1043_v32 }
 0x1b1   : > { %1334 = vst [vmem:[%s1856_s10 + $0x8] sm:$0xff] %v1322_v20   ;;  %v1096_v22 = vadd.f32 %v1095_v44, %v1089_v17  ;;  %v1075_v27 = vadd.f32 %v1074_v8, %v1046_v51 }
 0x1b3   : > { %v1097_v45 = vadd.f32 %v1096_v22, %v1090_v26  ;;  %v1076_v28 = vadd.f32 %v1075_v27, %v1048_v61 }
 0x1b5   : > { %v1098_v30 = vadd.f32 %v1097_v45, %v1091_v54 }
 0x1b9   : > { %v1051_v62 = vpop.f32.mrf.mxu3 }
 0x1ba   : > { %v1092_v25 = vmul.f32 %v1051_v62, %v1051_v62  ;;  %v1077_v19 = vadd.f32 %v1076_v28, %v1051_v62 }
 0x1bc   : > { %v1099_v4 = vadd.f32 %v1098_v30, %v1092_v25 }
 0x1c1   : > { %v1053_v40 = vpop.f32.mrf.mxu3 }
 0x1c2   : > { %v1332_v0 = vpack.c.bf16 %v1053_v40, %v1051_v62  ;;  %v1078_v14 = vadd.f32 %v1077_v19, %v1053_v40  ;;  %v1093_v31 = vmul.f32 %v1053_v40, %v1053_v40 }
 0x1c4   : > { %1336 = vst [vmem:[%s1856_s10 + $0x18] sm:$0xff] %v1332_v0   ;;  %v1079_v24 = vrot.slane %v1078_v14, 4  ;;  %v1100_v1 = vadd.f32 %v1099_v4, %v1093_v31 }
 0x1c6   : > { %v1080_v35 = vadd.f32 %v1079_v24, %v1078_v14  ;;  %v1101_v37 = vrot.slane %v1100_v1, 4 }
 0x1c8   : > { %v1081_v39 = vrot.slane %v1080_v35, 2  ;;  %v1102_v48 = vadd.f32 %v1101_v37, %v1100_v1 }
 0x1ca   : > { %v1082_v59 = vadd.f32 %v1081_v39, %v1080_v35  ;;  %v1103_v29 = vrot.slane %v1102_v48, 2 }
 0x1cc   : > { %v1083_v3 = vrot.slane %v1082_v59, 1  ;;  %v1104_v33 = vadd.f32 %v1103_v29, %v1102_v48 }
 0x1ce   : > { %v1084_v55 = vadd.f32 %v1083_v3, %v1082_v59  ;;  %v1105_v57 = vrot.slane %v1104_v33, 1 }
 0x1d0   : > { %1085 = vst [vmem:[%s212_s18] sm:$0x1] %v1084_v55  ;;  %v1106_v41 = vadd.f32 %v1105_v57, %v1104_v33 }
 0x1d2   : > { %1107 = vst [vmem:[%s212_s18 + $0x1] sm:$0x1] %v1106_v41 }
 0x1d3 PF: > { %s14_s14 = sadd.s32 1, %s1401_s14   ;;  %s1879_s12 = smov %s1397_s13 }
 0x1d4   : > { %p11_p5 = scmp.ge.s32.totalorder %s14_s14, 4   ;;  %s1880_s13 = smov %s1882_s15 }
 0x1d6   :  { %13 = sbr.rel (!%p11_p5) target bundleno = 2 (0x2), region = 73 }

// kernel: down_forward.5
= control target key start
LH: loop header
LB: loop body
LE: loop exit
PB: predicated region body
PF: predicated region fallthrough
CT: control target
= control target key end

     0   :  { %s1818_s6 = smov 0   ;;  %s1820_s7 = smov 0   ;;  %s3543_s0 = inlined_call_operand.vmem [shape: f32[2,16,8,2,4], index: 0, kind: input, shape index: {}]   ;;  %s3544_s1 = inlined_call_operand.vmem [shape: bf16[2,8,8,4], index: 1, kind: output, shape index: {}]  }
   0x1   :  { %s1822_s8 = smov 0  }
   0x2 LB: > { %s23_s9 = sadd.s32 1, %s1802_s7  ;;  %p1751_p0 = scmp.ge.s32.totalorder %s1806_s8, 1  ;;  %s1806_s8 = sphi %s1822_s8, %s11_s8   ;;  %s1802_s7 = sphi %s1820_s7, %s3899_s7   ;;  %s1798_s6 = sphi %s1818_s6, %s3898_s6  }
   0x3   : > { %p25_p1 = scmp.ge.s32.totalorder %s23_s9, 2  ;;  %p109_p2 = scmp.lt.s32.totalorder %s1806_s8, 3 }
   0x5   : > { %s3901_s9 = smov (%p25_p1, %s23_s9), 0  ;;  %p110_p3 = pnand %p1751_p0, %p109_p2 }
   0x7   : > { %113 = sbr.rel (%p110_p3) target bundleno = 352 (0x160), region = 24 }
   0xc   : > { %p139_p4 = scmp.lt.s32.totalorder %s1798_s6, 1  ;;  %vm287_vm0 = vcmask 25600   ;;  %vm1184_vm1 = vcmask 31744   ;;  %vm1569_vm2 = vcmask 1041409   ;;  %vm1571_vm3 = vcmask 1042434  }
   0xd   : > { %vm1573_vm4 = vcmask 1043459   ;;  %vm1575_vm5 = vcmask 1044484   ;;  %vm1577_vm6 = vcmask 1045509   ;;  %vm1579_vm7 = vcmask 1046534  }
   0xe   : > { %s3903_s6 = smov (!%p139_p4, %s1798_s6), 1  ;;  %vm1581_vm8 = vcmask 1047559   ;;  %vm1648_vm9 = vcmask 27648  }
   0xf   : > { %s1758_s10 = sshll.u32 %s3903_s6, 8  ;;  %s1759_s14 = sshll.u32 %s3903_s6, 5 }
  0x10   : > { %s1842_s13 = scalar_lea.vmem %s3543_s0, %s1758_s10  ;;  %s157_s17 = scalar_lea.vmem %s3544_s1, %s1759_s14 }
  0x11   : > { %v159_v0 = vld [vmem:[%s1842_s13] sm:$0x3]  ;;  %v160_v1 = vld [vmem:[%s1842_s13 + $0x2] sm:$0x3]  ;;  %v161_v2 = vld [vmem:[%s1842_s13 + $0x4] sm:$0x3] }
  0x12   : > { %v162_v3 = vld [vmem:[%s1842_s13 + $0x6] sm:$0x3]  ;;  %v163_v4 = vld [vmem:[%s1842_s13 + $0x8] sm:$0x3]  ;;  %v164_v5 = vld [vmem:[%s1842_s13 + $0xa] sm:$0x3] }
  0x13   : > { %v165_v6 = vld [vmem:[%s1842_s13 + $0xc] sm:$0x3]  ;;  %v166_v7 = vld [vmem:[%s1842_s13 + $0xe] sm:$0x3]  ;;  %v288_v8 = vsel %vm287_vm0, %v159_v0, -inf  ;;  %v295_v9 = vsel %vm287_vm0, %v160_v1, -inf }
  0x14   : > { %v302_v10 = vsel %vm287_vm0, %v161_v2, -inf  ;;  %v309_v11 = vsel %vm287_vm0, %v162_v3, -inf  ;;  %v289_v12 = vrot.slane %v288_v8, 4  ;;  %v296_v13 = vrot.slane %v295_v9, 4  ;;  %v167_v44 = vld [vmem:[%s1842_s13 + $0x10] sm:$0x3] }
  0x15   : > { %v303_v14 = vrot.slane %v302_v10, 4  ;;  %v310_v15 = vrot.slane %v309_v11, 4  ;;  %v316_v16 = vsel %vm287_vm0, %v163_v4, -inf  ;;  %v323_v17 = vsel %vm287_vm0, %v164_v5, -inf  ;;  %v168_v48 = vld [vmem:[%s1842_s13 + $0x12] sm:$0x3] }
  0x16   : > { %v330_v18 = vsel %vm287_vm0, %v165_v6, -inf  ;;  %v337_v19 = vsel %vm287_vm0, %v166_v7, -inf  ;;  %v290_v20 = vmax.f32 %v288_v8, %v289_v12  ;;  %v297_v21 = vmax.f32 %v295_v9, %v296_v13  ;;  %v169_v49 = vld [vmem:[%s1842_s13 + $0x14] sm:$0x3]  ;;  %v170_v50 = vld [vmem:[%s1842_s13 + $0x16] sm:$0x3] }
  0x17   : > { %v304_v22 = vmax.f32 %v302_v10, %v303_v14  ;;  %v311_v23 = vmax.f32 %v309_v11, %v310_v15  ;;  %v317_v24 = vrot.slane %v316_v16, 4  ;;  %v324_v25 = vrot.slane %v323_v17, 4  ;;  %v171_v55 = vld [vmem:[%s1842_s13 + $0x18] sm:$0x3]  ;;  %v172_v56 = vld [vmem:[%s1842_s13 + $0x1a] sm:$0x3] }
  0x18   : > { %v331_v26 = vrot.slane %v330_v18, 4  ;;  %v338_v27 = vrot.slane %v337_v19, 4  ;;  %v291_v28 = vrot.slane %v290_v20, 2  ;;  %v298_v29 = vrot.slane %v297_v21, 2  ;;  %v173_v57 = vld [vmem:[%s1842_s13 + $0x1c] sm:$0x3] }
  0x19   : > { %v305_v30 = vrot.slane %v304_v22, 2  ;;  %v312_v31 = vrot.slane %v311_v23, 2  ;;  %v318_v32 = vmax.f32 %v316_v16, %v317_v24  ;;  %v325_v33 = vmax.f32 %v323_v17, %v324_v25  ;;  %v174_v62 = vld [vmem:[%s1842_s13 + $0x1e] sm:$0x3] }
  0x1a   : > { %v332_v34 = vmax.f32 %v330_v18, %v331_v26  ;;  %v339_v35 = vmax.f32 %v337_v19, %v338_v27  ;;  %v292_v36 = vmax.f32 %v290_v20, %v291_v28  ;;  %v299_v37 = vmax.f32 %v297_v21, %v298_v29 }
  0x1b   : > { %v306_v38 = vmax.f32 %v304_v22, %v305_v30  ;;  %v1860_v39 = vmax.f32 %v311_v23, %v312_v31  ;;  %v319_v40 = vrot.slane %v318_v32, 2  ;;  %v326_v41 = vrot.slane %v325_v33, 2 }
  0x1c   : > { %v333_v42 = vrot.slane %v332_v34, 2  ;;  %v340_v43 = vrot.slane %v339_v35, 2  ;;  %v293_v45 = vrot.slane %v292_v36, 1  ;;  %v300_v46 = vrot.slane %v299_v37, 1 }
  0x1d   : > { %v307_v47 = vrot.slane %v306_v38, 1  ;;  %v1866_v51 = vmax.f32 %v318_v32, %v319_v40  ;;  %v1868_v52 = vmax.f32 %v325_v33, %v326_v41  ;;  %v314_v61 = vrot.slane %v1860_v39, 1  ;;  %v175_v40 = vld [vmem:[%s1842_s13 + $0x20] sm:$0x3] }
  0x1e   : > { %v1870_v53 = vmax.f32 %v332_v34, %v333_v42  ;;  %v1872_v54 = vmax.f32 %v339_v35, %v340_v43  ;;  %v1877_v58 = vmax.f32 %v292_v36, %v293_v45  ;;  %v1879_v59 = vmax.f32 %v299_v37, %v300_v46  ;;  %v176_v45 = vld [vmem:[%s1842_s13 + $0x22] sm:$0x3]  ;;  %v177_v46 = vld [vmem:[%s1842_s13 + $0x24] sm:$0x3] }
  0x1f   : > { %v1881_v60 = vmax.f32 %v306_v38, %v307_v47  ;;  %v344_v63 = vsel %vm287_vm0, %v167_v44, -inf  ;;  %v351_v0 = vsel %vm287_vm0, %v168_v48, -inf  ;;  %v358_v1 = vsel %vm287_vm0, %v169_v49, -inf  ;;  %v178_v47 = vld [vmem:[%s1842_s13 + $0x26] sm:$0x3] }
  0x20   : > { %v365_v2 = vsel %vm287_vm0, %v170_v50, -inf  ;;  %v321_v3 = vrot.slane %v1866_v51, 1  ;;  %v328_v4 = vrot.slane %v1868_v52, 1  ;;  %v335_v5 = vrot.slane %v1870_v53, 1 }
  0x21   : > { %v342_v6 = vrot.slane %v1872_v54, 1  ;;  %v345_v7 = vrot.slane %v344_v63, 4  ;;  %v352_v8 = vrot.slane %v351_v0, 4  ;;  %v359_v9 = vrot.slane %v358_v1, 4 }
  0x22   : > { %v366_v10 = vrot.slane %v365_v2, 4  ;;  %v372_v11 = vsel %vm287_vm0, %v171_v55, -inf  ;;  %v379_v12 = vsel %vm287_vm0, %v172_v56, -inf  ;;  %v386_v13 = vsel %vm287_vm0, %v173_v57, -inf  ;;  %v179_v56 = vld [vmem:[%s1842_s13 + $0x28] sm:$0x3] }
  0x23   : > { %v393_v14 = vsel %vm287_vm0, %v174_v62, -inf  ;;  %v346_v15 = vmax.f32 %v344_v63, %v345_v7  ;;  %v353_v16 = vmax.f32 %v351_v0, %v352_v8  ;;  %v360_v17 = vmax.f32 %v358_v1, %v359_v9  ;;  %v180_v63 = vld [vmem:[%s1842_s13 + $0x2a] sm:$0x3]  ;;  %v181_v0 = vld [vmem:[%s1842_s13 + $0x2c] sm:$0x3] }
  0x24   : > { %v367_v18 = vmax.f32 %v365_v2, %v366_v10  ;;  %v373_v19 = vrot.slane %v372_v11, 4  ;;  %v380_v20 = vrot.slane %v379_v12, 4  ;;  %v387_v21 = vrot.slane %v386_v13, 4 }
  0x25   : > { %v394_v22 = vrot.slane %v393_v14, 4  ;;  %v347_v23 = vrot.slane %v346_v15, 2  ;;  %v354_v24 = vrot.slane %v353_v16, 2  ;;  %v361_v25 = vrot.slane %v360_v17, 2 }
  0x26   : > { %v368_v26 = vrot.slane %v367_v18, 2  ;;  %v374_v27 = vmax.f32 %v372_v11, %v373_v19  ;;  %v381_v28 = vmax.f32 %v379_v12, %v380_v20  ;;  %v388_v29 = vmax.f32 %v386_v13, %v387_v21 }
  0x27   : > { %v395_v30 = vmax.f32 %v393_v14, %v394_v22  ;;  %v348_v31 = vmax.f32 %v346_v15, %v347_v23  ;;  %v355_v32 = vmax.f32 %v353_v16, %v354_v24  ;;  %v362_v33 = vmax.f32 %v360_v17, %v361_v25 }
  0x28   : > { %v1897_v34 = vmax.f32 %v367_v18, %v368_v26  ;;  %v375_v35 = vrot.slane %v374_v27, 2  ;;  %v382_v36 = vrot.slane %v381_v28, 2  ;;  %v389_v37 = vrot.slane %v388_v29, 2 }
  0x29   : > { %v396_v38 = vrot.slane %v395_v30, 2  ;;  %v1901_v41 = vmax.f32 %v1860_v39, %v314_v61  ;;  %v349_v42 = vrot.slane %v348_v31, 1  ;;  %v356_v43 = vrot.slane %v355_v32, 1 }
  0x2a   : > { %v363_v44 = vrot.slane %v362_v33, 1  ;;  %v1906_v48 = vmax.f32 %v374_v27, %v375_v35  ;;  %v1908_v49 = vmax.f32 %v381_v28, %v382_v36  ;;  %v1910_v50 = vmax.f32 %v388_v29, %v389_v37 }
  0x2b   : > { %v1912_v55 = vmax.f32 %v395_v30, %v396_v38  ;;  %v1916_v39 = vmax.f32 %v1866_v51, %v321_v3  ;;  %v1919_v57 = vmax.f32 %v1868_v52, %v328_v4  ;;  %v1922_v61 = vmax.f32 %v1870_v53, %v335_v5  ;;  %v182_v3 = vld [vmem:[%s1842_s13 + $0x2e] sm:$0x3] }
  0x2c   : > { %v1925_v62 = vmax.f32 %v1872_v54, %v342_v6  ;;  %v1929_v1 = vmax.f32 %v348_v31, %v349_v42  ;;  %v1931_v2 = vmax.f32 %v355_v32, %v356_v43  ;;  %v1933_v7 = vmax.f32 %v362_v33, %v363_v44 }
  0x2d   : > { %v370_v51 = vrot.slane %v1897_v34, 1  ;;  %v400_v52 = vsel %vm287_vm0, %v175_v40, -inf  ;;  %v407_v4 = vsel %vm287_vm0, %v176_v45, -inf  ;;  %v414_v53 = vsel %vm287_vm0, %v177_v46, -inf  ;;  %v183_v45 = vld [vmem:[%s1842_s13 + $0x30] sm:$0x3] }
  0x2e   : > { %v421_v54 = vsel %vm287_vm0, %v178_v47, -inf  ;;  %v377_v5 = vrot.slane %v1906_v48, 1  ;;  %v384_v6 = vrot.slane %v1908_v49, 1  ;;  %v391_v8 = vrot.slane %v1910_v50, 1 }
  0x2f   : > { %v398_v9 = vrot.slane %v1912_v55, 1  ;;  %v401_v10 = vrot.slane %v400_v52, 4  ;;  %v408_v11 = vrot.slane %v407_v4, 4  ;;  %v415_v12 = vrot.slane %v414_v53, 4 }
  0x30   : > { %v422_v13 = vrot.slane %v421_v54, 4  ;;  %v428_v14 = vsel %vm287_vm0, %v179_v56, -inf  ;;  %v435_v15 = vsel %vm287_vm0, %v180_v63, -inf  ;;  %v442_v16 = vsel %vm287_vm0, %v181_v0, -inf  ;;  %v184_v0 = vld [vmem:[%s1842_s13 + $0x32] sm:$0x3] }
  0x31   : > { %v449_v17 = vsel %vm287_vm0, %v182_v3, -inf  ;;  %v402_v18 = vmax.f32 %v400_v52, %v401_v10  ;;  %v409_v19 = vmax.f32 %v407_v4, %v408_v11  ;;  %v416_v20 = vmax.f32 %v414_v53, %v415_v12  ;;  %v185_v3 = vld [vmem:[%s1842_s13 + $0x34] sm:$0x3]  ;;  %v186_v52 = vld [vmem:[%s1842_s13 + $0x36] sm:$0x3] }
  0x32   : > { %v423_v21 = vmax.f32 %v421_v54, %v422_v13  ;;  %v429_v22 = vrot.slane %v428_v14, 4  ;;  %v436_v23 = vrot.slane %v435_v15, 4  ;;  %v443_v24 = vrot.slane %v442_v16, 4  ;;  %v187_v11 = vld [vmem:[%s1842_s13 + $0x38] sm:$0x3] }
  0x33   : > { %v450_v25 = vrot.slane %v449_v17, 4  ;;  %v403_v26 = vrot.slane %v402_v18, 2  ;;  %v410_v27 = vrot.slane %v409_v19, 2  ;;  %v417_v28 = vrot.slane %v416_v20, 2 }
  0x34   : > { %v424_v29 = vrot.slane %v423_v21, 2  ;;  %v430_v30 = vmax.f32 %v428_v14, %v429_v22  ;;  %v437_v31 = vmax.f32 %v435_v15, %v436_v23  ;;  %v444_v32 = vmax.f32 %v442_v16, %v443_v24  ;;  %v188_v14 = vld [vmem:[%s1842_s13 + $0x3a] sm:$0x3]  ;;  %v189_v15 = vld [vmem:[%s1842_s13 + $0x3c] sm:$0x3] }
  0x35   : > { %v451_v33 = vmax.f32 %v449_v17, %v450_v25  ;;  %v404_v35 = vmax.f32 %v402_v18, %v403_v26  ;;  %v411_v36 = vmax.f32 %v409_v19, %v410_v27  ;;  %v418_v37 = vmax.f32 %v416_v20, %v417_v28 }
  0x36   : > { %v1949_v38 = vmax.f32 %v423_v21, %v424_v29  ;;  %v431_v40 = vrot.slane %v430_v30, 2  ;;  %v438_v42 = vrot.slane %v437_v31, 2  ;;  %v445_v43 = vrot.slane %v444_v32, 2 }
  0x37   : > { %v452_v44 = vrot.slane %v451_v33, 2  ;;  %v1953_v46 = vmax.f32 %v1897_v34, %v370_v51  ;;  %v405_v47 = vrot.slane %v404_v35, 1  ;;  %v412_v56 = vrot.slane %v411_v36, 1 }
  0x38   : > { %v419_v63 = vrot.slane %v418_v37, 1  ;;  %v1958_v4 = vmax.f32 %v430_v30, %v431_v40  ;;  %v1960_v53 = vmax.f32 %v437_v31, %v438_v42  ;;  %v1962_v54 = vmax.f32 %v444_v32, %v445_v43 }
  0x39   : > { %v1964_v10 = vmax.f32 %v451_v33, %v452_v44  ;;  %v1968_v34 = vmax.f32 %v1906_v48, %v377_v5  ;;  %v1971_v51 = vmax.f32 %v1908_v49, %v384_v6  ;;  %v1974_v12 = vmax.f32 %v1910_v50, %v391_v8  ;;  %v190_v5 = vld [vmem:[%s1842_s13 + $0x3e] sm:$0x3] }
  0x3a   : > { %v1977_v13 = vmax.f32 %v1912_v55, %v398_v9  ;;  %v1981_v16 = vmax.f32 %v404_v35, %v405_v47  ;;  %v1983_v17 = vmax.f32 %v411_v36, %v412_v56  ;;  %v1985_v18 = vmax.f32 %v418_v37, %v419_v63 }
  0x3b   : > { %v426_v48 = vrot.slane %v1949_v38, 1  ;;  %v456_v49 = vsel %vm287_vm0, %v183_v45, -inf  ;;  %v463_v6 = vsel %vm287_vm0, %v184_v0, -inf  ;;  %v470_v50 = vsel %vm287_vm0, %v185_v3, -inf }
  0x3c   : > { %3571 = vst [vmem:[#allocation2_spill] sm:$0xff] %v1983_v17  ;;  %v477_v55 = vsel %vm287_vm0, %v186_v52, -inf  ;;  %v433_v8 = vrot.slane %v1958_v4, 1  ;;  %v440_v9 = vrot.slane %v1960_v53, 1  ;;  %v447_v19 = vrot.slane %v1962_v54, 1 }
  0x3d   : > { %3572 = vst [vmem:[#allocation3_spill] sm:$0xff] %v1985_v18  ;;  %v454_v20 = vrot.slane %v1964_v10, 1  ;;  %v457_v21 = vrot.slane %v456_v49, 4  ;;  %v464_v22 = vrot.slane %v463_v6, 4  ;;  %v471_v23 = vrot.slane %v470_v50, 4 }
  0x3e   : > { %v478_v24 = vrot.slane %v477_v55, 4  ;;  %v484_v25 = vsel %vm287_vm0, %v187_v11, -inf  ;;  %v491_v26 = vsel %vm287_vm0, %v188_v14, -inf  ;;  %v498_v27 = vsel %vm287_vm0, %v189_v15, -inf }
  0x3f   : > { %v505_v28 = vsel %vm287_vm0, %v190_v5, -inf  ;;  %v458_v29 = vmax.f32 %v456_v49, %v457_v21  ;;  %v465_v30 = vmax.f32 %v463_v6, %v464_v22  ;;  %v472_v31 = vmax.f32 %v470_v50, %v471_v23  ;;  %v191_v6 = vld [vmem:[%s1842_s13 + $0x40] sm:$0x3]  ;;  %v192_v23 = vld [vmem:[%s1842_s13 + $0x42] sm:$0x3] }
  0x40   : > { %v479_v32 = vmax.f32 %v477_v55, %v478_v24  ;;  %v485_v33 = vrot.slane %v484_v25, 4  ;;  %v492_v35 = vrot.slane %v491_v26, 4  ;;  %v499_v36 = vrot.slane %v498_v27, 4  ;;  %v193_v24 = vld [vmem:[%s1842_s13 + $0x44] sm:$0x3] }
  0x41   : > { %v506_v37 = vrot.slane %v505_v28, 4  ;;  %v459_v40 = vrot.slane %v458_v29, 2  ;;  %v466_v42 = vrot.slane %v465_v30, 2  ;;  %v473_v43 = vrot.slane %v472_v31, 2 }
  0x42   : > { %v480_v44 = vrot.slane %v479_v32, 2  ;;  %v486_v45 = vmax.f32 %v484_v25, %v485_v33  ;;  %v493_v47 = vmax.f32 %v491_v26, %v492_v35  ;;  %v500_v56 = vmax.f32 %v498_v27, %v499_v36  ;;  %v194_v25 = vld [vmem:[%s1842_s13 + $0x46] sm:$0x3]  ;;  %v196_v33 = vld [vmem:[%s1842_s13 + $0x4a] sm:$0x3] }
  0x43   : > { %v507_v63 = vmax.f32 %v505_v28, %v506_v37  ;;  %v460_v0 = vmax.f32 %v458_v29, %v459_v40  ;;  %v467_v3 = vmax.f32 %v465_v30, %v466_v42  ;;  %v474_v52 = vmax.f32 %v472_v31, %v473_v43  ;;  %v195_v30 = vld [vmem:[%s1842_s13 + $0x48] sm:$0x3]  ;;  %v197_v35 = vld [vmem:[%s1842_s13 + $0x4c] sm:$0x3] }
  0x44   : > { %v2001_v11 = vmax.f32 %v479_v32, %v480_v44  ;;  %v487_v14 = vrot.slane %v486_v45, 2  ;;  %v494_v15 = vrot.slane %v493_v47, 2  ;;  %v501_v5 = vrot.slane %v500_v56, 2 }
  0x45   : > { %v508_v49 = vrot.slane %v507_v63, 2  ;;  %v2005_v50 = vmax.f32 %v1949_v38, %v426_v48  ;;  %v461_v55 = vrot.slane %v460_v0, 1  ;;  %v468_v21 = vrot.slane %v467_v3, 1 }
  0x46   : > { %v475_v22 = vrot.slane %v474_v52, 1  ;;  %v2010_v26 = vmax.f32 %v486_v45, %v487_v14  ;;  %v2012_v27 = vmax.f32 %v493_v47, %v494_v15  ;;  %v2014_v28 = vmax.f32 %v500_v56, %v501_v5 }
  0x47   : > { %3573 = vst [vmem:[#allocation4_spill] sm:$0xff] %v2005_v50  ;;  %v2016_v29 = vmax.f32 %v507_v63, %v508_v49  ;;  %v2020_v38 = vmax.f32 %v1958_v4, %v433_v8  ;;  %v2023_v48 = vmax.f32 %v1960_v53, %v440_v9  ;;  %v2026_v31 = vmax.f32 %v1962_v54, %v447_v19  ;;  %v198_v8 = vld [vmem:[%s1842_s13 + $0x4e] sm:$0x3] }
  0x48   : > { %v2029_v32 = vmax.f32 %v1964_v10, %v454_v20  ;;  %v2033_v36 = vmax.f32 %v460_v0, %v461_v55  ;;  %v2035_v37 = vmax.f32 %v467_v3, %v468_v21  ;;  %v2037_v40 = vmax.f32 %v474_v52, %v475_v22 }
  0x49   : > { %3574 = vst [vmem:[#allocation5_spill] sm:$0xff] %v2020_v38  ;;  %v482_v4 = vrot.slane %v2001_v11, 1  ;;  %v512_v53 = vsel %vm287_vm0, %v191_v6, -inf  ;;  %v519_v9 = vsel %vm287_vm0, %v192_v23, -inf  ;;  %v526_v54 = vsel %vm287_vm0, %v193_v24, -inf }
  0x4a   : > { %3575 = vst [vmem:[#allocation6_spill] sm:$0xff] %v2023_v48  ;;  %v533_v10 = vsel %vm287_vm0, %v194_v25, -inf  ;;  %v489_v19 = vrot.slane %v2010_v26, 1  ;;  %v496_v20 = vrot.slane %v2012_v27, 1  ;;  %v503_v42 = vrot.slane %v2014_v28, 1 }
  0x4b   : > { %3576 = vst [vmem:[#allocation7_spill] sm:$0xff] %v2026_v31  ;;  %v510_v43 = vrot.slane %v2016_v29, 1  ;;  %v513_v44 = vrot.slane %v512_v53, 4  ;;  %v520_v45 = vrot.slane %v519_v9, 4  ;;  %v527_v47 = vrot.slane %v526_v54, 4 }
  0x4c   : > { %3577 = vst [vmem:[#allocation8_spill] sm:$0xff] %v2029_v32  ;;  %v534_v56 = vrot.slane %v533_v10, 4  ;;  %v540_v63 = vsel %vm287_vm0, %v195_v30, -inf  ;;  %v547_v0 = vsel %vm287_vm0, %v196_v33, -inf  ;;  %v554_v3 = vsel %vm287_vm0, %v197_v35, -inf }
  0x4d   : > { %3578 = vst [vmem:[#allocation9_spill] sm:$0xff] %v2035_v37  ;;  %v561_v52 = vsel %vm287_vm0, %v198_v8, -inf  ;;  %v514_v14 = vmax.f32 %v512_v53, %v513_v44  ;;  %v521_v15 = vmax.f32 %v519_v9, %v520_v45  ;;  %v528_v5 = vmax.f32 %v526_v54, %v527_v47 }
  0x4e   : > { %3579 = vst [vmem:[#allocation10_spill] sm:$0xff] %v2037_v40  ;;  %v535_v49 = vmax.f32 %v533_v10, %v534_v56  ;;  %v541_v6 = vrot.slane %v540_v63, 4  ;;  %v548_v55 = vrot.slane %v547_v0, 4  ;;  %v555_v21 = vrot.slane %v554_v3, 4  ;;  %v199_v56 = vld [vmem:[%s1842_s13 + $0x50] sm:$0x3] }
  0x4f   : > { %v562_v22 = vrot.slane %v561_v52, 4  ;;  %v515_v23 = vrot.slane %v514_v14, 2  ;;  %v522_v24 = vrot.slane %v521_v15, 2  ;;  %v529_v25 = vrot.slane %v528_v5, 2 }
  0x50   : > { %v536_v32 = vrot.slane %v535_v49, 2  ;;  %v542_v30 = vmax.f32 %v540_v63, %v541_v6  ;;  %v549_v31 = vmax.f32 %v547_v0, %v548_v55  ;;  %v556_v33 = vmax.f32 %v554_v3, %v555_v21  ;;  %v203_v55 = vld [vmem:[%s1842_s13 + $0x58] sm:$0x3] }
  0x51   : > { %v563_v35 = vmax.f32 %v561_v52, %v562_v22  ;;  %v516_v8 = vmax.f32 %v514_v14, %v515_v23  ;;  %v523_v53 = vmax.f32 %v521_v15, %v522_v24  ;;  %v530_v9 = vmax.f32 %v528_v5, %v529_v25  ;;  %v200_v52 = vld [vmem:[%s1842_s13 + $0x52] sm:$0x3]  ;;  %v201_v14 = vld [vmem:[%s1842_s13 + $0x54] sm:$0x3]  ;;  %v202_v15 = vld [vmem:[%s1842_s13 + $0x56] sm:$0x3] }
  0x52   : > { %v2053_v54 = vmax.f32 %v535_v49, %v536_v32  ;;  %v543_v10 = vrot.slane %v542_v30, 2  ;;  %v550_v44 = vrot.slane %v549_v31, 2  ;;  %v557_v45 = vrot.slane %v556_v33, 2  ;;  %v204_v23 = vld [vmem:[%s1842_s13 + $0x5a] sm:$0x3] }
  0x53   : > { %v564_v47 = vrot.slane %v563_v35, 2  ;;  %v2057_v48 = vmax.f32 %v2001_v11, %v482_v4  ;;  %v517_v63 = vrot.slane %v516_v8, 1  ;;  %v524_v0 = vrot.slane %v523_v53, 1 }
  0x54   : > { %v531_v3 = vrot.slane %v530_v9, 1  ;;  %v2062_v32 = vmax.f32 %v542_v30, %v543_v10  ;;  %v2064_v5 = vmax.f32 %v549_v31, %v550_v44  ;;  %v2066_v49 = vmax.f32 %v556_v33, %v557_v45  ;;  %v205_v31 = vld [vmem:[%s1842_s13 + $0x5c] sm:$0x3] }
  0x55   : > { %3580 = vst [vmem:[#allocation11_spill] sm:$0xff] %v2057_v48  ;;  %v2068_v6 = vmax.f32 %v563_v35, %v564_v47  ;;  %v2072_v11 = vmax.f32 %v2010_v26, %v489_v19  ;;  %v2075_v4 = vmax.f32 %v2012_v27, %v496_v20  ;;  %v2078_v21 = vmax.f32 %v2014_v28, %v503_v42  ;;  %v206_v19 = vld [vmem:[%s1842_s13 + $0x5e] sm:$0x3] }
  0x56   : > { %v2081_v22 = vmax.f32 %v2016_v29, %v510_v43  ;;  %v2085_v24 = vmax.f32 %v516_v8, %v517_v63  ;;  %v2087_v25 = vmax.f32 %v523_v53, %v524_v0  ;;  %v2089_v30 = vmax.f32 %v530_v9, %v531_v3 }
  0x57   : > { %3581 = vst [vmem:[#allocation12_spill] sm:$0xff] %v2072_v11  ;;  %v538_v26 = vrot.slane %v2053_v54, 1  ;;  %v568_v27 = vsel %vm287_vm0, %v199_v56, -inf  ;;  %v575_v20 = vsel %vm287_vm0, %v200_v52, -inf  ;;  %v582_v28 = vsel %vm287_vm0, %v201_v14, -inf }
  0x58   : > { %3582 = vst [vmem:[#allocation13_spill] sm:$0xff] %v2075_v4  ;;  %v589_v29 = vsel %vm287_vm0, %v202_v15, -inf  ;;  %v545_v42 = vrot.slane %v2062_v32, 1  ;;  %v552_v43 = vrot.slane %v2064_v5, 1  ;;  %v559_v33 = vrot.slane %v2066_v49, 1 }
  0x59   : > { %3583 = vst [vmem:[#allocation14_spill] sm:$0xff] %v2078_v21  ;;  %v566_v35 = vrot.slane %v2068_v6, 1  ;;  %v569_v8 = vrot.slane %v568_v27, 4  ;;  %v576_v53 = vrot.slane %v575_v20, 4  ;;  %v583_v9 = vrot.slane %v582_v28, 4 }
  0x5a   : > { %3584 = vst [vmem:[#allocation15_spill] sm:$0xff] %v2081_v22  ;;  %v590_v10 = vrot.slane %v589_v29, 4  ;;  %v596_v44 = vsel %vm287_vm0, %v203_v55, -inf  ;;  %v603_v45 = vsel %vm287_vm0, %v204_v23, -inf  ;;  %v610_v47 = vsel %vm287_vm0, %v205_v31, -inf }
  0x5b   : > { %3585 = vst [vmem:[#allocation16_spill] sm:$0xff] %v2085_v24  ;;  %v617_v56 = vsel %vm287_vm0, %v206_v19, -inf  ;;  %v570_v63 = vmax.f32 %v568_v27, %v569_v8  ;;  %v577_v0 = vmax.f32 %v575_v20, %v576_v53  ;;  %v584_v3 = vmax.f32 %v582_v28, %v583_v9 }
  0x5c   : > { %3586 = vst [vmem:[#allocation17_spill] sm:$0xff] %v2087_v25  ;;  %v591_v52 = vmax.f32 %v589_v29, %v590_v10  ;;  %v597_v14 = vrot.slane %v596_v44, 4  ;;  %v604_v15 = vrot.slane %v603_v45, 4  ;;  %v618_v25 = vrot.slane %v617_v56, 4  ;;  %v207_v10 = vld [vmem:[%s1842_s13 + $0x60] sm:$0x3] }
  0x5d   : > { %3587 = vst [vmem:[#allocation18_spill] sm:$0xff] %v2089_v30  ;;  %v611_v30 = vrot.slane %v610_v47, 4  ;;  %v571_v24 = vrot.slane %v570_v63, 2  ;;  %v578_v22 = vrot.slane %v577_v0, 2  ;;  %v585_v21 = vrot.slane %v584_v3, 2 }
  0x5e   : > { %v592_v4 = vrot.slane %v591_v52, 2  ;;  %v598_v55 = vmax.f32 %v596_v44, %v597_v14  ;;  %v605_v11 = vmax.f32 %v603_v45, %v604_v15  ;;  %v619_v31 = vmax.f32 %v617_v56, %v618_v25  ;;  %v208_v45 = vld [vmem:[%s1842_s13 + $0x62] sm:$0x3] }
  0x5f   : > { %v612_v23 = vmax.f32 %v610_v47, %v611_v30  ;;  %v572_v19 = vmax.f32 %v570_v63, %v571_v24  ;;  %v579_v27 = vmax.f32 %v577_v0, %v578_v22  ;;  %v586_v20 = vmax.f32 %v584_v3, %v585_v21  ;;  %v209_v24 = vld [vmem:[%s1842_s13 + $0x64] sm:$0x3]  ;;  %v210_v22 = vld [vmem:[%s1842_s13 + $0x66] sm:$0x3]  ;;  %v211_v63 = vld [vmem:[%s1842_s13 + $0x68] sm:$0x3] }
  0x60   : > { %v2105_v28 = vmax.f32 %v591_v52, %v592_v4  ;;  %v599_v29 = vrot.slane %v598_v55, 2  ;;  %v606_v8 = vrot.slane %v605_v11, 2  ;;  %v620_v9 = vrot.slane %v619_v31, 2  ;;  %v212_v52 = vld [vmem:[%s1842_s13 + $0x6a] sm:$0x3] }
  0x61   : > { %v613_v53 = vrot.slane %v612_v23, 2  ;;  %v2109_v38 = vmax.f32 %v2053_v54, %v538_v26  ;;  %v573_v44 = vrot.slane %v572_v19, 1  ;;  %v580_v30 = vrot.slane %v579_v27, 1 }
  0x62   : > { %v587_v25 = vrot.slane %v586_v20, 1  ;;  %v2114_v4 = vmax.f32 %v598_v55, %v599_v29  ;;  %v2116_v21 = vmax.f32 %v605_v11, %v606_v8  ;;  %v2120_v56 = vmax.f32 %v619_v31, %v620_v9  ;;  %v213_v11 = vld [vmem:[%s1842_s13 + $0x6c] sm:$0x3] }
  0x63   : > { %3588 = vst [vmem:[#allocation19_spill] sm:$0xff] %v2109_v38  ;;  %v2118_v47 = vmax.f32 %v612_v23, %v613_v53  ;;  %v2124_v54 = vmax.f32 %v2062_v32, %v545_v42  ;;  %v2127_v26 = vmax.f32 %v2064_v5, %v552_v43  ;;  %v2130_v0 = vmax.f32 %v2066_v49, %v559_v33  ;;  %v214_v42 = vld [vmem:[%s1842_s13 + $0x6e] sm:$0x3] }
  0x64   : > { %v2133_v3 = vmax.f32 %v2068_v6, %v566_v35  ;;  %v2137_v14 = vmax.f32 %v572_v19, %v573_v44  ;;  %v2139_v15 = vmax.f32 %v579_v27, %v580_v30  ;;  %v2141_v55 = vmax.f32 %v586_v20, %v587_v25 }
  0x65   : > { %3589 = vst [vmem:[#allocation20_spill] sm:$0xff] %v2124_v54  ;;  %v594_v32 = vrot.slane %v2105_v28, 1  ;;  %v624_v5 = vsel %vm287_vm0, %v207_v10, -inf  ;;  %v631_v43 = vsel %vm287_vm0, %v208_v45, -inf  ;;  %v638_v49 = vsel %vm287_vm0, %v209_v24, -inf }
  0x66   : > { %3590 = vst [vmem:[#allocation21_spill] sm:$0xff] %v2127_v26  ;;  %v645_v6 = vsel %vm287_vm0, %v210_v22, -inf  ;;  %v601_v33 = vrot.slane %v2114_v4, 1  ;;  %v608_v35 = vrot.slane %v2116_v21, 1  ;;  %v615_v23 = vrot.slane %v2118_v47, 1 }
  0x67   : > { %3591 = vst [vmem:[#allocation22_spill] sm:$0xff] %v2130_v0  ;;  %v622_v31 = vrot.slane %v2120_v56, 1  ;;  %v625_v19 = vrot.slane %v624_v5, 4  ;;  %v632_v27 = vrot.slane %v631_v43, 4  ;;  %v639_v20 = vrot.slane %v638_v49, 4 }
  0x68   : > { %3592 = vst [vmem:[#allocation23_spill] sm:$0xff] %v2133_v3  ;;  %v646_v29 = vrot.slane %v645_v6, 4  ;;  %v652_v8 = vsel %vm287_vm0, %v211_v63, -inf  ;;  %v659_v53 = vsel %vm287_vm0, %v212_v52, -inf  ;;  %v666_v9 = vsel %vm287_vm0, %v213_v11, -inf }
  0x69   : > { %3593 = vst [vmem:[#allocation24_spill] sm:$0xff] %v2137_v14  ;;  %v673_v10 = vsel %vm287_vm0, %v214_v42, -inf  ;;  %v626_v44 = vmax.f32 %v624_v5, %v625_v19  ;;  %v633_v30 = vmax.f32 %v631_v43, %v632_v27  ;;  %v640_v25 = vmax.f32 %v638_v49, %v639_v20 }
  0x6a   : > { %3594 = vst [vmem:[#allocation25_spill] sm:$0xff] %v2139_v15  ;;  %v647_v45 = vmax.f32 %v645_v6, %v646_v29  ;;  %v653_v24 = vrot.slane %v652_v8, 4  ;;  %v660_v22 = vrot.slane %v659_v53, 4  ;;  %v667_v3 = vrot.slane %v666_v9, 4  ;;  %v215_v29 = vld [vmem:[%s1842_s13 + $0x70] sm:$0x3] }
  0x6b   : > { %3595 = vst [vmem:[#allocation26_spill] sm:$0xff] %v2141_v55  ;;  %v674_v0 = vrot.slane %v673_v10, 4  ;;  %v627_v26 = vrot.slane %v626_v44, 2  ;;  %v634_v54 = vrot.slane %v633_v30, 2  ;;  %v641_v38 = vrot.slane %v640_v25, 2 }
  0x6c   : > { %v648_v55 = vrot.slane %v647_v45, 2  ;;  %v654_v63 = vmax.f32 %v652_v8, %v653_v24  ;;  %v661_v15 = vmax.f32 %v659_v53, %v660_v22  ;;  %v668_v52 = vmax.f32 %v666_v9, %v667_v3  ;;  %v216_v53 = vld [vmem:[%s1842_s13 + $0x72] sm:$0x3] }
  0x6d   : > { %v675_v11 = vmax.f32 %v673_v10, %v674_v0  ;;  %v628_v42 = vmax.f32 %v626_v44, %v627_v26  ;;  %v635_v5 = vmax.f32 %v633_v30, %v634_v54  ;;  %v642_v43 = vmax.f32 %v640_v25, %v641_v38  ;;  %v217_v26 = vld [vmem:[%s1842_s13 + $0x74] sm:$0x3]  ;;  %v218_v54 = vld [vmem:[%s1842_s13 + $0x76] sm:$0x3]  ;;  %v219_v44 = vld [vmem:[%s1842_s13 + $0x78] sm:$0x3] }
  0x6e   : > { %v2157_v49 = vmax.f32 %v647_v45, %v648_v55  ;;  %v655_v6 = vrot.slane %v654_v63, 2  ;;  %v662_v19 = vrot.slane %v661_v15, 2  ;;  %v669_v27 = vrot.slane %v668_v52, 2  ;;  %v220_v45 = vld [vmem:[%s1842_s13 + $0x7a] sm:$0x3] }
  0x6f   : > { %v676_v20 = vrot.slane %v675_v11, 2  ;;  %v2161_v14 = vmax.f32 %v2105_v28, %v594_v32  ;;  %v629_v8 = vrot.slane %v628_v42, 1  ;;  %v636_v3 = vrot.slane %v635_v5, 1 }
  0x70   : > { %v643_v0 = vrot.slane %v642_v43, 1  ;;  %v2166_v38 = vmax.f32 %v654_v63, %v655_v6  ;;  %v2168_v55 = vmax.f32 %v661_v15, %v662_v19  ;;  %v2170_v9 = vmax.f32 %v668_v52, %v669_v27  ;;  %v221_v15 = vld [vmem:[%s1842_s13 + $0x7c] sm:$0x3] }
  0x71   : > { %3596 = vst [vmem:[#allocation27_spill] sm:$0xff] %v2161_v14  ;;  %v2172_v10 = vmax.f32 %v675_v11, %v676_v20  ;;  %v2176_v28 = vmax.f32 %v2114_v4, %v601_v33  ;;  %v2179_v32 = vmax.f32 %v2116_v21, %v608_v35  ;;  %v2182_v30 = vmax.f32 %v2118_v47, %v615_v23  ;;  %v222_v33 = vld [vmem:[%s1842_s13 + $0x7e] sm:$0x3] }
  0x72   : > { %v2185_v25 = vmax.f32 %v2120_v56, %v622_v31  ;;  %v2189_v24 = vmax.f32 %v628_v42, %v629_v8  ;;  %v2191_v22 = vmax.f32 %v635_v5, %v636_v3  ;;  %v2193_v63 = vmax.f32 %v642_v43, %v643_v0 }
  0x73   : > { %3597 = vst [vmem:[#allocation28_spill] sm:$0xff] %v2176_v28  ;;  %v650_v4 = vrot.slane %v2157_v49, 1  ;;  %v680_v21 = vsel %vm287_vm0, %v215_v29, -inf  ;;  %v687_v35 = vsel %vm287_vm0, %v216_v53, -inf  ;;  %v694_v47 = vsel %vm287_vm0, %v217_v26, -inf }
  0x74   : > { %3598 = vst [vmem:[#allocation29_spill] sm:$0xff] %v2179_v32  ;;  %v701_v56 = vsel %vm287_vm0, %v218_v54, -inf  ;;  %v657_v23 = vrot.slane %v2166_v38, 1  ;;  %v664_v31 = vrot.slane %v2168_v55, 1  ;;  %v671_v52 = vrot.slane %v2170_v9, 1 }
  0x75   : > { %3599 = vst [vmem:[#allocation30_spill] sm:$0xff] %v2182_v30  ;;  %v678_v11 = vrot.slane %v2172_v10, 1  ;;  %v681_v42 = vrot.slane %v680_v21, 4  ;;  %v688_v5 = vrot.slane %v687_v35, 4  ;;  %v695_v43 = vrot.slane %v694_v47, 4 }
  0x76   : > { %3600 = vst [vmem:[#allocation31_spill] sm:$0xff] %v2185_v25  ;;  %v702_v6 = vrot.slane %v701_v56, 4  ;;  %v708_v19 = vsel %vm287_vm0, %v219_v44, -inf  ;;  %v715_v27 = vsel %vm287_vm0, %v220_v45, -inf  ;;  %v722_v20 = vsel %vm287_vm0, %v221_v15, -inf }
  0x77   : > { %3601 = vst [vmem:[#allocation32_spill] sm:$0xff] %v2189_v24  ;;  %v729_v29 = vsel %vm287_vm0, %v222_v33, -inf  ;;  %v682_v8 = vmax.f32 %v680_v21, %v681_v42  ;;  %v689_v3 = vmax.f32 %v687_v35, %v688_v5  ;;  %v696_v0 = vmax.f32 %v694_v47, %v695_v43 }
  0x78   : > { %3602 = vst [vmem:[#allocation33_spill] sm:$0xff] %v2191_v22  ;;  %v703_v53 = vmax.f32 %v701_v56, %v702_v6  ;;  %v709_v26 = vrot.slane %v708_v19, 4  ;;  %v716_v54 = vrot.slane %v715_v27, 4  ;;  %v730_v22 = vrot.slane %v729_v29, 4  ;;  %v223_v6 = vld [vmem:[%s1842_s13 + $0x80] sm:$0x3] }
  0x79   : > { %3603 = vst [vmem:[#allocation34_spill] sm:$0xff] %v2193_v63  ;;  %v723_v63 = vrot.slane %v722_v20, 4  ;;  %v683_v24 = vrot.slane %v682_v8, 2  ;;  %v690_v25 = vrot.slane %v689_v3, 2  ;;  %v697_v30 = vrot.slane %v696_v0, 2 }
  0x7a   : > { %v704_v32 = vrot.slane %v703_v53, 2  ;;  %v710_v44 = vmax.f32 %v708_v19, %v709_v26  ;;  %v717_v28 = vmax.f32 %v715_v27, %v716_v54  ;;  %v731_v15 = vmax.f32 %v729_v29, %v730_v22  ;;  %v224_v27 = vld [vmem:[%s1842_s13 + $0x82] sm:$0x3] }
  0x7b   : > { %v724_v45 = vmax.f32 %v722_v20, %v723_v63  ;;  %v684_v33 = vmax.f32 %v682_v8, %v683_v24  ;;  %v691_v21 = vmax.f32 %v689_v3, %v690_v25  ;;  %v698_v35 = vmax.f32 %v696_v0, %v697_v30  ;;  %v225_v24 = vld [vmem:[%s1842_s13 + $0x84] sm:$0x3]  ;;  %v226_v25 = vld [vmem:[%s1842_s13 + $0x86] sm:$0x3]  ;;  %v227_v8 = vld [vmem:[%s1842_s13 + $0x88] sm:$0x3] }
  0x7c   : > { %v2209_v47 = vmax.f32 %v703_v53, %v704_v32  ;;  %v711_v56 = vrot.slane %v710_v44, 2  ;;  %v718_v42 = vrot.slane %v717_v28, 2  ;;  %v732_v43 = vrot.slane %v731_v15, 2  ;;  %v228_v53 = vld [vmem:[%s1842_s13 + $0x8a] sm:$0x3] }
  0x7d   : > { %v725_v5 = vrot.slane %v724_v45, 2  ;;  %v2213_v14 = vmax.f32 %v2157_v49, %v650_v4  ;;  %v685_v19 = vrot.slane %v684_v33, 1  ;;  %v692_v63 = vrot.slane %v691_v21, 1 }
  0x7e   : > { %v699_v22 = vrot.slane %v698_v35, 1  ;;  %v2218_v32 = vmax.f32 %v710_v44, %v711_v56  ;;  %v2220_v30 = vmax.f32 %v717_v28, %v718_v42  ;;  %v2224_v29 = vmax.f32 %v731_v15, %v732_v43  ;;  %v229_v28 = vld [vmem:[%s1842_s13 + $0x8c] sm:$0x3] }
  0x7f   : > { %3604 = vst [vmem:[#allocation35_spill] sm:$0xff] %v2213_v14  ;;  %v2222_v20 = vmax.f32 %v724_v45, %v725_v5  ;;  %v2228_v49 = vmax.f32 %v2166_v38, %v657_v23  ;;  %v2231_v4 = vmax.f32 %v2168_v55, %v664_v31  ;;  %v2234_v3 = vmax.f32 %v2170_v9, %v671_v52  ;;  %v230_v23 = vld [vmem:[%s1842_s13 + $0x8e] sm:$0x3] }
  0x80   : > { %v2237_v0 = vmax.f32 %v2172_v10, %v678_v11  ;;  %v2241_v26 = vmax.f32 %v684_v33, %v685_v19  ;;  %v2243_v54 = vmax.f32 %v691_v21, %v692_v63  ;;  %v2245_v44 = vmax.f32 %v698_v35, %v699_v22 }
  0x81   : > { %3605 = vst [vmem:[#allocation36_spill] sm:$0xff] %v2228_v49  ;;  %v706_v38 = vrot.slane %v2209_v47, 1  ;;  %v736_v55 = vsel %vm287_vm0, %v223_v6, -inf  ;;  %v743_v31 = vsel %vm287_vm0, %v224_v27, -inf  ;;  %v750_v9 = vsel %vm287_vm0, %v225_v24, -inf }
  0x82   : > { %3606 = vst [vmem:[#allocation37_spill] sm:$0xff] %v2231_v4  ;;  %v757_v10 = vsel %vm287_vm0, %v226_v25, -inf  ;;  %v713_v52 = vrot.slane %v2218_v32, 1  ;;  %v720_v11 = vrot.slane %v2220_v30, 1  ;;  %v727_v45 = vrot.slane %v2222_v20, 1 }
  0x83   : > { %3607 = vst [vmem:[#allocation38_spill] sm:$0xff] %v2234_v3  ;;  %v734_v15 = vrot.slane %v2224_v29, 1  ;;  %v737_v33 = vrot.slane %v736_v55, 4  ;;  %v744_v21 = vrot.slane %v743_v31, 4  ;;  %v751_v35 = vrot.slane %v750_v9, 4 }
  0x84   : > { %3608 = vst [vmem:[#allocation39_spill] sm:$0xff] %v2237_v0  ;;  %v758_v56 = vrot.slane %v757_v10, 4  ;;  %v764_v42 = vsel %vm287_vm0, %v227_v8, -inf  ;;  %v771_v5 = vsel %vm287_vm0, %v228_v53, -inf  ;;  %v778_v43 = vsel %vm287_vm0, %v229_v28, -inf }
  0x85   : > { %3609 = vst [vmem:[#allocation40_spill] sm:$0xff] %v2241_v26  ;;  %v785_v6 = vsel %vm287_vm0, %v230_v23, -inf  ;;  %v738_v19 = vmax.f32 %v736_v55, %v737_v33  ;;  %v745_v63 = vmax.f32 %v743_v31, %v744_v21  ;;  %v752_v22 = vmax.f32 %v750_v9, %v751_v35 }
  0x86   : > { %3610 = vst [vmem:[#allocation41_spill] sm:$0xff] %v2243_v54  ;;  %v759_v27 = vmax.f32 %v757_v10, %v758_v56  ;;  %v765_v24 = vrot.slane %v764_v42, 4  ;;  %v772_v25 = vrot.slane %v771_v5, 4  ;;  %v779_v0 = vrot.slane %v778_v43, 4  ;;  %v231_v56 = vld [vmem:[%s1842_s13 + $0x90] sm:$0x3] }
  0x87   : > { %3611 = vst [vmem:[#allocation42_spill] sm:$0xff] %v2245_v44  ;;  %v786_v3 = vrot.slane %v785_v6, 4  ;;  %v739_v4 = vrot.slane %v738_v19, 2  ;;  %v746_v49 = vrot.slane %v745_v63, 2  ;;  %v753_v14 = vrot.slane %v752_v22, 2 }
  0x88   : > { %v760_v44 = vrot.slane %v759_v27, 2  ;;  %v766_v8 = vmax.f32 %v764_v42, %v765_v24  ;;  %v773_v54 = vmax.f32 %v771_v5, %v772_v25  ;;  %v780_v53 = vmax.f32 %v778_v43, %v779_v0  ;;  %v232_v5 = vld [vmem:[%s1842_s13 + $0x92] sm:$0x3] }
  0x89   : > { %v787_v28 = vmax.f32 %v785_v6, %v786_v3  ;;  %v740_v23 = vmax.f32 %v738_v19, %v739_v4  ;;  %v747_v55 = vmax.f32 %v745_v63, %v746_v49  ;;  %v754_v31 = vmax.f32 %v752_v22, %v753_v14  ;;  %v233_v4 = vld [vmem:[%s1842_s13 + $0x94] sm:$0x3]  ;;  %v234_v49 = vld [vmem:[%s1842_s13 + $0x96] sm:$0x3]  ;;  %v235_v19 = vld [vmem:[%s1842_s13 + $0x98] sm:$0x3] }
  0x8a   : > { %v2261_v9 = vmax.f32 %v759_v27, %v760_v44  ;;  %v767_v10 = vrot.slane %v766_v8, 2  ;;  %v774_v33 = vrot.slane %v773_v54, 2  ;;  %v781_v21 = vrot.slane %v780_v53, 2  ;;  %v236_v27 = vld [vmem:[%s1842_s13 + $0x9a] sm:$0x3] }
  0x8b   : > { %v788_v35 = vrot.slane %v787_v28, 2  ;;  %v2265_v26 = vmax.f32 %v2209_v47, %v706_v38  ;;  %v741_v42 = vrot.slane %v740_v23, 1  ;;  %v748_v0 = vrot.slane %v747_v55, 1 }
  0x8c   : > { %v755_v3 = vrot.slane %v754_v31, 1  ;;  %v2270_v14 = vmax.f32 %v766_v8, %v767_v10  ;;  %v2272_v44 = vmax.f32 %v773_v54, %v774_v33  ;;  %v2274_v43 = vmax.f32 %v780_v53, %v781_v21  ;;  %v237_v54 = vld [vmem:[%s1842_s13 + $0x9c] sm:$0x3] }
  0x8d   : > { %3612 = vst [vmem:[#allocation43_spill] sm:$0xff] %v2265_v26  ;;  %v2276_v6 = vmax.f32 %v787_v28, %v788_v35  ;;  %v2280_v47 = vmax.f32 %v2218_v32, %v713_v52  ;;  %v2283_v38 = vmax.f32 %v2220_v30, %v720_v11  ;;  %v2286_v63 = vmax.f32 %v2222_v20, %v727_v45  ;;  %v238_v52 = vld [vmem:[%s1842_s13 + $0x9e] sm:$0x3] }
  0x8e   : > { %v2289_v22 = vmax.f32 %v2224_v29, %v734_v15  ;;  %v2293_v24 = vmax.f32 %v740_v23, %v741_v42  ;;  %v2295_v25 = vmax.f32 %v747_v55, %v748_v0  ;;  %v2297_v8 = vmax.f32 %v754_v31, %v755_v3 }
  0x8f   : > { %3613 = vst [vmem:[#allocation44_spill] sm:$0xff] %v2280_v47  ;;  %v762_v32 = vrot.slane %v2261_v9, 1  ;;  %v792_v30 = vsel %vm287_vm0, %v231_v56, -inf  ;;  %v799_v11 = vsel %vm287_vm0, %v232_v5, -inf  ;;  %v806_v20 = vsel %vm287_vm0, %v233_v4, -inf }
  0x90   : > { %3614 = vst [vmem:[#allocation45_spill] sm:$0xff] %v2283_v38  ;;  %v813_v29 = vsel %vm287_vm0, %v234_v49, -inf  ;;  %v769_v45 = vrot.slane %v2270_v14, 1  ;;  %v776_v15 = vrot.slane %v2272_v44, 1  ;;  %v783_v53 = vrot.slane %v2274_v43, 1 }
  0x91   : > { %3615 = vst [vmem:[#allocation46_spill] sm:$0xff] %v2286_v63  ;;  %v790_v28 = vrot.slane %v2276_v6, 1  ;;  %v793_v23 = vrot.slane %v792_v30, 4  ;;  %v800_v55 = vrot.slane %v799_v11, 4  ;;  %v807_v31 = vrot.slane %v806_v20, 4 }
  0x92   : > { %3616 = vst [vmem:[#allocation47_spill] sm:$0xff] %v2289_v22  ;;  %v814_v10 = vrot.slane %v813_v29, 4  ;;  %v820_v33 = vsel %vm287_vm0, %v235_v19, -inf  ;;  %v827_v21 = vsel %vm287_vm0, %v236_v27, -inf  ;;  %v834_v35 = vsel %vm287_vm0, %v237_v54, -inf }
  0x93   : > { %3617 = vst [vmem:[#allocation48_spill] sm:$0xff] %v2293_v24  ;;  %v841_v56 = vsel %vm287_vm0, %v238_v52, -inf  ;;  %v794_v42 = vmax.f32 %v792_v30, %v793_v23  ;;  %v801_v0 = vmax.f32 %v799_v11, %v800_v55  ;;  %v808_v3 = vmax.f32 %v806_v20, %v807_v31 }
  0x94   : > { %3618 = vst [vmem:[#allocation49_spill] sm:$0xff] %v2295_v25  ;;  %v815_v5 = vmax.f32 %v813_v29, %v814_v10  ;;  %v821_v4 = vrot.slane %v820_v33, 4  ;;  %v828_v49 = vrot.slane %v827_v21, 4  ;;  %v842_v25 = vrot.slane %v841_v56, 4  ;;  %v239_v10 = vld [vmem:[%s1842_s13 + $0xa0] sm:$0x3] }
  0x95   : > { %3619 = vst [vmem:[#allocation50_spill] sm:$0xff] %v2297_v8  ;;  %v835_v8 = vrot.slane %v834_v35, 4  ;;  %v795_v24 = vrot.slane %v794_v42, 2  ;;  %v802_v22 = vrot.slane %v801_v0, 2  ;;  %v809_v63 = vrot.slane %v808_v3, 2 }
  0x96   : > { %v816_v38 = vrot.slane %v815_v5, 2  ;;  %v822_v19 = vmax.f32 %v820_v33, %v821_v4  ;;  %v829_v47 = vmax.f32 %v827_v21, %v828_v49  ;;  %v843_v54 = vmax.f32 %v841_v56, %v842_v25  ;;  %v240_v21 = vld [vmem:[%s1842_s13 + $0xa2] sm:$0x3] }
  0x97   : > { %v836_v27 = vmax.f32 %v834_v35, %v835_v8  ;;  %v796_v52 = vmax.f32 %v794_v42, %v795_v24  ;;  %v803_v30 = vmax.f32 %v801_v0, %v802_v22  ;;  %v810_v11 = vmax.f32 %v808_v3, %v809_v63  ;;  %v241_v24 = vld [vmem:[%s1842_s13 + $0xa4] sm:$0x3]  ;;  %v242_v22 = vld [vmem:[%s1842_s13 + $0xa6] sm:$0x3]  ;;  %v243_v42 = vld [vmem:[%s1842_s13 + $0xa8] sm:$0x3] }
  0x98   : > { %v2313_v20 = vmax.f32 %v815_v5, %v816_v38  ;;  %v823_v29 = vrot.slane %v822_v19, 2  ;;  %v830_v23 = vrot.slane %v829_v47, 2  ;;  %v844_v31 = vrot.slane %v843_v54, 2  ;;  %v244_v5 = vld [vmem:[%s1842_s13 + $0xaa] sm:$0x3] }
  0x99   : > { %v837_v55 = vrot.slane %v836_v27, 2  ;;  %v2317_v26 = vmax.f32 %v2261_v9, %v762_v32  ;;  %v797_v33 = vrot.slane %v796_v52, 1  ;;  %v804_v8 = vrot.slane %v803_v30, 1 }
  0x9a   : > { %v811_v25 = vrot.slane %v810_v11, 1  ;;  %v2322_v38 = vmax.f32 %v822_v19, %v823_v29  ;;  %v2324_v63 = vmax.f32 %v829_v47, %v830_v23  ;;  %v2328_v56 = vmax.f32 %v843_v54, %v844_v31  ;;  %v245_v47 = vld [vmem:[%s1842_s13 + $0xac] sm:$0x3] }
  0x9b   : > { %3620 = vst [vmem:[#allocation51_spill] sm:$0xff] %v2317_v26  ;;  %v2326_v35 = vmax.f32 %v836_v27, %v837_v55  ;;  %v2332_v9 = vmax.f32 %v2270_v14, %v769_v45  ;;  %v2335_v32 = vmax.f32 %v2272_v44, %v776_v15  ;;  %v2338_v0 = vmax.f32 %v2274_v43, %v783_v53  ;;  %v246_v45 = vld [vmem:[%s1842_s13 + $0xae] sm:$0x3] }
  0x9c   : > { %v2341_v3 = vmax.f32 %v2276_v6, %v790_v28  ;;  %v2345_v4 = vmax.f32 %v796_v52, %v797_v33  ;;  %v2347_v49 = vmax.f32 %v803_v30, %v804_v8  ;;  %v2349_v19 = vmax.f32 %v810_v11, %v811_v25 }
  0x9d   : > { %3621 = vst [vmem:[#allocation52_spill] sm:$0xff] %v2332_v9  ;;  %v818_v14 = vrot.slane %v2313_v20, 1  ;;  %v848_v44 = vsel %vm287_vm0, %v239_v10, -inf  ;;  %v855_v15 = vsel %vm287_vm0, %v240_v21, -inf  ;;  %v862_v43 = vsel %vm287_vm0, %v241_v24, -inf }
  0x9e   : > { %3622 = vst [vmem:[#allocation53_spill] sm:$0xff] %v2335_v32  ;;  %v869_v6 = vsel %vm287_vm0, %v242_v22, -inf  ;;  %v825_v53 = vrot.slane %v2322_v38, 1  ;;  %v832_v28 = vrot.slane %v2324_v63, 1  ;;  %v839_v27 = vrot.slane %v2326_v35, 1 }
  0x9f   : > { %3623 = vst [vmem:[#allocation54_spill] sm:$0xff] %v2338_v0  ;;  %v846_v54 = vrot.slane %v2328_v56, 1  ;;  %v849_v52 = vrot.slane %v848_v44, 4  ;;  %v856_v30 = vrot.slane %v855_v15, 4  ;;  %v863_v11 = vrot.slane %v862_v43, 4 }
  0xa0   : > { %3624 = vst [vmem:[#allocation55_spill] sm:$0xff] %v2341_v3  ;;  %v870_v29 = vrot.slane %v869_v6, 4  ;;  %v876_v23 = vsel %vm287_vm0, %v243_v42, -inf  ;;  %v883_v55 = vsel %vm287_vm0, %v244_v5, -inf  ;;  %v890_v31 = vsel %vm287_vm0, %v245_v47, -inf }
  0xa1   : > { %3625 = vst [vmem:[#allocation56_spill] sm:$0xff] %v2345_v4  ;;  %v897_v10 = vsel %vm287_vm0, %v246_v45, -inf  ;;  %v850_v33 = vmax.f32 %v848_v44, %v849_v52  ;;  %v857_v8 = vmax.f32 %v855_v15, %v856_v30  ;;  %v864_v25 = vmax.f32 %v862_v43, %v863_v11 }
  0xa2   : > { %3626 = vst [vmem:[#allocation57_spill] sm:$0xff] %v2347_v49  ;;  %v871_v21 = vmax.f32 %v869_v6, %v870_v29  ;;  %v877_v24 = vrot.slane %v876_v23, 4  ;;  %v884_v22 = vrot.slane %v883_v55, 4  ;;  %v891_v3 = vrot.slane %v890_v31, 4  ;;  %v247_v29 = vld [vmem:[%s1842_s13 + $0xb0] sm:$0x3] }
  0xa3   : > { %3627 = vst [vmem:[#allocation58_spill] sm:$0xff] %v2349_v19  ;;  %v898_v0 = vrot.slane %v897_v10, 4  ;;  %v851_v32 = vrot.slane %v850_v33, 2  ;;  %v858_v9 = vrot.slane %v857_v8, 2  ;;  %v865_v26 = vrot.slane %v864_v25, 2 }
  0xa4   : > { %v872_v19 = vrot.slane %v871_v21, 2  ;;  %v878_v42 = vmax.f32 %v876_v23, %v877_v24  ;;  %v885_v49 = vmax.f32 %v883_v55, %v884_v22  ;;  %v892_v5 = vmax.f32 %v890_v31, %v891_v3  ;;  %v248_v55 = vld [vmem:[%s1842_s13 + $0xb2] sm:$0x3] }
  0xa5   : > { %v899_v47 = vmax.f32 %v897_v10, %v898_v0  ;;  %v852_v45 = vmax.f32 %v850_v33, %v851_v32  ;;  %v859_v44 = vmax.f32 %v857_v8, %v858_v9  ;;  %v866_v15 = vmax.f32 %v864_v25, %v865_v26  ;;  %v249_v32 = vld [vmem:[%s1842_s13 + $0xb4] sm:$0x3]  ;;  %v250_v9 = vld [vmem:[%s1842_s13 + $0xb6] sm:$0x3]  ;;  %v251_v33 = vld [vmem:[%s1842_s13 + $0xb8] sm:$0x3] }
  0xa6   : > { %v2365_v43 = vmax.f32 %v871_v21, %v872_v19  ;;  %v879_v6 = vrot.slane %v878_v42, 2  ;;  %v886_v52 = vrot.slane %v885_v49, 2  ;;  %v893_v30 = vrot.slane %v892_v5, 2  ;;  %v252_v21 = vld [vmem:[%s1842_s13 + $0xba] sm:$0x3] }
  0xa7   : > { %v900_v11 = vrot.slane %v899_v47, 2  ;;  %v2369_v4 = vmax.f32 %v2313_v20, %v818_v14  ;;  %v853_v23 = vrot.slane %v852_v45, 1  ;;  %v860_v3 = vrot.slane %v859_v44, 1 }
  0xa8   : > { %v867_v0 = vrot.slane %v866_v15, 1  ;;  %v2374_v26 = vmax.f32 %v878_v42, %v879_v6  ;;  %v2376_v19 = vmax.f32 %v885_v49, %v886_v52  ;;  %v2378_v31 = vmax.f32 %v892_v5, %v893_v30  ;;  %v253_v49 = vld [vmem:[%s1842_s13 + $0xbc] sm:$0x3] }
  0xa9   : > { %3628 = vst [vmem:[#allocation59_spill] sm:$0xff] %v2369_v4  ;;  %v2380_v10 = vmax.f32 %v899_v47, %v900_v11  ;;  %v2384_v20 = vmax.f32 %v2322_v38, %v825_v53  ;;  %v2387_v14 = vmax.f32 %v2324_v63, %v832_v28  ;;  %v2390_v8 = vmax.f32 %v2326_v35, %v839_v27  ;;  %v254_v53 = vld [vmem:[%s1842_s13 + $0xbe] sm:$0x3] }
  0xaa   : > { %v2393_v25 = vmax.f32 %v2328_v56, %v846_v54  ;;  %v2397_v24 = vmax.f32 %v852_v45, %v853_v23  ;;  %v2399_v22 = vmax.f32 %v859_v44, %v860_v3  ;;  %v2401_v42 = vmax.f32 %v866_v15, %v867_v0 }
  0xab   : > { %3629 = vst [vmem:[#allocation60_spill] sm:$0xff] %v2384_v20  ;;  %v874_v38 = vrot.slane %v2365_v43, 1  ;;  %v904_v63 = vsel %vm287_vm0, %v247_v29, -inf  ;;  %v911_v28 = vsel %vm287_vm0, %v248_v55, -inf  ;;  %v918_v35 = vsel %vm287_vm0, %v249_v32, -inf }
  0xac   : > { %3630 = vst [vmem:[#allocation61_spill] sm:$0xff] %v2387_v14  ;;  %v925_v56 = vsel %vm287_vm0, %v250_v9, -inf  ;;  %v881_v27 = vrot.slane %v2374_v26, 1  ;;  %v888_v54 = vrot.slane %v2376_v19, 1  ;;  %v895_v5 = vrot.slane %v2378_v31, 1 }
  0xad   : > { %3631 = vst [vmem:[#allocation62_spill] sm:$0xff] %v2390_v8  ;;  %v902_v47 = vrot.slane %v2380_v10, 1  ;;  %v905_v45 = vrot.slane %v904_v63, 4  ;;  %v912_v44 = vrot.slane %v911_v28, 4  ;;  %v919_v15 = vrot.slane %v918_v35, 4 }
  0xae   : > { %3632 = vst [vmem:[#allocation63_spill] sm:$0xff] %v2393_v25  ;;  %v926_v6 = vrot.slane %v925_v56, 4  ;;  %v932_v52 = vsel %vm287_vm0, %v251_v33, -inf  ;;  %v939_v30 = vsel %vm287_vm0, %v252_v21, -inf  ;;  %v946_v11 = vsel %vm287_vm0, %v253_v49, -inf }
  0xaf   : > { %3633 = vst [vmem:[#allocation64_spill] sm:$0xff] %v2397_v24  ;;  %v953_v29 = vsel %vm287_vm0, %v254_v53, -inf  ;;  %v906_v23 = vmax.f32 %v904_v63, %v905_v45  ;;  %v913_v3 = vmax.f32 %v911_v28, %v912_v44  ;;  %v920_v0 = vmax.f32 %v918_v35, %v919_v15 }
  0xb0   : > { %3634 = vst [vmem:[#allocation65_spill] sm:$0xff] %v2399_v22  ;;  %v927_v55 = vmax.f32 %v925_v56, %v926_v6  ;;  %v933_v32 = vrot.slane %v932_v52, 4  ;;  %v940_v9 = vrot.slane %v939_v30, 4  ;;  %v954_v22 = vrot.slane %v953_v29, 4  ;;  %v255_v6 = vld [vmem:[%s1842_s13 + $0xc0] sm:$0x3] }
  0xb1   : > { %3635 = vst [vmem:[#allocation66_spill] sm:$0xff] %v2401_v42  ;;  %v947_v42 = vrot.slane %v946_v11, 4  ;;  %v907_v24 = vrot.slane %v906_v23, 2  ;;  %v914_v25 = vrot.slane %v913_v3, 2  ;;  %v921_v8 = vrot.slane %v920_v0, 2 }
  0xb2   : > { %v928_v14 = vrot.slane %v927_v55, 2  ;;  %v934_v33 = vmax.f32 %v932_v52, %v933_v32  ;;  %v941_v20 = vmax.f32 %v939_v30, %v940_v9  ;;  %v955_v49 = vmax.f32 %v953_v29, %v954_v22  ;;  %v256_v30 = vld [vmem:[%s1842_s13 + $0xc2] sm:$0x3] }
  0xb3   : > { %v948_v21 = vmax.f32 %v946_v11, %v947_v42  ;;  %v908_v53 = vmax.f32 %v906_v23, %v907_v24  ;;  %v915_v63 = vmax.f32 %v913_v3, %v914_v25  ;;  %v922_v28 = vmax.f32 %v920_v0, %v921_v8  ;;  %v257_v24 = vld [vmem:[%s1842_s13 + $0xc4] sm:$0x3]  ;;  %v258_v25 = vld [vmem:[%s1842_s13 + $0xc6] sm:$0x3]  ;;  %v259_v23 = vld [vmem:[%s1842_s13 + $0xc8] sm:$0x3] }
  0xb4   : > { %v2417_v35 = vmax.f32 %v927_v55, %v928_v14  ;;  %v935_v56 = vrot.slane %v934_v33, 2  ;;  %v942_v45 = vrot.slane %v941_v20, 2  ;;  %v956_v15 = vrot.slane %v955_v49, 2  ;;  %v260_v55 = vld [vmem:[%s1842_s13 + $0xca] sm:$0x3] }
  0xb5   : > { %v949_v44 = vrot.slane %v948_v21, 2  ;;  %v2421_v4 = vmax.f32 %v2365_v43, %v874_v38  ;;  %v909_v52 = vrot.slane %v908_v53, 1  ;;  %v916_v42 = vrot.slane %v915_v63, 1 }
  0xb6   : > { %v923_v22 = vrot.slane %v922_v28, 1  ;;  %v2426_v14 = vmax.f32 %v934_v33, %v935_v56  ;;  %v2428_v8 = vmax.f32 %v941_v20, %v942_v45  ;;  %v2432_v29 = vmax.f32 %v955_v49, %v956_v15  ;;  %v261_v20 = vld [vmem:[%s1842_s13 + $0xcc] sm:$0x3] }
  0xb7   : > { %3636 = vst [vmem:[#allocation67_spill] sm:$0xff] %v2421_v4  ;;  %v2430_v11 = vmax.f32 %v948_v21, %v949_v44  ;;  %v2436_v43 = vmax.f32 %v2374_v26, %v881_v27  ;;  %v2439_v38 = vmax.f32 %v2376_v19, %v888_v54  ;;  %v2442_v3 = vmax.f32 %v2378_v31, %v895_v5  ;;  %v262_v27 = vld [vmem:[%s1842_s13 + $0xce] sm:$0x3] }
  0xb8   : > { %v2445_v0 = vmax.f32 %v2380_v10, %v902_v47  ;;  %v2449_v32 = vmax.f32 %v908_v53, %v909_v52  ;;  %v2451_v9 = vmax.f32 %v915_v63, %v916_v42  ;;  %v2453_v33 = vmax.f32 %v922_v28, %v923_v22 }
  0xb9   : > { %3637 = vst [vmem:[#allocation68_spill] sm:$0xff] %v2436_v43  ;;  %v930_v26 = vrot.slane %v2417_v35, 1  ;;  %v960_v19 = vsel %vm287_vm0, %v255_v6, -inf  ;;  %v967_v54 = vsel %vm287_vm0, %v256_v30, -inf  ;;  %v974_v31 = vsel %vm287_vm0, %v257_v24, -inf }
  0xba   : > { %3638 = vst [vmem:[#allocation69_spill] sm:$0xff] %v2439_v38  ;;  %v981_v10 = vsel %vm287_vm0, %v258_v25, -inf  ;;  %v937_v5 = vrot.slane %v2426_v14, 1  ;;  %v944_v47 = vrot.slane %v2428_v8, 1  ;;  %v951_v21 = vrot.slane %v2430_v11, 1 }
  0xbb   : > { %3639 = vst [vmem:[#allocation70_spill] sm:$0xff] %v2442_v3  ;;  %v958_v49 = vrot.slane %v2432_v29, 1  ;;  %v961_v53 = vrot.slane %v960_v19, 4  ;;  %v968_v63 = vrot.slane %v967_v54, 4  ;;  %v975_v28 = vrot.slane %v974_v31, 4 }
  0xbc   : > { %3640 = vst [vmem:[#allocation71_spill] sm:$0xff] %v2445_v0  ;;  %v982_v56 = vrot.slane %v981_v10, 4  ;;  %v988_v45 = vsel %vm287_vm0, %v259_v23, -inf  ;;  %v995_v44 = vsel %vm287_vm0, %v260_v55, -inf  ;;  %v1002_v15 = vsel %vm287_vm0, %v261_v20, -inf }
  0xbd   : > { %3641 = vst [vmem:[#allocation72_spill] sm:$0xff] %v2449_v32  ;;  %v1009_v6 = vsel %vm287_vm0, %v262_v27, -inf  ;;  %v962_v52 = vmax.f32 %v960_v19, %v961_v53  ;;  %v969_v42 = vmax.f32 %v967_v54, %v968_v63  ;;  %v976_v22 = vmax.f32 %v974_v31, %v975_v28 }
  0xbe   : > { %3642 = vst [vmem:[#allocation73_spill] sm:$0xff] %v2451_v9  ;;  %v983_v30 = vmax.f32 %v981_v10, %v982_v56  ;;  %v989_v24 = vrot.slane %v988_v45, 4  ;;  %v996_v25 = vrot.slane %v995_v44, 4  ;;  %v1003_v0 = vrot.slane %v1002_v15, 4  ;;  %v263_v56 = vld [vmem:[%s1842_s13 + $0xd0] sm:$0x3] }
  0xbf   : > { %3643 = vst [vmem:[#allocation74_spill] sm:$0xff] %v2453_v33  ;;  %v1010_v3 = vrot.slane %v1009_v6, 4  ;;  %v963_v38 = vrot.slane %v962_v52, 2  ;;  %v970_v43 = vrot.slane %v969_v42, 2  ;;  %v977_v4 = vrot.slane %v976_v22, 2 }
  0xc0   : > { %v984_v33 = vrot.slane %v983_v30, 2  ;;  %v990_v23 = vmax.f32 %v988_v45, %v989_v24  ;;  %v997_v9 = vmax.f32 %v995_v44, %v996_v25  ;;  %v1004_v55 = vmax.f32 %v1002_v15, %v1003_v0  ;;  %v264_v44 = vld [vmem:[%s1842_s13 + $0xd2] sm:$0x3] }
  0xc1   : > { %v1011_v20 = vmax.f32 %v1009_v6, %v1010_v3  ;;  %v964_v27 = vmax.f32 %v962_v52, %v963_v38  ;;  %v971_v19 = vmax.f32 %v969_v42, %v970_v43  ;;  %v978_v54 = vmax.f32 %v976_v22, %v977_v4  ;;  %v265_v38 = vld [vmem:[%s1842_s13 + $0xd4] sm:$0x3]  ;;  %v266_v43 = vld [vmem:[%s1842_s13 + $0xd6] sm:$0x3]  ;;  %v267_v52 = vld [vmem:[%s1842_s13 + $0xd8] sm:$0x3] }
  0xc2   : > { %v2469_v31 = vmax.f32 %v983_v30, %v984_v33  ;;  %v991_v10 = vrot.slane %v990_v23, 2  ;;  %v998_v53 = vrot.slane %v997_v9, 2  ;;  %v1005_v63 = vrot.slane %v1004_v55, 2  ;;  %v268_v30 = vld [vmem:[%s1842_s13 + $0xda] sm:$0x3] }
  0xc3   : > { %v1012_v28 = vrot.slane %v1011_v20, 2  ;;  %v2473_v32 = vmax.f32 %v2417_v35, %v930_v26  ;;  %v965_v45 = vrot.slane %v964_v27, 1  ;;  %v972_v0 = vrot.slane %v971_v19, 1 }
  0xc4   : > { %v979_v3 = vrot.slane %v978_v54, 1  ;;  %v2478_v4 = vmax.f32 %v990_v23, %v991_v10  ;;  %v2480_v33 = vmax.f32 %v997_v9, %v998_v53  ;;  %v2482_v15 = vmax.f32 %v1004_v55, %v1005_v63  ;;  %v269_v9 = vld [vmem:[%s1842_s13 + $0xdc] sm:$0x3] }
  0xc5   : > { %3644 = vst [vmem:[#allocation75_spill] sm:$0xff] %v2473_v32  ;;  %v2484_v6 = vmax.f32 %v1011_v20, %v1012_v28  ;;  %v2488_v35 = vmax.f32 %v2426_v14, %v937_v5  ;;  %v2491_v26 = vmax.f32 %v2428_v8, %v944_v47  ;;  %v2494_v42 = vmax.f32 %v2430_v11, %v951_v21  ;;  %v270_v5 = vld [vmem:[%s1842_s13 + $0xde] sm:$0x3] }
  0xc6   : > { %v2497_v22 = vmax.f32 %v2432_v29, %v958_v49  ;;  %v2501_v24 = vmax.f32 %v964_v27, %v965_v45  ;;  %v2503_v25 = vmax.f32 %v971_v19, %v972_v0  ;;  %v2505_v23 = vmax.f32 %v978_v54, %v979_v3 }
  0xc7   : > { %3645 = vst [vmem:[#allocation76_spill] sm:$0xff] %v2488_v35  ;;  %v986_v14 = vrot.slane %v2469_v31, 1  ;;  %v1016_v8 = vsel %vm287_vm0, %v263_v56, -inf  ;;  %v1023_v47 = vsel %vm287_vm0, %v264_v44, -inf  ;;  %v1030_v11 = vsel %vm287_vm0, %v265_v38, -inf }
  0xc8   : > { %3646 = vst [vmem:[#allocation77_spill] sm:$0xff] %v2491_v26  ;;  %v1037_v29 = vsel %vm287_vm0, %v266_v43, -inf  ;;  %v993_v21 = vrot.slane %v2478_v4, 1  ;;  %v1000_v49 = vrot.slane %v2480_v33, 1  ;;  %v1007_v55 = vrot.slane %v2482_v15, 1 }
  0xc9   : > { %3647 = vst [vmem:[#allocation78_spill] sm:$0xff] %v2494_v42  ;;  %v1014_v20 = vrot.slane %v2484_v6, 1  ;;  %v1017_v27 = vrot.slane %v1016_v8, 4  ;;  %v1024_v19 = vrot.slane %v1023_v47, 4  ;;  %v1031_v54 = vrot.slane %v1030_v11, 4 }
  0xca   : > { %3648 = vst [vmem:[#allocation79_spill] sm:$0xff] %v2497_v22  ;;  %v1038_v10 = vrot.slane %v1037_v29, 4  ;;  %v1044_v53 = vsel %vm287_vm0, %v267_v52, -inf  ;;  %v1051_v63 = vsel %vm287_vm0, %v268_v30, -inf  ;;  %v1058_v28 = vsel %vm287_vm0, %v269_v9, -inf }
  0xcb   : > { %3649 = vst [vmem:[#allocation80_spill] sm:$0xff] %v2501_v24  ;;  %v1065_v56 = vsel %vm287_vm0, %v270_v5, -inf  ;;  %v1018_v45 = vmax.f32 %v1016_v8, %v1017_v27  ;;  %v1025_v0 = vmax.f32 %v1023_v47, %v1024_v19  ;;  %v1032_v3 = vmax.f32 %v1030_v11, %v1031_v54 }
  0xcc   : > { %3650 = vst [vmem:[#allocation81_spill] sm:$0xff] %v2503_v25  ;;  %v1039_v44 = vmax.f32 %v1037_v29, %v1038_v10  ;;  %v1045_v38 = vrot.slane %v1044_v53, 4  ;;  %v1052_v43 = vrot.slane %v1051_v63, 4  ;;  %v1066_v25 = vrot.slane %v1065_v56, 4  ;;  %v271_v10 = vld [vmem:[%s1842_s13 + $0xe0] sm:$0x3] }
  0xcd   : > { %3651 = vst [vmem:[#allocation82_spill] sm:$0xff] %v2505_v23  ;;  %v1059_v23 = vrot.slane %v1058_v28, 4  ;;  %v1019_v24 = vrot.slane %v1018_v45, 2  ;;  %v1026_v22 = vrot.slane %v1025_v0, 2  ;;  %v1033_v42 = vrot.slane %v1032_v3, 2 }
  0xce   : > { %v1040_v26 = vrot.slane %v1039_v44, 2  ;;  %v1046_v52 = vmax.f32 %v1044_v53, %v1045_v38  ;;  %v1053_v35 = vmax.f32 %v1051_v63, %v1052_v43  ;;  %v1067_v9 = vmax.f32 %v1065_v56, %v1066_v25  ;;  %v272_v63 = vld [vmem:[%s1842_s13 + $0xe2] sm:$0x3] }
  0xcf   : > { %v1060_v30 = vmax.f32 %v1058_v28, %v1059_v23  ;;  %v1020_v5 = vmax.f32 %v1018_v45, %v1019_v24  ;;  %v1027_v8 = vmax.f32 %v1025_v0, %v1026_v22  ;;  %v1034_v47 = vmax.f32 %v1032_v3, %v1033_v42  ;;  %v273_v24 = vld [vmem:[%s1842_s13 + $0xe4] sm:$0x3]  ;;  %v274_v22 = vld [vmem:[%s1842_s13 + $0xe6] sm:$0x3]  ;;  %v275_v45 = vld [vmem:[%s1842_s13 + $0xe8] sm:$0x3] }
  0xd0   : > { %v2521_v11 = vmax.f32 %v1039_v44, %v1040_v26  ;;  %v1047_v29 = vrot.slane %v1046_v52, 2  ;;  %v1054_v27 = vrot.slane %v1053_v35, 2  ;;  %v1068_v54 = vrot.slane %v1067_v9, 2  ;;  %v276_v44 = vld [vmem:[%s1842_s13 + $0xea] sm:$0x3] }
  0xd1   : > { %v1061_v19 = vrot.slane %v1060_v30, 2  ;;  %v2525_v32 = vmax.f32 %v2469_v31, %v986_v14  ;;  %v1021_v53 = vrot.slane %v1020_v5, 1  ;;  %v1028_v23 = vrot.slane %v1027_v8, 1 }
  0xd2   : > { %v1035_v25 = vrot.slane %v1034_v47, 1  ;;  %v2530_v26 = vmax.f32 %v1046_v52, %v1047_v29  ;;  %v2532_v42 = vmax.f32 %v1053_v35, %v1054_v27  ;;  %v2536_v56 = vmax.f32 %v1067_v9, %v1068_v54  ;;  %v277_v35 = vld [vmem:[%s1842_s13 + $0xec] sm:$0x3] }
  0xd3   : > { %3652 = vst [vmem:[#allocation83_spill] sm:$0xff] %v2525_v32  ;;  %v2534_v28 = vmax.f32 %v1060_v30, %v1061_v19  ;;  %v2540_v31 = vmax.f32 %v2478_v4, %v993_v21  ;;  %v2543_v14 = vmax.f32 %v2480_v33, %v1000_v49  ;;  %v2546_v0 = vmax.f32 %v2482_v15, %v1007_v55  ;;  %v278_v21 = vld [vmem:[%s1842_s13 + $0xee] sm:$0x3] }
  0xd4   : > { %v2549_v3 = vmax.f32 %v2484_v6, %v1014_v20  ;;  %v2553_v38 = vmax.f32 %v1020_v5, %v1021_v53  ;;  %v2555_v43 = vmax.f32 %v1027_v8, %v1028_v23  ;;  %v2557_v52 = vmax.f32 %v1034_v47, %v1035_v25 }
  0xd5   : > { %3653 = vst [vmem:[#allocation84_spill] sm:$0xff] %v2540_v31  ;;  %v1042_v4 = vrot.slane %v2521_v11, 1  ;;  %v1072_v33 = vsel %vm287_vm0, %v271_v10, -inf  ;;  %v1079_v49 = vsel %vm287_vm0, %v272_v63, -inf  ;;  %v1086_v15 = vsel %vm287_vm0, %v273_v24, -inf }
  0xd6   : > { %3654 = vst [vmem:[#allocation85_spill] sm:$0xff] %v2543_v14  ;;  %v1093_v6 = vsel %vm287_vm0, %v274_v22, -inf  ;;  %v1049_v55 = vrot.slane %v2530_v26, 1  ;;  %v1056_v20 = vrot.slane %v2532_v42, 1  ;;  %v1063_v30 = vrot.slane %v2534_v28, 1 }
  0xd7   : > { %3655 = vst [vmem:[#allocation86_spill] sm:$0xff] %v2546_v0  ;;  %v1070_v9 = vrot.slane %v2536_v56, 1  ;;  %v1073_v5 = vrot.slane %v1072_v33, 4  ;;  %v1080_v8 = vrot.slane %v1079_v49, 4  ;;  %v1087_v47 = vrot.slane %v1086_v15, 4 }
  0xd8   : > { %3656 = vst [vmem:[#allocation87_spill] sm:$0xff] %v2549_v3  ;;  %v1094_v29 = vrot.slane %v1093_v6, 4  ;;  %v1100_v27 = vsel %vm287_vm0, %v275_v45, -inf  ;;  %v1107_v19 = vsel %vm287_vm0, %v276_v44, -inf  ;;  %v1114_v54 = vsel %vm287_vm0, %v277_v35, -inf }
  0xd9   : > { %3657 = vst [vmem:[#allocation88_spill] sm:$0xff] %v2553_v38  ;;  %v1121_v10 = vsel %vm287_vm0, %v278_v21, -inf  ;;  %v1074_v53 = vmax.f32 %v1072_v33, %v1073_v5  ;;  %v1081_v23 = vmax.f32 %v1079_v49, %v1080_v8  ;;  %v1088_v25 = vmax.f32 %v1086_v15, %v1087_v47 }
  0xda   : > { %3658 = vst [vmem:[#allocation89_spill] sm:$0xff] %v2555_v43  ;;  %v1095_v63 = vmax.f32 %v1093_v6, %v1094_v29  ;;  %v1101_v24 = vrot.slane %v1100_v27, 4  ;;  %v1108_v22 = vrot.slane %v1107_v19, 4  ;;  %v1115_v3 = vrot.slane %v1114_v54, 4  ;;  %v279_v29 = vld [vmem:[%s1842_s13 + $0xf0] sm:$0x3] }
  0xdb   : > { %3659 = vst [vmem:[#allocation90_spill] sm:$0xff] %v2557_v52  ;;  %v1122_v0 = vrot.slane %v1121_v10, 4  ;;  %v1075_v14 = vrot.slane %v1074_v53, 2  ;;  %v1082_v31 = vrot.slane %v1081_v23, 2  ;;  %v1089_v32 = vrot.slane %v1088_v25, 2 }
  0xdc   : > { %v1096_v52 = vrot.slane %v1095_v63, 2  ;;  %v1102_v45 = vmax.f32 %v1100_v27, %v1101_v24  ;;  %v1109_v43 = vmax.f32 %v1107_v19, %v1108_v22  ;;  %v1116_v44 = vmax.f32 %v1114_v54, %v1115_v3  ;;  %v280_v19 = vld [vmem:[%s1842_s13 + $0xf2] sm:$0x3] }
  0xdd   : > { %v1123_v35 = vmax.f32 %v1121_v10, %v1122_v0  ;;  %v1076_v21 = vmax.f32 %v1074_v53, %v1075_v14  ;;  %v1083_v33 = vmax.f32 %v1081_v23, %v1082_v31  ;;  %v1090_v49 = vmax.f32 %v1088_v25, %v1089_v32  ;;  %v281_v14 = vld [vmem:[%s1842_s13 + $0xf4] sm:$0x3]  ;;  %v282_v31 = vld [vmem:[%s1842_s13 + $0xf6] sm:$0x3]  ;;  %v283_v53 = vld [vmem:[%s1842_s13 + $0xf8] sm:$0x3] }
  0xde   : > { %v2573_v15 = vmax.f32 %v1095_v63, %v1096_v52  ;;  %v1103_v6 = vrot.slane %v1102_v45, 2  ;;  %v1110_v5 = vrot.slane %v1109_v43, 2  ;;  %v1117_v8 = vrot.slane %v1116_v44, 2  ;;  %v284_v63 = vld [vmem:[%s1842_s13 + $0xfa] sm:$0x3] }
  0xdf   : > { %v1124_v47 = vrot.slane %v1123_v35, 2  ;;  %v2577_v38 = vmax.f32 %v2521_v11, %v1042_v4  ;;  %v1077_v27 = vrot.slane %v1076_v21, 1  ;;  %v1084_v3 = vrot.slane %v1083_v33, 1 }
  0xe0   : > { %v1091_v0 = vrot.slane %v1090_v49, 1  ;;  %v2582_v32 = vmax.f32 %v1102_v45, %v1103_v6  ;;  %v2584_v52 = vmax.f32 %v1109_v43, %v1110_v5  ;;  %v2586_v54 = vmax.f32 %v1116_v44, %v1117_v8  ;;  %v285_v43 = vld [vmem:[%s1842_s13 + $0xfc] sm:$0x3] }
  0xe1   : > { %3660 = vst [vmem:[#allocation91_spill] sm:$0xff] %v2577_v38  ;;  %v2588_v10 = vmax.f32 %v1123_v35, %v1124_v47  ;;  %v2592_v11 = vmax.f32 %v2530_v26, %v1049_v55  ;;  %v2595_v4 = vmax.f32 %v2532_v42, %v1056_v20  ;;  %v2598_v23 = vmax.f32 %v2534_v28, %v1063_v30  ;;  %v286_v55 = vld [vmem:[%s1842_s13 + $0xfe] sm:$0x3] }
  0xe2   : > { %v2601_v25 = vmax.f32 %v2536_v56, %v1070_v9  ;;  %v2605_v24 = vmax.f32 %v1076_v21, %v1077_v27  ;;  %v2607_v22 = vmax.f32 %v1083_v33, %v1084_v3  ;;  %v2609_v45 = vmax.f32 %v1090_v49, %v1091_v0 }
  0xe3   : > { %3661 = vst [vmem:[#allocation92_spill] sm:$0xff] %v2592_v11  ;;  %v1098_v26 = vrot.slane %v2573_v15, 1  ;;  %v1128_v42 = vsel %vm287_vm0, %v279_v29, -inf  ;;  %v1135_v20 = vsel %vm287_vm0, %v280_v19, -inf  ;;  %v1142_v28 = vsel %vm287_vm0, %v281_v14, -inf }
  0xe4   : > { %3662 = vst [vmem:[#allocation93_spill] sm:$0xff] %v2595_v4  ;;  %v1149_v56 = vsel %vm287_vm0, %v282_v31, -inf  ;;  %v1105_v30 = vrot.slane %v2582_v32, 1  ;;  %v1112_v9 = vrot.slane %v2584_v52, 1  ;;  %v1119_v44 = vrot.slane %v2586_v54, 1 }
  0xe5   : > { %3663 = vst [vmem:[#allocation94_spill] sm:$0xff] %v2598_v23  ;;  %v1126_v35 = vrot.slane %v2588_v10, 1  ;;  %v1129_v21 = vrot.slane %v1128_v42, 4  ;;  %v1136_v33 = vrot.slane %v1135_v20, 4  ;;  %v1143_v49 = vrot.slane %v1142_v28, 4 }
  0xe6   : > { %3664 = vst [vmem:[#allocation95_spill] sm:$0xff] %v2601_v25  ;;  %v1150_v6 = vrot.slane %v1149_v56, 4  ;;  %v1156_v5 = vsel %vm287_vm0, %v283_v53, -inf  ;;  %v1163_v8 = vsel %vm287_vm0, %v284_v63, -inf  ;;  %v1170_v47 = vsel %vm287_vm0, %v285_v43, -inf }
  0xe7   : > { %3665 = vst [vmem:[#allocation96_spill] sm:$0xff] %v2605_v24  ;;  %v1177_v29 = vsel %vm287_vm0, %v286_v55, -inf  ;;  %v1130_v27 = vmax.f32 %v1128_v42, %v1129_v21  ;;  %v1137_v3 = vmax.f32 %v1135_v20, %v1136_v33  ;;  %v1144_v0 = vmax.f32 %v1142_v28, %v1143_v49 }
  0xe8   : > { %3666 = vst [vmem:[#allocation97_spill] sm:$0xff] %v2607_v22  ;;  %v1151_v19 = vmax.f32 %v1149_v56, %v1150_v6  ;;  %v1157_v14 = vrot.slane %v1156_v5, 4  ;;  %v1164_v31 = vrot.slane %v1163_v8, 4  ;;  %v1178_v22 = vrot.slane %v1177_v29, 4 }
  0xe9   : > { %3667 = vst [vmem:[#allocation98_spill] sm:$0xff] %v2609_v45  ;;  %v1171_v45 = vrot.slane %v1170_v47, 4  ;;  %v1131_v24 = vrot.slane %v1130_v27, 2  ;;  %v1138_v25 = vrot.slane %v1137_v3, 2  ;;  %v1145_v23 = vrot.slane %v1144_v0, 2 }
  0xea   : > { %v1152_v4 = vrot.slane %v1151_v19, 2  ;;  %v1158_v11 = vmax.f32 %v1156_v5, %v1157_v14  ;;  %v1165_v53 = vmax.f32 %v1163_v8, %v1164_v31  ;;  %v1179_v63 = vmax.f32 %v1177_v29, %v1178_v22  ;;  %v3670_v14 = vld [vmem:[#allocation3_spill] sm:$0xff]  ;;  %v3671_v31 = vld [vmem:[#allocation10_spill] sm:$0xff] }
  0xeb   : > { %v1172_v38 = vmax.f32 %v1170_v47, %v1171_v45  ;;  %v1132_v48 = vmax.f32 %v1130_v27, %v1131_v24  ;;  %v1139_v43 = vmax.f32 %v1137_v3, %v1138_v25  ;;  %v1146_v50 = vmax.f32 %v1144_v0, %v1145_v23 }
  0xec   : > { %v1153_v55 = vmax.f32 %v1151_v19, %v1152_v4  ;;  %v1159_v42 = vrot.slane %v1158_v11, 2  ;;  %v1166_v20 = vrot.slane %v1165_v53, 2  ;;  %v1180_v56 = vrot.slane %v1179_v63, 2 }
  0xed   : > { %v1173_v28 = vrot.slane %v1172_v38, 2  ;;  %v1133_v21 = vrot.slane %v1132_v48, 1  ;;  %v1140_v33 = vrot.slane %v1139_v43, 1  ;;  %v1147_v49 = vrot.slane %v1146_v50, 1 }
  0xee   : > { %v1154_v6 = vrot.slane %v1153_v55, 1  ;;  %v1160_v40 = vmax.f32 %v1158_v11, %v1159_v42  ;;  %v1167_v18 = vmax.f32 %v1165_v53, %v1166_v20  ;;  %v1181_v17 = vmax.f32 %v1179_v63, %v1180_v56  ;;  %v3672_v63 = vld [vmem:[#allocation4_spill] sm:$0xff]  ;;  %v3674_v42 = vld [vmem:[#allocation5_spill] sm:$0xff] }
  0xef   : > { %v1174_v37 = vmax.f32 %v1172_v38, %v1173_v28  ;;  %v2626_v5 = vmax.f32 %v2573_v15, %v1098_v26  ;;  %v2629_v24 = vmax.f32 %v2582_v32, %v1105_v30  ;;  %v2632_v4 = vmax.f32 %v2584_v52, %v1112_v9  ;;  %v3675_v56 = vld [vmem:[#allocation12_spill] sm:$0xff] }
  0xf0   : > { %v2635_v23 = vmax.f32 %v2586_v54, %v1119_v44  ;;  %v1161_v25 = vrot.slane %v1160_v40, 1  ;;  %v1168_v22 = vrot.slane %v1167_v18, 1  ;;  %v1182_v8 = vrot.slane %v1181_v17, 1 }
  0xf1   : > { %v1175_v45 = vrot.slane %v1174_v37, 1  ;;  %v2638_v11 = vmax.f32 %v2588_v10, %v1126_v35  ;;  %v2640_v38 = vmax.f32 %v1132_v48, %v1133_v21  ;;  %v2642_v15 = vmax.f32 %v1139_v43, %v1140_v33  ;;  %v3673_v43 = vld [vmem:[#allocation11_spill] sm:$0xff]  ;;  %v3676_v33 = vld [vmem:[#allocation6_spill] sm:$0xff] }
  0xf2   : > { %v2644_v32 = vmax.f32 %v1146_v50, %v1147_v49  ;;  %v2646_v26 = vmax.f32 %v1153_v55, %v1154_v6  ;;  %v2648_v52 = vmax.f32 %v1160_v40, %v1161_v25  ;;  %v2650_v54 = vmax.f32 %v1167_v18, %v1168_v22  ;;  %v3677_v6 = vld [vmem:[#allocation13_spill] sm:$0xff] }
  0xf3   : > { %v1185_v30 = vsel %vm1184_vm1, %v1877_v58, -inf  ;;  %v1186_v10 = vsel %vm1184_vm1, %v1929_v1, -inf  ;;  %v1188_v48 = vsel %vm1184_vm1, %v1879_v59, -inf  ;;  %v1189_v9 = vsel %vm1184_vm1, %v1931_v2, -inf }
  0xf4   : > { %v2660_v50 = vmax.f32 %v1174_v37, %v1175_v45  ;;  %v2662_v44 = vmax.f32 %v1181_v17, %v1182_v8  ;;  %v1191_v18 = vsel %vm1184_vm1, %v1881_v60, -inf  ;;  %v1192_v40 = vsel %vm1184_vm1, %v1933_v7, -inf  ;;  %v3678_v8 = vld [vmem:[#allocation7_spill] sm:$0xff] }
  0xf5   : > { %v2668_v58 = vmax.f32 %v1185_v30, %v1186_v10  ;;  %v1194_v1 = vsel %vm1184_vm1, %v1901_v41, -inf  ;;  %v1195_v59 = vsel %vm1184_vm1, %v1953_v46, -inf  ;;  %v1197_v2 = vsel %vm1184_vm1, %v1916_v39, -inf  ;;  %v3679_v10 = vld [vmem:[#allocation14_spill] sm:$0xff] }
  0xf6   : > { %v2676_v37 = vmax.f32 %v1188_v48, %v1189_v9  ;;  %v1198_v17 = vsel %vm1184_vm1, %v1968_v34, -inf  ;;  %v1200_v60 = vsel %vm1184_vm1, %v1919_v57, -inf  ;;  %v1201_v7 = vsel %vm1184_vm1, %v1971_v51, -inf }
  0xf7   : > { %v2684_v35 = vmax.f32 %v1191_v18, %v1192_v40  ;;  %v2686_v41 = vmax.f32 %v1194_v1, %v1195_v59  ;;  %v1203_v46 = vsel %vm1184_vm1, %v1922_v61, -inf  ;;  %v1204_v39 = vsel %vm1184_vm1, %v1974_v12, -inf  ;;  %v3668_v61 = vld [vmem:[#allocation2_spill] sm:$0xff]  ;;  %v3669_v12 = vld [vmem:[#allocation9_spill] sm:$0xff]  ;;  %v3680_v18 = vld [vmem:[#allocation8_spill] sm:$0xff] }
  0xf8   : > { %v2692_v47 = vmax.f32 %v1197_v2, %v1198_v17  ;;  %v1206_v34 = vsel %vm1184_vm1, %v1925_v62, -inf  ;;  %v1207_v57 = vsel %vm1184_vm1, %v1977_v13, -inf  ;;  %v1209_v51 = vsel %vm1184_vm1, %v1981_v16, -inf  ;;  %v3681_v1 = vld [vmem:[#allocation15_spill] sm:$0xff]  ;;  %v3682_v2 = vld [vmem:[#allocation16_spill] sm:$0xff] }
  0xf9   : > { %v2700_v29 = vmax.f32 %v1200_v60, %v1201_v7  ;;  %v1210_v27 = vsel %vm1184_vm1, %v2033_v36, -inf  ;;  %v1212_v3 = vsel %vm1184_vm1, %v3668_v61, -inf  ;;  %v1213_v0 = vsel %vm1184_vm1, %v3669_v12, -inf  ;;  %v3683_v7 = vld [vmem:[#allocation24_spill] sm:$0xff] }
  0xfa   : > { %v2708_v19 = vmax.f32 %v1203_v46, %v1204_v39  ;;  %v2710_v62 = vmax.f32 %v1206_v34, %v1207_v57  ;;  %v1215_v13 = vsel %vm1184_vm1, %v3670_v14, -inf  ;;  %v1216_v16 = vsel %vm1184_vm1, %v3671_v31, -inf  ;;  %v3684_v39 = vld [vmem:[#allocation17_spill] sm:$0xff]  ;;  %v3688_v31 = vld [vmem:[#allocation19_spill] sm:$0xff] }
  0xfb   : > { %v2716_v53 = vmax.f32 %v1209_v51, %v1210_v27  ;;  %v1218_v36 = vsel %vm1184_vm1, %v3672_v63, -inf  ;;  %v1219_v55 = vsel %vm1184_vm1, %v3673_v43, -inf  ;;  %v1221_v20 = vsel %vm1184_vm1, %v3674_v42, -inf  ;;  %v3685_v57 = vld [vmem:[#allocation25_spill] sm:$0xff]  ;;  %v3689_v63 = vld [vmem:[#allocation27_spill] sm:$0xff]  ;;  %v3690_v43 = vld [vmem:[#allocation20_spill] sm:$0xff] }
  0xfc   : > { %v2724_v28 = vmax.f32 %v1212_v3, %v1213_v0  ;;  %v1222_v21 = vsel %vm1184_vm1, %v3675_v56, -inf  ;;  %v1224_v49 = vsel %vm1184_vm1, %v3676_v33, -inf  ;;  %v1225_v25 = vsel %vm1184_vm1, %v3677_v6, -inf  ;;  %v3686_v3 = vld [vmem:[#allocation18_spill] sm:$0xff] }
  0xfd   : > { %v2732_v22 = vmax.f32 %v1215_v13, %v1216_v16  ;;  %v2734_v45 = vmax.f32 %v1218_v36, %v1219_v55  ;;  %v1227_v30 = vsel %vm1184_vm1, %v3678_v8, -inf  ;;  %v1228_v48 = vsel %vm1184_vm1, %v3679_v10, -inf  ;;  %v3687_v0 = vld [vmem:[#allocation26_spill] sm:$0xff] }
  0xfe   : > { %v2740_v9 = vmax.f32 %v1221_v20, %v1222_v21  ;;  %v1230_v40 = vsel %vm1184_vm1, %v3680_v18, -inf  ;;  %v1231_v59 = vsel %vm1184_vm1, %v3681_v1, -inf  ;;  %v1233_v17 = vsel %vm1184_vm1, %v3682_v2, -inf  ;;  %v3691_v20 = vld [vmem:[#allocation28_spill] sm:$0xff]  ;;  %v3692_v21 = vld [vmem:[#allocation21_spill] sm:$0xff]  ;;  %v3696_v1 = vld [vmem:[#allocation23_spill] sm:$0xff] }
  0xff   : > { %v2748_v60 = vmax.f32 %v1224_v49, %v1225_v25  ;;  %v1234_v46 = vsel %vm1184_vm1, %v3683_v7, -inf  ;;  %v1236_v34 = vsel %vm1184_vm1, %v3684_v39, -inf  ;;  %v1237_v51 = vsel %vm1184_vm1, %v3685_v57, -inf  ;;  %v3693_v49 = vld [vmem:[#allocation29_spill] sm:$0xff]  ;;  %v3697_v2 = vld [vmem:[#allocation31_spill] sm:$0xff]  ;;  %v3698_v7 = vld [vmem:[#allocation32_spill] sm:$0xff] }
 0x100   : > { %v2756_v27 = vmax.f32 %v1227_v30, %v1228_v48  ;;  %v2758_v61 = vmax.f32 %v1230_v40, %v1231_v59  ;;  %v1239_v12 = vsel %vm1184_vm1, %v3686_v3, -inf  ;;  %v1240_v14 = vsel %vm1184_vm1, %v3687_v0, -inf  ;;  %v3694_v30 = vld [vmem:[#allocation22_spill] sm:$0xff] }
 0x101   : > { %v2764_v13 = vmax.f32 %v1233_v17, %v1234_v46  ;;  %v1242_v16 = vsel %vm1184_vm1, %v3688_v31, -inf  ;;  %v1243_v36 = vsel %vm1184_vm1, %v3689_v63, -inf  ;;  %v1245_v55 = vsel %vm1184_vm1, %v3690_v43, -inf  ;;  %v3695_v48 = vld [vmem:[#allocation30_spill] sm:$0xff] }
 0x102   : > { %v2772_v42 = vmax.f32 %v1236_v34, %v1237_v51  ;;  %v1246_v56 = vsel %vm1184_vm1, %v3691_v20, -inf  ;;  %v1248_v33 = vsel %vm1184_vm1, %v3692_v21, -inf  ;;  %v1249_v6 = vsel %vm1184_vm1, %v3693_v49, -inf  ;;  %v3699_v34 = vld [vmem:[#allocation40_spill] sm:$0xff]  ;;  %v3700_v51 = vld [vmem:[#allocation33_spill] sm:$0xff]  ;;  %v3704_v20 = vld [vmem:[#allocation35_spill] sm:$0xff] }
 0x103   : > { %v2780_v25 = vmax.f32 %v1239_v12, %v1240_v14  ;;  %v2782_v8 = vmax.f32 %v1242_v16, %v1243_v36  ;;  %v1251_v10 = vsel %vm1184_vm1, %v3694_v30, -inf  ;;  %v1252_v18 = vsel %vm1184_vm1, %v3695_v48, -inf  ;;  %v3701_v12 = vld [vmem:[#allocation41_spill] sm:$0xff]  ;;  %v3702_v16 = vld [vmem:[#allocation34_spill] sm:$0xff]  ;;  %v3705_v21 = vld [vmem:[#allocation43_spill] sm:$0xff] }
 0x104   : > { %v2788_v40 = vmax.f32 %v1245_v55, %v1246_v56  ;;  %v1254_v59 = vsel %vm1184_vm1, %v3696_v1, -inf  ;;  %v1255_v17 = vsel %vm1184_vm1, %v3697_v2, -inf  ;;  %v1257_v46 = vsel %vm1184_vm1, %v3698_v7, -inf  ;;  %v3703_v36 = vld [vmem:[#allocation42_spill] sm:$0xff]  ;;  %v3706_v49 = vld [vmem:[#allocation36_spill] sm:$0xff] }
 0x105   : > { %v2796_v39 = vmax.f32 %v1248_v33, %v1249_v6  ;;  %v1258_v57 = vsel %vm1184_vm1, %v3699_v34, -inf  ;;  %v1260_v3 = vsel %vm1184_vm1, %v3700_v51, -inf  ;;  %v1261_v0 = vsel %vm1184_vm1, %v3701_v12, -inf  ;;  %v3712_v12 = vld [vmem:[#allocation39_spill] sm:$0xff] }
 0x106   : > { %v2804_v14 = vmax.f32 %v1251_v10, %v1252_v18  ;;  %v2806_v31 = vmax.f32 %v1254_v59, %v1255_v17  ;;  %v1263_v63 = vsel %vm1184_vm1, %v3702_v16, -inf  ;;  %v1264_v43 = vsel %vm1184_vm1, %v3703_v36, -inf  ;;  %v3707_v10 = vld [vmem:[#allocation44_spill] sm:$0xff]  ;;  %v3708_v18 = vld [vmem:[#allocation37_spill] sm:$0xff]  ;;  %v3713_v16 = vld [vmem:[#allocation47_spill] sm:$0xff] }
 0x107   : > { %v2812_v55 = vmax.f32 %v1257_v46, %v1258_v57  ;;  %v1266_v56 = vsel %vm1184_vm1, %v3704_v20, -inf  ;;  %v1267_v33 = vsel %vm1184_vm1, %v3705_v21, -inf  ;;  %v1269_v6 = vsel %vm1184_vm1, %v3706_v49, -inf  ;;  %v3709_v59 = vld [vmem:[#allocation45_spill] sm:$0xff]  ;;  %v3710_v46 = vld [vmem:[#allocation38_spill] sm:$0xff]  ;;  %v3714_v20 = vld [vmem:[#allocation48_spill] sm:$0xff] }
 0x108   : > { %v2820_v30 = vmax.f32 %v1260_v3, %v1261_v0  ;;  %v1270_v48 = vsel %vm1184_vm1, %v3707_v10, -inf  ;;  %v1272_v1 = vsel %vm1184_vm1, %v3708_v18, -inf  ;;  %v1273_v2 = vsel %vm1184_vm1, %v3709_v59, -inf  ;;  %v3711_v57 = vld [vmem:[#allocation46_spill] sm:$0xff]  ;;  %v3717_v10 = vld [vmem:[#allocation57_spill] sm:$0xff] }
 0x109   : > { %v2828_v17 = vmax.f32 %v1263_v63, %v1264_v43  ;;  %v2830_v7 = vmax.f32 %v1266_v56, %v1267_v33  ;;  %v1275_v34 = vsel %vm1184_vm1, %v3710_v46, -inf  ;;  %v1276_v51 = vsel %vm1184_vm1, %v3711_v57, -inf  ;;  %v3715_v56 = vld [vmem:[#allocation56_spill] sm:$0xff]  ;;  %v3716_v33 = vld [vmem:[#allocation49_spill] sm:$0xff]  ;;  %v3720_v59 = vld [vmem:[#allocation50_spill] sm:$0xff] }
 0x10a   : > { %v2836_v3 = vmax.f32 %v1269_v6, %v1270_v48  ;;  %v1278_v0 = vsel %vm1184_vm1, %v3712_v12, -inf  ;;  %v1279_v36 = vsel %vm1184_vm1, %v3713_v16, -inf  ;;  %v1281_v63 = vsel %vm1184_vm1, %v3714_v20, -inf  ;;  %v3721_v57 = vld [vmem:[#allocation58_spill] sm:$0xff]  ;;  %v3723_v12 = vld [vmem:[#allocation51_spill] sm:$0xff] }
 0x10b   : > { %v2844_v43 = vmax.f32 %v1272_v1, %v1273_v2  ;;  %v1282_v21 = vsel %vm1184_vm1, %v3715_v56, -inf  ;;  %v1284_v49 = vsel %vm1184_vm1, %v3716_v33, -inf  ;;  %v1285_v6 = vsel %vm1184_vm1, %v3717_v10, -inf  ;;  %v3724_v20 = vld [vmem:[#allocation59_spill] sm:$0xff]  ;;  %v3725_v33 = vld [vmem:[#allocation52_spill] sm:$0xff]  ;;  %v3728_v10 = vld [vmem:[#allocation53_spill] sm:$0xff] }
 0x10c   : > { %v2852_v48 = vmax.f32 %v1275_v34, %v1276_v51  ;;  %v2854_v18 = vmax.f32 %v1278_v0, %v1279_v36  ;;  %v1287_v46 = vsel %vm1184_vm1, %v3720_v59, -inf  ;;  %v1288_v1 = vsel %vm1184_vm1, %v3721_v57, -inf  ;;  %v3727_v0 = vld [vmem:[#allocation60_spill] sm:$0xff]  ;;  %v3729_v57 = vld [vmem:[#allocation61_spill] sm:$0xff] }
 0x10d   : > { %v2860_v2 = vmax.f32 %v1281_v63, %v1282_v21  ;;  %v1290_v16 = vsel %vm1184_vm1, %v3723_v12, -inf  ;;  %v1291_v56 = vsel %vm1184_vm1, %v3724_v20, -inf  ;;  %v1293_v34 = vsel %vm1184_vm1, %v3725_v33, -inf  ;;  %v3735_v33 = vld [vmem:[#allocation55_spill] sm:$0xff] }
 0x10e   : > { %3718 = vst [vmem:[#allocation2_spill] sm:$0xff] %v2852_v48  ;;  %v2868_v51 = vmax.f32 %v1284_v49, %v1285_v6  ;;  %v1294_v36 = vsel %vm1184_vm1, %v3727_v0, -inf  ;;  %v1296_v59 = vsel %vm1184_vm1, %v3728_v10, -inf  ;;  %v1297_v63 = vsel %vm1184_vm1, %v3729_v57, -inf  ;;  %v3737_v48 = vld [vmem:[#allocation64_spill] sm:$0xff] }
 0x10f   : > { %3719 = vst [vmem:[#allocation9_spill] sm:$0xff] %v2854_v18  ;;  %v2876_v21 = vmax.f32 %v1287_v46, %v1288_v1  ;;  %v2878_v12 = vmax.f32 %v1290_v16, %v1291_v56  ;;  %v3733_v18 = vld [vmem:[#allocation62_spill] sm:$0xff]  ;;  %v2884_v6 = vmax.f32 %v1293_v34, %v1294_v36  ;;  %v1302_v0 = vsel %vm1184_vm1, %v3735_v33, -inf  ;;  %v3739_v16 = vld [vmem:[#allocation72_spill] sm:$0xff] }
 0x110   : > { %3722 = vst [vmem:[#allocation3_spill] sm:$0xff] %v2860_v2  ;;  %v3732_v2 = vld [vmem:[#allocation54_spill] sm:$0xff]  ;;  %v1300_v49 = vsel %vm1184_vm1, %v3733_v18, -inf  ;;  %v1305_v46 = vsel %vm1184_vm1, %v3737_v48, -inf  ;;  %v2892_v1 = vmax.f32 %v1296_v59, %v1297_v63  ;;  %v1306_v56 = vsel %vm1184_vm1, %v3739_v16, -inf  ;;  %v3741_v18 = vld [vmem:[#allocation73_spill] sm:$0xff] }
 0x111   : > { %3726 = vst [vmem:[#allocation10_spill] sm:$0xff] %v2868_v51  ;;  %v1299_v20 = vsel %vm1184_vm1, %v3732_v2, -inf  ;;  %v3736_v51 = vld [vmem:[#allocation63_spill] sm:$0xff]  ;;  %v3740_v2 = vld [vmem:[#allocation65_spill] sm:$0xff]  ;;  %v1309_v34 = vsel %vm1184_vm1, %v3741_v18, -inf  ;;  %v2908_v59 = vmax.f32 %v1305_v46, %v1306_v56 }
 0x112   : > { %3730 = vst [vmem:[#allocation4_spill] sm:$0xff] %v2876_v21  ;;  %v1303_v10 = vsel %vm1184_vm1, %v3736_v51, -inf  ;;  %v1308_v57 = vsel %vm1184_vm1, %v3740_v2, -inf  ;;  %v2900_v36 = vmax.f32 %v1299_v20, %v1300_v49  ;;  %v3747_v63 = vld [vmem:[#allocation67_spill] sm:$0xff]  ;;  %v3749_v21 = vld [vmem:[#allocation68_spill] sm:$0xff] }
 0x113   : > { %3731 = vst [vmem:[#allocation11_spill] sm:$0xff] %v2878_v12  ;;  %v2902_v33 = vmax.f32 %v1302_v0, %v1303_v10  ;;  %v3745_v12 = vld [vmem:[#allocation74_spill] sm:$0xff]  ;;  %v1314_v16 = vsel %vm1184_vm1, %v3747_v63, -inf  ;;  %v1317_v20 = vsel %vm1184_vm1, %v3749_v21, -inf  ;;  %v2916_v49 = vmax.f32 %v1308_v57, %v1309_v34  ;;  %v3751_v0 = vld [vmem:[#allocation76_spill] sm:$0xff]  ;;  %v3759_v34 = vld [vmem:[#allocation71_spill] sm:$0xff] }
 0x114   : > { %3734 = vst [vmem:[#allocation5_spill] sm:$0xff] %v2884_v6  ;;  %v3744_v6 = vld [vmem:[#allocation66_spill] sm:$0xff]  ;;  %v1312_v48 = vsel %vm1184_vm1, %v3745_v12, -inf  ;;  %v1318_v10 = vsel %vm1184_vm1, %v3751_v0, -inf  ;;  %v3753_v12 = vld [vmem:[#allocation77_spill] sm:$0xff]  ;;  %v1326_v0 = vsel %vm1184_vm1, %v3759_v34, -inf }
 0x115   : > { %3738 = vst [vmem:[#allocation12_spill] sm:$0xff] %v2892_v1  ;;  %v1311_v51 = vsel %vm1184_vm1, %v3744_v6, -inf  ;;  %v3748_v1 = vld [vmem:[#allocation75_spill] sm:$0xff]  ;;  %v3752_v6 = vld [vmem:[#allocation69_spill] sm:$0xff]  ;;  %v1321_v46 = vsel %vm1184_vm1, %v3753_v12, -inf  ;;  %v2932_v57 = vmax.f32 %v1317_v20, %v1318_v10 }
 0x116   : > { %3742 = vst [vmem:[#allocation6_spill] sm:$0xff] %v2900_v36  ;;  %v1315_v2 = vsel %vm1184_vm1, %v3748_v1, -inf  ;;  %v1320_v18 = vsel %vm1184_vm1, %v3752_v6, -inf  ;;  %v2924_v56 = vmax.f32 %v1311_v51, %v1312_v48  ;;  %v3761_v36 = vld [vmem:[#allocation80_spill] sm:$0xff] }
 0x117   : > { %3743 = vst [vmem:[#allocation13_spill] sm:$0xff] %v2902_v33  ;;  %v2926_v63 = vmax.f32 %v1314_v16, %v1315_v2  ;;  %v3757_v33 = vld [vmem:[#allocation78_spill] sm:$0xff]  ;;  %v1329_v51 = vsel %vm1184_vm1, %v3761_v36, -inf  ;;  %v2940_v48 = vmax.f32 %v1320_v18, %v1321_v46  ;;  %v3763_v16 = vld [vmem:[#allocation88_spill] sm:$0xff]  ;;  %v3771_v46 = vld [vmem:[#allocation83_spill] sm:$0xff] }
 0x118   : > { %3746 = vst [vmem:[#allocation7_spill] sm:$0xff] %v2908_v59  ;;  %v3756_v59 = vld [vmem:[#allocation70_spill] sm:$0xff]  ;;  %v1324_v21 = vsel %vm1184_vm1, %v3757_v33, -inf  ;;  %v1330_v2 = vsel %vm1184_vm1, %v3763_v16, -inf  ;;  %v3765_v33 = vld [vmem:[#allocation89_spill] sm:$0xff]  ;;  %v1338_v16 = vsel %vm1184_vm1, %v3771_v46, -inf }
 0x119   : > { %3750 = vst [vmem:[#allocation14_spill] sm:$0xff] %v2916_v49  ;;  %v1323_v1 = vsel %vm1184_vm1, %v3756_v59, -inf  ;;  %v3760_v49 = vld [vmem:[#allocation79_spill] sm:$0xff]  ;;  %v3764_v59 = vld [vmem:[#allocation81_spill] sm:$0xff]  ;;  %v1333_v20 = vsel %vm1184_vm1, %v3765_v33, -inf  ;;  %v2956_v18 = vmax.f32 %v1329_v51, %v1330_v2 }
 0x11a   : > { %3754 = vst [vmem:[#allocation8_spill] sm:$0xff] %v2924_v56  ;;  %v1327_v6 = vsel %vm1184_vm1, %v3760_v49, -inf  ;;  %v1332_v12 = vsel %vm1184_vm1, %v3764_v59, -inf  ;;  %v2948_v10 = vmax.f32 %v1323_v1, %v1324_v21  ;;  %v3773_v56 = vld [vmem:[#allocation84_spill] sm:$0xff] }
 0x11b   : > { %3755 = vst [vmem:[#allocation15_spill] sm:$0xff] %v2926_v63  ;;  %v2950_v34 = vmax.f32 %v1326_v0, %v1327_v6  ;;  %v3769_v63 = vld [vmem:[#allocation90_spill] sm:$0xff]  ;;  %v1341_v1 = vsel %vm1184_vm1, %v3773_v56, -inf  ;;  %v2964_v21 = vmax.f32 %v1332_v12, %v1333_v20  ;;  %v3775_v0 = vld [vmem:[#allocation92_spill] sm:$0xff]  ;;  %v3780_v20 = vld [vmem:[#allocation87_spill] sm:$0xff] }
 0x11c   : > { %3758 = vst [vmem:[#allocation16_spill] sm:$0xff] %v2932_v57  ;;  %v3768_v57 = vld [vmem:[#allocation82_spill] sm:$0xff]  ;;  %v1336_v36 = vsel %vm1184_vm1, %v3769_v63, -inf  ;;  %v1342_v6 = vsel %vm1184_vm1, %v3775_v0, -inf  ;;  %v3777_v63 = vld [vmem:[#allocation93_spill] sm:$0xff]  ;;  %v1350_v0 = vsel %vm1184_vm1, %v3780_v20, -inf }
 0x11d   : > { %3762 = vst [vmem:[#allocation24_spill] sm:$0xff] %v2940_v48  ;;  %v1335_v49 = vsel %vm1184_vm1, %v3768_v57, -inf  ;;  %v3772_v48 = vld [vmem:[#allocation91_spill] sm:$0xff]  ;;  %v3776_v57 = vld [vmem:[#allocation85_spill] sm:$0xff]  ;;  %v1345_v51 = vsel %vm1184_vm1, %v3777_v63, -inf  ;;  %v2980_v12 = vmax.f32 %v1341_v1, %v1342_v6  ;;  %v3784_v63 = vld [vmem:[#allocation98_spill] sm:$0xff] }
 0x11e   : > { %3766 = vst [vmem:[#allocation17_spill] sm:$0xff] %v2948_v10  ;;  %v1339_v59 = vsel %vm1184_vm1, %v3772_v48, -inf  ;;  %v1344_v33 = vsel %vm1184_vm1, %v3776_v57, -inf  ;;  %v2972_v2 = vmax.f32 %v1335_v49, %v1336_v36  ;;  %v3782_v10 = vld [vmem:[#allocation96_spill] sm:$0xff]  ;;  %v1368_v20 = vsel %vm1184_vm1, %v2632_v4, -inf }
 0x11f   : > { %3767 = vst [vmem:[#allocation25_spill] sm:$0xff] %v2950_v34  ;;  %v2974_v46 = vmax.f32 %v1338_v16, %v1339_v59  ;;  %v3779_v34 = vld [vmem:[#allocation94_spill] sm:$0xff]  ;;  %v1353_v49 = vsel %vm1184_vm1, %v3782_v10, -inf  ;;  %v2988_v36 = vmax.f32 %v1344_v33, %v1345_v51  ;;  %v1354_v16 = vsel %vm1184_vm1, %v2640_v38, -inf }
 0x120   : > { %3770 = vst [vmem:[#allocation18_spill] sm:$0xff] %v2956_v18  ;;  %v3778_v18 = vld [vmem:[#allocation86_spill] sm:$0xff]  ;;  %v1348_v56 = vsel %vm1184_vm1, %v3779_v34, -inf  ;;  %v1357_v34 = vsel %vm1184_vm1, %v2642_v15, -inf  ;;  %v1360_v10 = vsel %vm1184_vm1, %v2644_v32, -inf  ;;  %v3004_v33 = vmax.f32 %v1353_v49, %v1354_v16 }
 0x121   : > { %3774 = vst [vmem:[#allocation26_spill] sm:$0xff] %v2964_v21  ;;  %v1347_v48 = vsel %vm1184_vm1, %v3778_v18, -inf  ;;  %v3781_v21 = vld [vmem:[#allocation95_spill] sm:$0xff]  ;;  %v3783_v18 = vld [vmem:[#allocation97_spill] sm:$0xff]  ;;  %v1362_v38 = vsel %vm1184_vm1, %v2626_v5, -inf  ;;  %v1363_v51 = vsel %vm1184_vm1, %v2646_v26, -inf }
 0x122   : > { %v1351_v57 = vsel %vm1184_vm1, %v3781_v21, -inf  ;;  %v1356_v59 = vsel %vm1184_vm1, %v3783_v18, -inf  ;;  %v2996_v1 = vmax.f32 %v1347_v48, %v1348_v56  ;;  %v1359_v21 = vsel %vm1184_vm1, %v3784_v63, -inf  ;;  %v3801_v63 = vld [vmem:[#allocation15_spill] sm:$0xff] }
 0x123   : > { %v2998_v6 = vmax.f32 %v1350_v0, %v1351_v57  ;;  %v1365_v15 = vsel %vm1184_vm1, %v2629_v24, -inf  ;;  %v3012_v48 = vmax.f32 %v1356_v59, %v1357_v34  ;;  %v1366_v56 = vsel %vm1184_vm1, %v2648_v52, -inf  ;;  %v3802_v34 = vld [vmem:[#allocation16_spill] sm:$0xff] }
 0x124   : > { %v1369_v32 = vsel %vm1184_vm1, %v2650_v54, -inf  ;;  %v3020_v0 = vmax.f32 %v1359_v21, %v1360_v10  ;;  %v3022_v5 = vmax.f32 %v1362_v38, %v1363_v51  ;;  %v1371_v26 = vsel %vm1184_vm1, %v2635_v23, -inf  ;;  %v3789_v51 = vld [vmem:[#allocation9_spill] sm:$0xff]  ;;  %v3790_v38 = vld [vmem:[#allocation3_spill] sm:$0xff]  ;;  %v3791_v10 = vld [vmem:[#allocation10_spill] sm:$0xff] }
 0x125   : > { %3785 = vst [vmem:[#allocation19_spill] sm:$0xff] %v3012_v48  ;;  %v1372_v24 = vsel %vm1184_vm1, %v2660_v50, -inf  ;;  %v3028_v57 = vmax.f32 %v1365_v15, %v1366_v56  ;;  %v3030_v49 = vmax.f32 %v1368_v20, %v1369_v32  ;;  %v1374_v4 = vsel %vm1184_vm1, %v2638_v11, -inf  ;;  %v3788_v15 = vld [vmem:[#allocation2_spill] sm:$0xff]  ;;  %v3792_v21 = vld [vmem:[#allocation4_spill] sm:$0xff]  ;;  %v3804_v11 = vld [vmem:[#allocation17_spill] sm:$0xff] }
 0x126   : > { %v1375_v52 = vsel %vm1184_vm1, %v2662_v44, -inf  ;;  %v3036_v54 = vmax.f32 %v1371_v26, %v1372_v24  ;;  %v3800_v23 = vld [vmem:[#allocation8_spill] sm:$0xff]  ;;  %v3805_v59 = vld [vmem:[#allocation25_spill] sm:$0xff]  ;;  %v3808_v32 = vpack.c.bf16 %v2668_v58, %v2668_v58  ;;  %v3809_v24 = vpack.c.bf16 %v2676_v37, %v2676_v37 }
 0x127   : > { %v3038_v16 = vmax.f32 %v1374_v4, %v1375_v52  ;;  %v3803_v44 = vld [vmem:[#allocation24_spill] sm:$0xff]  ;;  %v3806_v18 = vld [vmem:[#allocation18_spill] sm:$0xff]  ;;  %v3810_v4 = vpack.c.bf16 %v2684_v35, %v2684_v35  ;;  %v3811_v56 = vpack.c.bf16 %v2686_v41, %v2686_v41  ;;  %v3812_v58 = vpack.c.bf16 %v2692_v47, %v2692_v47 }
 0x128   : > { %3786 = vst [vmem:[#allocation27_spill] sm:$0xff] %v3036_v54  ;;  %v3807_v50 = vld [vmem:[#allocation26_spill] sm:$0xff]  ;;  %v3171_v48 = vunpack.c.l.b16 %v3808_v32  ;;  %v3176_v26 = vunpack.c.l.b16 %v3809_v24  ;;  %v3813_v37 = vpack.c.bf16 %v2700_v29, %v2700_v29  ;;  %v3814_v35 = vpack.c.bf16 %v2708_v19, %v2708_v19 }
 0x129   : > { %3787 = vst [vmem:[#allocation20_spill] sm:$0xff] %v3038_v16  ;;  %v3181_v52 = vunpack.c.l.b16 %v3810_v4  ;;  %v3186_v54 = vunpack.c.l.b16 %v3811_v56  ;;  %v3191_v32 = vunpack.c.l.b16 %v3812_v58  ;;  %v3815_v41 = vpack.c.bf16 %v2710_v62, %v2710_v62 }
 0x12a   : > { %v3196_v24 = vunpack.c.l.b16 %v3813_v37  ;;  %v3201_v4 = vunpack.c.l.b16 %v3814_v35  ;;  %v3816_v47 = vpack.c.bf16 %v2716_v53, %v2716_v53  ;;  %v3817_v29 = vpack.c.bf16 %v2724_v28, %v2724_v28 }
 0x12b   : > { %v3206_v56 = vunpack.c.l.b16 %v3815_v41  ;;  %v3818_v19 = vpack.c.bf16 %v2732_v22, %v2732_v22  ;;  %v3819_v62 = vpack.c.bf16 %v2734_v45, %v2734_v45  ;;  %v3820_v53 = vpack.c.bf16 %v2740_v9, %v2740_v9 }
 0x12c   : > { %v3211_v58 = vunpack.c.l.b16 %v3816_v47  ;;  %v3216_v37 = vunpack.c.l.b16 %v3817_v29  ;;  %v3821_v28 = vpack.c.bf16 %v2748_v60, %v2748_v60  ;;  %v3822_v22 = vpack.c.bf16 %v2756_v27, %v2756_v27 }
 0x12d   : > { %v3221_v35 = vunpack.c.l.b16 %v3818_v19  ;;  %v3226_v41 = vunpack.c.l.b16 %v3819_v62  ;;  %v3231_v47 = vunpack.c.l.b16 %v3820_v53  ;;  %v3823_v45 = vpack.c.bf16 %v2758_v61, %v2758_v61 }
 0x12e   : > { %v3236_v29 = vunpack.c.l.b16 %v3821_v28  ;;  %v3241_v19 = vunpack.c.l.b16 %v3822_v22  ;;  %v3824_v9 = vpack.c.bf16 %v2764_v13, %v2764_v13  ;;  %v3825_v20 = vpack.c.bf16 %v2772_v42, %v2772_v42 }
 0x12f   : > { %v3246_v62 = vunpack.c.l.b16 %v3823_v45  ;;  %v3826_v28 = vpack.c.bf16 %v2780_v25, %v2780_v25  ;;  %v3827_v27 = vpack.c.bf16 %v2782_v8, %v2782_v8  ;;  %v3828_v61 = vpack.c.bf16 %v2788_v40, %v2788_v40 }
 0x130   : > { %v1521_v53 = vunpack.c.l.b16 %v3824_v9  ;;  %v1522_v60 = vunpack.c.l.b16 %v3825_v20  ;;  %v3829_v13 = vpack.c.bf16 %v2796_v39, %v2796_v39  ;;  %v3830_v42 = vpack.c.bf16 %v2804_v14, %v2804_v14 }
 0x131   : > { %v1523_v16 = vunpack.c.l.b16 %v3826_v28  ;;  %v1524_v22 = vunpack.c.l.b16 %v3827_v27  ;;  %v3263_v45 = vunpack.c.l.b16 %v3828_v61  ;;  %v3831_v25 = vpack.c.bf16 %v2806_v31, %v2806_v31 }
 0x132   : > { %v3268_v9 = vunpack.c.l.b16 %v3829_v13  ;;  %v3273_v20 = vunpack.c.l.b16 %v3830_v42  ;;  %v3832_v40 = vpack.c.bf16 %v2812_v55, %v2812_v55  ;;  %v3833_v27 = vpack.c.bf16 %v2820_v30, %v2820_v30 }
 0x133   : > { %v3278_v8 = vunpack.c.l.b16 %v3831_v25  ;;  %v3834_v61 = vpack.c.bf16 %v2828_v17, %v2828_v17  ;;  %v3835_v14 = vpack.c.bf16 %v2830_v7, %v2830_v7  ;;  %v3836_v31 = vpack.c.bf16 %v2836_v3, %v2836_v3 }
 0x134   : > { %v1529_v28 = vunpack.c.l.b16 %v3832_v40  ;;  %v1530_v39 = vunpack.c.l.b16 %v3833_v27  ;;  %v3837_v55 = vpack.c.bf16 %v2844_v43, %v2844_v43  ;;  %v3838_v30 = vpack.c.bf16 %v3788_v15, %v3788_v15 }
 0x135   : > { %v1531_v13 = vunpack.c.l.b16 %v3834_v61  ;;  %v1532_v42 = vunpack.c.l.b16 %v3835_v14  ;;  %v1533_v25 = vunpack.c.l.b16 %v3836_v31  ;;  %v3839_v17 = vpack.c.bf16 %v3789_v51, %v3789_v51 }
 0x136   : > { %v1534_v40 = vunpack.c.l.b16 %v3837_v55  ;;  %v3301_v27 = vunpack.c.l.b16 %v3838_v30  ;;  %v3841_v7 = vpack.c.bf16 %v3790_v38, %v3790_v38  ;;  %v3843_v3 = vpack.c.bf16 %v3791_v10, %v3791_v10  ;;  %v3847_v55 = vld [vmem:[#allocation11_spill] sm:$0xff] }
 0x137   : > { %v3306_v61 = vunpack.c.l.b16 %v3839_v17  ;;  %v3845_v15 = vpack.c.bf16 %v3792_v21, %v3792_v21  ;;  %v3848_v51 = vpack.c.bf16 %v3847_v55, %v3847_v55  ;;  %v3850_v17 = vld [vmem:[#allocation5_spill] sm:$0xff] }
 0x138   : > { %v3311_v14 = vunpack.c.l.b16 %v3841_v7  ;;  %v3316_v43 = vunpack.c.l.b16 %v3843_v3  ;;  %v3851_v38 = vpack.c.bf16 %v3850_v17, %v3850_v17 }
 0x139   : > { %3840 = vst [vmem:[#allocation28_spill] sm:$0xff] %v3306_v61  ;;  %v3321_v31 = vunpack.c.l.b16 %v3845_v15  ;;  %v3326_v30 = vunpack.c.l.b16 %v3848_v51  ;;  %v3853_v61 = vld [vmem:[#allocation12_spill] sm:$0xff] }
 0x13a   : > { %3842 = vst [vmem:[#allocation21_spill] sm:$0xff] %v3311_v14  ;;  %v3331_v7 = vunpack.c.l.b16 %v3851_v38  ;;  %v3854_v10 = vpack.c.bf16 %v3853_v61, %v3853_v61 }
 0x13b   : > { %3844 = vst [vmem:[#allocation29_spill] sm:$0xff] %v3316_v43  ;;  %v3856_v43 = vld [vmem:[#allocation6_spill] sm:$0xff] }
 0x13c   : > { %3846 = vst [vmem:[#allocation22_spill] sm:$0xff] %v3321_v31  ;;  %v3336_v3 = vunpack.c.l.b16 %v3854_v10  ;;  %v3857_v21 = vpack.c.bf16 %v3856_v43, %v3856_v43  ;;  %v3858_v31 = vld [vmem:[#allocation13_spill] sm:$0xff]  ;;  %v3864_v10 = vpack.c.bf16 %v3800_v23, %v3800_v23  ;;  %v3865_v43 = vpack.c.bf16 %v3801_v63, %v3801_v63 }
 0x13d   : > { %3849 = vst [vmem:[#allocation30_spill] sm:$0xff] %v3326_v30  ;;  %v3859_v55 = vpack.c.bf16 %v3858_v31, %v3858_v31  ;;  %v3860_v30 = vld [vmem:[#allocation7_spill] sm:$0xff]  ;;  %v3866_v31 = vpack.c.bf16 %v3802_v34, %v3802_v34  ;;  %v3869_v63 = vpack.c.bf16 %v3805_v59, %v3805_v59  ;;  %v3871_v34 = vpack.c.bf16 %v3806_v18, %v3806_v18 }
 0x13e   : > { %3852 = vst [vmem:[#allocation23_spill] sm:$0xff] %v3331_v7  ;;  %v3341_v15 = vunpack.c.l.b16 %v3857_v21  ;;  %v3861_v17 = vpack.c.bf16 %v3860_v30, %v3860_v30  ;;  %v3862_v7 = vld [vmem:[#allocation14_spill] sm:$0xff]  ;;  %v3360_v21 = vunpack.c.l.b16 %v3865_v43  ;;  %v3867_v30 = vpack.c.bf16 %v3803_v44, %v3803_v44 }
 0x13f   : > { %3855 = vst [vmem:[#allocation31_spill] sm:$0xff] %v3336_v3  ;;  %v3346_v51 = vunpack.c.l.b16 %v3859_v55  ;;  %v3863_v14 = vpack.c.bf16 %v3862_v7, %v3862_v7  ;;  %v1547_v3 = vunpack.c.l.b16 %v3864_v10  ;;  %v3365_v55 = vunpack.c.l.b16 %v3866_v31 }
 0x140   : > { %v1545_v38 = vunpack.c.l.b16 %v3861_v17  ;;  %v3370_v17 = vunpack.c.l.b16 %v3867_v30  ;;  %v3380_v7 = vunpack.c.l.b16 %v3869_v63  ;;  %v1553_v10 = vunpack.c.l.b16 %v3871_v34 }
 0x141   : > { %v1546_v61 = vunpack.c.l.b16 %v3863_v14  ;;  %v3868_v14 = vpack.c.bf16 %v3804_v11, %v3804_v11  ;;  %v3872_v43 = vpack.c.bf16 %v3807_v50, %v3807_v50  ;;  %v3873_v31 = vpack.c.bf16 %v2972_v2, %v2972_v2 }
 0x142   : > { %3870 = vst [vmem:[#allocation32_spill] sm:$0xff] %v3380_v7  ;;  %v3874_v11 = vpack.c.bf16 %v2974_v46, %v2974_v46  ;;  %v3875_v59 = vpack.c.bf16 %v2980_v12, %v2980_v12  ;;  %v3876_v18 = vpack.c.bf16 %v2988_v36, %v2988_v36  ;;  %v3877_v50 = vpack.c.bf16 %v2996_v1, %v2996_v1 }
 0x143   : > { %v3375_v23 = vunpack.c.l.b16 %v3868_v14  ;;  %v1554_v44 = vunpack.c.l.b16 %v3872_v43  ;;  %v1555_v30 = vunpack.c.l.b16 %v3873_v31  ;;  %v3878_v2 = vpack.c.bf16 %v2998_v6, %v2998_v6 }
 0x144   : > { %v1556_v14 = vunpack.c.l.b16 %v3874_v11  ;;  %v1557_v63 = vunpack.c.l.b16 %v3875_v59  ;;  %v3400_v34 = vunpack.c.l.b16 %v3876_v18  ;;  %v3405_v43 = vunpack.c.l.b16 %v3877_v50  ;;  %v3880_v11 = vld [vmem:[#allocation19_spill] sm:$0xff] }
 0x145   : > { %v3410_v31 = vunpack.c.l.b16 %v3878_v2  ;;  %v3879_v46 = vpack.c.bf16 %v3004_v33, %v3004_v33  ;;  %v3881_v59 = vpack.c.bf16 %v3880_v11, %v3880_v11  ;;  %v3882_v18 = vpack.c.bf16 %v3020_v0, %v3020_v0 }
 0x146   : > { %v3883_v1 = vpack.c.bf16 %v3022_v5, %v3022_v5  ;;  %v3884_v6 = vpack.c.bf16 %v3028_v57, %v3028_v57  ;;  %v3885_v33 = vpack.c.bf16 %v3030_v49, %v3030_v49  ;;  %v1570_v0 = vsel %vm1569_vm2, %v3176_v26, %v3171_v48 }
 0x147   : > { %v1561_v12 = vunpack.c.l.b16 %v3879_v46  ;;  %v1562_v36 = vunpack.c.l.b16 %v3881_v59  ;;  %v1563_v7 = vunpack.c.l.b16 %v3882_v18  ;;  %v1572_v5 = vsel %vm1571_vm3, %v3181_v52, %v1570_v0 }
 0x148   : > { %v1564_v50 = vunpack.c.l.b16 %v3883_v1  ;;  %v1565_v2 = vunpack.c.l.b16 %v3884_v6  ;;  %v1566_v46 = vunpack.c.l.b16 %v3885_v33  ;;  %v1583_v57 = vsel %vm1569_vm2, %v3216_v37, %v3211_v58  ;;  %v3890_v1 = vld [vmem:[#allocation22_spill] sm:$0xff] }
 0x149   : > { %v1590_v49 = vsel %vm1569_vm2, %v1522_v60, %v1521_v53  ;;  %v1597_v11 = vsel %vm1569_vm2, %v1530_v39, %v1529_v28  ;;  %v1574_v59 = vsel %vm1573_vm4, %v3186_v54, %v1572_v5  ;;  %v1584_v48 = vsel %vm1571_vm3, %v3221_v35, %v1583_v57  ;;  %v3891_v33 = vld [vmem:[#allocation30_spill] sm:$0xff]  ;;  %v3892_v57 = vld [vmem:[#allocation23_spill] sm:$0xff] }
 0x14a   : > { %v1591_v26 = vsel %vm1571_vm3, %v1523_v16, %v1590_v49  ;;  %v1598_v18 = vsel %vm1571_vm3, %v1531_v13, %v1597_v11  ;;  %v1576_v52 = vsel %vm1575_vm5, %v3191_v32, %v1574_v59  ;;  %v1585_v58 = vsel %vm1573_vm4, %v3226_v41, %v1584_v48 }
 0x14b   : > { %v1592_v37 = vsel %vm1573_vm4, %v1524_v22, %v1591_v26  ;;  %v1599_v53 = vsel %vm1573_vm4, %v1532_v42, %v1598_v18  ;;  %v1578_v54 = vsel %vm1577_vm6, %v3196_v24, %v1576_v52  ;;  %v1586_v35 = vsel %vm1575_vm5, %v3231_v47, %v1585_v58  ;;  %v3886_v24 = vld [vmem:[#allocation27_spill] sm:$0xff]  ;;  %v3897_v26 = vld [vmem:[#allocation32_spill] sm:$0xff] }
 0x14c   : > { %v1593_v16 = vsel %vm1575_vm5, %v3263_v45, %v1592_v37  ;;  %v1600_v60 = vsel %vm1575_vm5, %v1533_v25, %v1599_v53  ;;  %v1580_v32 = vsel %vm1579_vm7, %v3201_v4, %v1578_v54  ;;  %v1587_v41 = vsel %vm1577_vm6, %v3236_v29, %v1586_v35  ;;  %v3888_v25 = vld [vmem:[#allocation21_spill] sm:$0xff] }
 0x14d   : > { %v1594_v22 = vsel %vm1577_vm6, %v3268_v9, %v1593_v16  ;;  %v1601_v28 = vsel %vm1577_vm6, %v1534_v40, %v1600_v60  ;;  %v3887_v39 = vpack.c.bf16 %v3886_v24, %v3886_v24  ;;  %v1582_v45 = vsel %vm1581_vm8, %v3206_v56, %v1580_v32  ;;  %v3889_v40 = vld [vmem:[#allocation29_spill] sm:$0xff] }
 0x14e   : > { %v1588_v13 = vsel %vm1579_vm7, %v3241_v19, %v1587_v41  ;;  %v1595_v4 = vsel %vm1579_vm7, %v3273_v20, %v1594_v22  ;;  %v1602_v42 = vsel %vm1579_vm7, %v3301_v27, %v1601_v28  ;;  %v1604_v56 = vsel %vm1569_vm2, %v3889_v40, %v3888_v25 }
 0x14f   : > { %v1567_v47 = vunpack.c.l.b16 %v3887_v39  ;;  %v1589_v29 = vsel %vm1581_vm8, %v3246_v62, %v1588_v13  ;;  %v1596_v9 = vsel %vm1581_vm8, %v3278_v8, %v1595_v4  ;;  %v1605_v19 = vsel %vm1571_vm3, %v3890_v1, %v1604_v56 }
 0x150   : > { %v1611_v6 = vsel %vm1569_vm2, %v1546_v61, %v1545_v38  ;;  %v1618_v20 = vsel %vm1569_vm2, %v1554_v44, %v1553_v10  ;;  %v1625_v62 = vsel %vm1569_vm2, %v1562_v36, %v1561_v12  ;;  %v1606_v0 = vsel %vm1573_vm4, %v3891_v33, %v1605_v19  ;;  %v3893_v10 = vld [vmem:[#allocation31_spill] sm:$0xff] }
 0x151   : > { %v1612_v8 = vsel %vm1571_vm3, %v1547_v3, %v1611_v6  ;;  %v1619_v27 = vsel %vm1571_vm3, %v1555_v30, %v1618_v20  ;;  %v1626_v5 = vsel %vm1571_vm3, %v1563_v7, %v1625_v62  ;;  %v1607_v49 = vsel %vm1575_vm5, %v3892_v57, %v1606_v0 }
 0x152   : > { %v1613_v11 = vsel %vm1573_vm4, %v3360_v21, %v1612_v8  ;;  %v1620_v38 = vsel %vm1573_vm4, %v1556_v14, %v1619_v27  ;;  %v1627_v61 = vsel %vm1573_vm4, %v1564_v50, %v1626_v5  ;;  %v1608_v44 = vsel %vm1577_vm6, %v3893_v10, %v1607_v49  ;;  %v3894_v50 = vld [vmem:[#allocation20_spill] sm:$0xff] }
 0x153   : > { %v1614_v3 = vsel %vm1575_vm5, %v3365_v55, %v1613_v11  ;;  %v1621_v30 = vsel %vm1575_vm5, %v1557_v63, %v1620_v38  ;;  %v1628_v7 = vsel %vm1575_vm5, %v1565_v2, %v1627_v61  ;;  %v1609_v12 = vsel %vm1579_vm7, %v3341_v15, %v1608_v44  ;;  %v3896_v55 = vld [vmem:[#allocation28_spill] sm:$0xff] }
 0x154   : > { %v1615_v21 = vsel %vm1577_vm6, %v3370_v17, %v1614_v3  ;;  %v1622_v14 = vsel %vm1577_vm6, %v3400_v34, %v1621_v30  ;;  %v1629_v36 = vsel %vm1577_vm6, %v1566_v46, %v1628_v7  ;;  %v3895_v59 = vpack.c.bf16 %v3894_v50, %v3894_v50 }
 0x155   : > { %v1603_v63 = vsel %vm1581_vm8, %v3896_v55, %v1602_v42  ;;  %v1616_v2 = vsel %vm1579_vm7, %v3375_v23, %v1615_v21  ;;  %v1623_v15 = vsel %vm1579_vm7, %v3405_v43, %v1622_v14  ;;  %v1610_v17 = vsel %vm1581_vm8, %v3346_v51, %v1609_v12 }
 0x156   : > { %v1568_v48 = vunpack.c.l.b16 %v3895_v59  ;;  %v1630_v34 = vsel %vm1579_vm7, %v1567_v47, %v1629_v36  ;;  %v1632_v46 = vpack.c.b16 %v1582_v45, %v1582_v45  ;;  %v1617_v18 = vsel %vm1581_vm8, %v3897_v26, %v1616_v2 }
 0x157   : > { %v1633_v52 = vpack.c.b16 %v1589_v29, %v1589_v29  ;;  %v1634_v58 = vpack.c.b16 %v1596_v9, %v1596_v9  ;;  %v1624_v23 = vsel %vm1581_vm8, %v3410_v31, %v1623_v15  ;;  %v1635_v37 = vpack.c.b16 %v1603_v63, %v1603_v63 }
 0x158   : > { %v1631_v43 = vsel %vm1581_vm8, %v1568_v48, %v1630_v34  ;;  %v1636_v53 = vpack.c.b16 %v1610_v17, %v1610_v17  ;;  %1649 = vst.msk [vmem:[%s157_s17] sm:$0xf] %vm1648_vm9, %v1632_v46  ;;  %v1637_v54 = vpack.c.b16 %v1617_v18, %v1617_v18  ;;  %v1638_v51 = vpack.c.b16 %v1624_v23, %v1624_v23 }
 0x159   : > { %1650 = vst.msk [vmem:[%s157_s17 + $0x4] sm:$0xf] %vm1648_vm9, %v1633_v52  ;;  %v1639_v35 = vpack.c.b16 %v1631_v43, %v1631_v43 }
 0x15a   : > { %1651 = vst.msk [vmem:[%s157_s17 + $0x8] sm:$0xf] %vm1648_vm9, %v1634_v58 }
 0x15b   : > { %1652 = vst.msk [vmem:[%s157_s17 + $0xc] sm:$0xf] %vm1648_vm9, %v1635_v37 }
 0x15c   : > { %1653 = vst.msk [vmem:[%s157_s17 + $0x10] sm:$0xf] %vm1648_vm9, %v1636_v53 }
 0x15d   : > { %1654 = vst.msk [vmem:[%s157_s17 + $0x14] sm:$0xf] %vm1648_vm9, %v1637_v54 }
 0x15e   : > { %1655 = vst.msk [vmem:[%s157_s17 + $0x18] sm:$0xf] %vm1648_vm9, %v1638_v51 }
 0x15f   : > { %1656 = vst.msk [vmem:[%s157_s17 + $0x1c] sm:$0xf] %vm1648_vm9, %v1639_v35 }
 0x160 PF: > { %s11_s8 = sadd.s32 1, %s1806_s8   ;;  %s3898_s6 = smov %s1802_s7 }
 0x161   : > { %p8_p5 = scmp.ge.s32.totalorder %s11_s8, 4   ;;  %s3899_s7 = smov %s3901_s9 }
 0x163   :  { %10 = sbr.rel (!%p8_p5) target bundleno = 2 (0x2), region = 54 }

// kernel: down_forward.8
= control target key start
LH: loop header
LB: loop body
LE: loop exit
PB: predicated region body
PF: predicated region fallthrough
CT: control target
= control target key end

     0   :  { %s2350_s12 = smov 0   ;;  %s2352_s13 = smov 0   ;;  %s3071_s0 = inlined_call_operand.vmem [shape: bf16[2,10,10,128], index: 0, kind: input, shape index: {}]   ;;  %s3072_s1 = inlined_call_operand.vmem [shape: bf16[1152,128], index: 1, kind: input, shape index: {}]   ;;  %s3073_s2 = inlined_call_operand.vmem [shape: bf16[2,8,8,128], index: 2, kind: output, shape index: {0}]   ;;  %s3074_s3 = inlined_call_operand.vmem [shape: f32[2,1,2,128], index: 3, kind: output, shape index: {1}]  }
   0x1   :  { %s2354_s14 = smov 0  }
   0x2 LB: > { %s26_s15 = sadd.s32 1, %s2324_s13  ;;  %p1826_p0 = scmp.ge.s32.totalorder %s2328_s14, 1  ;;  %s2328_s14 = sphi %s2354_s14, %s14_s14   ;;  %s2324_s13 = sphi %s2352_s13, %s3076_s13   ;;  %s2320_s12 = sphi %s2350_s12, %s3075_s12  }
   0x3   : > { %p28_p1 = scmp.ge.s32.totalorder %s26_s15, 2  ;;  %p156_p2 = scmp.lt.s32.totalorder %s2328_s14, 3 }
   0x5   : > { %s3078_s15 = smov (%p28_p1, %s26_s15), 0  ;;  %p157_p3 = pnand %p1826_p0, %p156_p2 }
   0x6   : > { %p191_p4 = scmp.lt.s32.totalorder (!%p157_p3), %s2320_s12, 1 }
   0x7   : > { %160 = sbr.rel (%p157_p3) target bundleno = 347 (0x15b), region = 28 }
   0xc   : > { %v2177_v0 = vld [vmem:[%s3072_s1 + $0x38] sm:$0xff]  ;;  %v2176_v2 = vld [vmem:[%s3072_s1 + $0x30] sm:$0xff]  ;;  %s3080_s12 = smov (!%p191_p4, %s2320_s12), 1  ;;  %v2175_v6 = vld [vmem:[%s3072_s1 + $0x28] sm:$0xff] }
   0xd   : > { %v2193_v1 = vld [vmem:[%s3072_s1 + $0xb8] sm:$0xff]  ;;  %2265 = vmatpush.bf16.msra.mxu1 %v2177_v0  ;;  %1377 = vmatpush.bf16.msra.mxu0 %v2177_v0  ;;  %v2192_v3 = vld [vmem:[%s3072_s1 + $0xb0] sm:$0xff]  ;;  %s2281_s28 = smul.u32 80, %s3080_s12  ;;  %v2191_v7 = vld [vmem:[%s3072_s1 + $0xa8] sm:$0xff]  ;;  %s1830_s7 = sshll.u32 %s3080_s12, 1 }
   0xe   : > { %1435 = vmatpush.bf16.msra.mxu2 %v2193_v1  ;;  %v2201_v4 = vld [vmem:[%s3072_s1 + $0xf8] sm:$0xff]  ;;  %v2200_v5 = vld [vmem:[%s3072_s1 + $0xf0] sm:$0xff]  ;;  %v2199_v8 = vld [vmem:[%s3072_s1 + $0xe8] sm:$0xff]  ;;  %s212_s11 = scalar_lea.vmem %s3074_s3, %s1830_s7 }
   0xf   : > { %1464 = vmatpush.bf16.msra.mxu3 %v2201_v4  ;;  %s2401_s10 = scalar_lea.vmem %s3071_s0, %s2281_s28  ;;  %v2174_v9 = vld [vmem:[%s3072_s1 + $0x20] sm:$0xff]  ;;  %v2173_v16 = vld [vmem:[%s3072_s1 + $0x18] sm:$0xff]  ;;  %v2172_v23 = vld [vmem:[%s3072_s1 + $0x10] sm:$0xff] }
  0x10   : > { %v2190_v10 = vld [vmem:[%s3072_s1 + $0xa0] sm:$0xff]  ;;  %v2413_v12 = vld [vmem:[%s2401_s10 + $0xc] sm:$0x1]  ;;  %v234_v14 = vld [vmem:[%s2401_s10 + $0x8] sm:$0xe] }
  0x11   : > { %2266 = vmatpush.bf16.msra.mxu1 %v2176_v2  ;;  %1378 = vmatpush.bf16.msra.mxu0 %v2176_v2  ;;  %v2410_v11 = vld [vmem:[%s2401_s10 + $0x4] sm:$0x1]  ;;  %v233_v13 = vld [vmem:[%s2401_s10] sm:$0xe]  ;;  %v316_v18 = vunpack.c.l.b16 %v2413_v12  ;;  %v402_v20 = vunpack.c.l.b16 %v234_v14  ;;  %v2189_v21 = vld [vmem:[%s3072_s1 + $0x98] sm:$0xff] }
  0x12   : > { %1436 = vmatpush.bf16.msra.mxu2 %v2192_v3  ;;  %v2198_v15 = vld [vmem:[%s3072_s1 + $0xe0] sm:$0xff]  ;;  %v314_v17 = vunpack.c.l.b16 %v2410_v11  ;;  %v401_v19 = vunpack.c.l.b16 %v233_v13  ;;  %v2197_v22 = vld [vmem:[%s3072_s1 + $0xd8] sm:$0xff]  ;;  %v2188_v26 = vld [vmem:[%s3072_s1 + $0x90] sm:$0xff] }
  0x13   : > { %1465 = vmatpush.bf16.msra.mxu3 %v2200_v5  ;;  %v410_v25 = vpack.c.b16 %v316_v18, %v402_v20  ;;  %v2171_v27 = vld [vmem:[%s3072_s1 + $0x8] sm:$0xff]  ;;  %v2445_v28 = vld [vmem:[%s2401_s10 + $0x20] sm:$0xf]  ;;  %v2196_v30 = vld [vmem:[%s3072_s1 + $0xd0] sm:$0xff] }
  0x14   : > { %v409_v24 = vpack.c.b16 %v314_v17, %v401_v19  ;;  %v2448_v29 = vld [vmem:[%s2401_s10 + $0x28] sm:$0xf]  ;;  %v2454_v31 = vld [vmem:[%s2401_s10] sm:$0xf]  ;;  %v321_v37 = vunpack.c.l.b16 %v2445_v28  ;;  %v2185_v39 = vld [vmem:[%s3072_s1 + $0x78] sm:$0xff] }
  0x15   : > { %2267 = vmatpush.bf16.msra.mxu1 %v2175_v6  ;;  %1379 = vmatpush.bf16.msra.mxu0 %v2175_v6  ;;  %v2457_v32 = vld [vmem:[%s2401_s10 + $0x8] sm:$0xf]  ;;  %v418_v34 = vrot.slane %v410_v25, 1  ;;  %v2170_v36 = vld [vmem:[%s3072_s1] sm:$0xff]  ;;  %v323_v38 = vunpack.c.l.b16 %v2448_v29  ;;  %v313_v41 = vunpack.c.l.b16 %v2454_v31  ;;  %v2479_v46 = vld [vmem:[%s2401_s10 + $0x14] sm:$0x1] }
  0x16   : > { %1437 = vmatpush.bf16.msra.mxu2 %v2191_v7  ;;  %v417_v33 = vrot.slane %v409_v24, 1  ;;  %v2187_v35 = vld [vmem:[%s3072_s1 + $0x88] sm:$0xff]  ;;  %v2186_v40 = vld [vmem:[%s3072_s1 + $0x80] sm:$0xff]  ;;  %v315_v42 = vunpack.c.l.b16 %v2457_v32  ;;  %v2485_v48 = vld [vmem:[%s2401_s10 + $0x10] sm:$0xf]  ;;  %v318_v56 = vunpack.c.l.b16 %v2479_v46 }
  0x17   : > { %1466 = vmatpush.bf16.msra.mxu3 %v2199_v8  ;;  %v2195_v43 = vld [vmem:[%s3072_s1 + $0xc8] sm:$0xff]  ;;  %v688_v45 = vunpack.c.l.b16 %v418_v34  ;;  %v2488_v49 = vld [vmem:[%s2401_s10 + $0x1c] sm:$0x1]  ;;  %v235_v50 = vld [vmem:[%s2401_s10 + $0x10] sm:$0xe]  ;;  %v891_v52 = vpack.c.b16 %v323_v38, %v321_v37  ;;  %v443_v58 = vunpack.c.l.b16 %v2485_v48 }
  0x18   : > { %v682_v44 = vunpack.c.l.b16 %v417_v33  ;;  %v2482_v47 = vld [vmem:[%s2401_s10 + $0x8] sm:$0xf]  ;;  %v236_v51 = vld [vmem:[%s2401_s10 + $0x18] sm:$0xe]  ;;  %v873_v55 = vpack.c.b16 %v315_v42, %v313_v41  ;;  %v2194_v60 = vld [vmem:[%s3072_s1 + $0xc0] sm:$0xff]  ;;  %v320_v61 = vunpack.c.l.b16 %v2488_v49  ;;  %v403_v62 = vunpack.c.l.b16 %v235_v50 }
  0x19   : > { %2268 = vmatpush.bf16.msra.mxu1 %v2174_v9  ;;  %1380 = vmatpush.bf16.msra.mxu0 %v2174_v9  ;;  %v2209_v53 = vld [vmem:[%s3072_s1 + $0x138] sm:$0xff]  ;;  %v441_v57 = vunpack.c.l.b16 %v2482_v47  ;;  %v404_v63 = vunpack.c.l.b16 %v236_v51  ;;  %v2184_v0 = vld [vmem:[%s3072_s1 + $0x70] sm:$0xff]  ;;  %v2524_v4 = vld [vmem:[%s2401_s10 + $0xc] sm:$0x1] }
  0x1a   : > { %1438 = vmatpush.bf16.msra.mxu2 %v2190_v10  ;;  %v2225_v54 = vld [vmem:[%s3072_s1 + $0x1b8] sm:$0xff]  ;;  %v875_v59 = vpack.c.b16 %v688_v45, %v682_v44  ;;  %v2208_v2 = vld [vmem:[%s3072_s1 + $0x130] sm:$0xff]  ;;  %v411_v7 = vpack.c.b16 %v318_v56, %v403_v62  ;;  %v2183_v9 = vld [vmem:[%s3072_s1 + $0x68] sm:$0xff]  ;;  %v442_v14 = vunpack.c.l.b16 %v2524_v4 }
  0x1b   : > { %1467 = vmatpush.bf16.msra.mxu3 %v2198_v15  ;;  %v2233_v1 = vld [vmem:[%s3072_s1 + $0x1f8] sm:$0xff]  ;;  %v2224_v3 = vld [vmem:[%s3072_s1 + $0x1b0] sm:$0xff]  ;;  %v876_v6 = vpack.c.b16 %v443_v58, %v441_v57  ;;  %v412_v8 = vpack.c.b16 %v320_v61, %v404_v63  ;;  %v2207_v13 = vld [vmem:[%s3072_s1 + $0x128] sm:$0xff] }
  0x1c   : > { %v2527_v5 = vld [vmem:[%s2401_s10 + $0x14] sm:$0x1]  ;;  %v2548_v19 = vld [vmem:[%s2401_s10 + $0x30] sm:$0xf]  ;;  %v2551_v20 = vld [vmem:[%s2401_s10 + $0x38] sm:$0xf]  ;;  %v2580_v12 = vpack.c.b16 %v442_v14, %v441_v57 }
  0x1d   : > { %2269 = vmatpush.bf16.msra.mxu1 %v2173_v16  ;;  %1381 = vmatpush.bf16.msra.mxu0 %v2173_v16  ;;  %v2232_v10 = vld [vmem:[%s3072_s1 + $0x1f0] sm:$0xff]  ;;  %v444_v15 = vunpack.c.l.b16 %v2527_v5  ;;  %v2223_v16 = vld [vmem:[%s3072_s1 + $0x1a8] sm:$0xff]  ;;  %v419_v24 = vrot.slane %v411_v7, 1  ;;  %v420_v25 = vrot.slane %v412_v8, 1  ;;  %v2182_v11 = vld [vmem:[%s3072_s1 + $0x60] sm:$0xff]  ;;  %v325_v33 = vunpack.c.l.b16 %v2548_v19 }
  0x1e   : > { %1439 = vmatpush.bf16.msra.mxu2 %v2189_v21  ;;  %v2555_v21 = vpack.c.b16 %v314_v17, %v313_v41  ;;  %v2231_v17 = vld [vmem:[%s3072_s1 + $0x1e8] sm:$0xff]  ;;  %v2590_v31 = vld [vmem:[%s2401_s10 + $0x24] sm:$0x1]  ;;  %v327_v34 = vunpack.c.l.b16 %v2551_v20  ;;  %v2181_v45 = vld [vmem:[%s3072_s1 + $0x58] sm:$0xff]  ;;  %v468_v51 = vshll.u32 %v2580_v12, 16  ;;  %v466_v7 = vshrl.u32 %v2580_v12, 16 }
  0x1f   : > { %1468 = vmatpush.bf16.msra.mxu3 %v2197_v22  ;;  %v2558_v22 = vld [vmem:[%s2401_s10 + $0x10] sm:$0xf]  ;;  %v2593_v32 = vld [vmem:[%s2401_s10 + $0x2c] sm:$0x1]  ;;  %v700_v41 = vunpack.c.l.b16 %v420_v25  ;;  %v237_v47 = vld [vmem:[%s2401_s10 + $0x20] sm:$0xe]  ;;  %v322_v50 = vunpack.c.l.b16 %v2590_v31 }
  0x20   : > { %v238_v48 = vld [vmem:[%s2401_s10 + $0x28] sm:$0xe]  ;;  %v405_v62 = vunpack.c.l.b16 %v237_v47  ;;  %v470_v8 = vrot.slane %v468_v51, 1  ;;  %v2646_v25 = vld [vmem:[%s2401_s10 + $0x24] sm:$0x1]  ;;  %v2229_v47 = vld [vmem:[%s3072_s1 + $0x1d8] sm:$0xff] }
  0x21   : > { %2270 = vmatpush.bf16.msra.mxu1 %v2172_v23  ;;  %1382 = vmatpush.bf16.msra.mxu0 %v2172_v23  ;;  %v2561_v23 = vld [vmem:[%s2401_s10 + $0x18] sm:$0xf]  ;;  %v406_v63 = vunpack.c.l.b16 %v238_v48  ;;  %v2203_v12 = vld [vmem:[%s3072_s1 + $0x108] sm:$0xff]  ;;  %v2202_v49 = vld [vmem:[%s3072_s1 + $0x100] sm:$0xff] }
  0x22   : > { %1440 = vmatpush.bf16.msra.mxu2 %v2188_v26  ;;  %v2567_v26 = vpack.c.b16 %v316_v18, %v315_v42  ;;  %v2584_v18 = vpack.c.b16 %v444_v15, %v443_v58  ;;  %v2601_v42 = vld [vmem:[%s2401_s10 + $0x18] sm:$0xf]  ;;  %v2794_v31 = vld [vmem:[%s3072_s1 + $0x220] sm:$0xff]  ;;  %v2227_v29 = vld [vmem:[%s3072_s1 + $0x1c8] sm:$0xff] }
  0x23   : > { %1469 = vmatpush.bf16.msra.mxu3 %v2196_v30  ;;  %v2222_v30 = vld [vmem:[%s3072_s1 + $0x1a0] sm:$0xff]  ;;  %v445_v57 = vunpack.c.l.b16 %v2601_v42  ;;  %v2235_v19 = vld [vmem:[%s3072_s1 + $0x208] sm:$0xff] }
  0x24   : > { %v347_v44 = vshll.u32 %v2567_v26, 16 }
  0x25   : > { %2271 = vmatpush.bf16.msra.mxu1 %v2171_v27  ;;  %1383 = vmatpush.bf16.msra.mxu0 %v2171_v27  ;;  %v2206_v27 = vld [vmem:[%s3072_s1 + $0x120] sm:$0xff] }
  0x26   : > { %1441 = vmatpush.bf16.msra.mxu2 %v2187_v35  ;;  %v317_v35 = vunpack.c.l.b16 %v2558_v22 }
  0x27   : > { %1470 = vmatpush.bf16.msra.mxu3 %v2195_v43  ;;  %v2604_v43 = vld [vmem:[%s2401_s10 + $0x20] sm:$0xf] }
  0x28   : > { %v447_v58 = vunpack.c.l.b16 %v2604_v43  ;;  %v448_v43 = vunpack.c.l.b16 %v2646_v25  ;;  %v2673_v48 = vpack.c.b16 %v318_v56, %v317_v35  ;;  %v2217_v56 = vld [vmem:[%s3072_s1 + $0x178] sm:$0xff] }
  0x29   : > { %2272 = vmatpush.bf16.msra.mxu1 %v2170_v36  ;;  %1384 = vmatpush.bf16.msra.mxu0 %v2170_v36  ;;  %v319_v36 = vunpack.c.l.b16 %v2561_v23 }
  0x2a   : > { %1442 = vmatpush.bf16.msra.mxu2 %v2186_v40  ;;  %v694_v40 = vunpack.c.l.b16 %v419_v24  ;;  %v2643_v24 = vld [vmem:[%s2401_s10 + $0x1c] sm:$0x1] }
  0x2b   : > { %1471 = vmatpush.bf16.msra.mxu3 %v2194_v60  ;;  %v446_v42 = vunpack.c.l.b16 %v2643_v24  ;;  %v2679_v51 = vpack.c.b16 %v320_v61, %v319_v36 }
  0x2c   : > { %1395 = vmatmul.bf16.vlgmr.msra.gmra.mxu1 %v891_v52  ;;  %1385 = vmatmul.bf16.vlgmr.msra.gmra.mxu0 %v873_v55  ;;  %v475_v52 = vshll.u32 %v2584_v18, 16  ;;  %v882_v55 = vpack.c.b16 %v319_v36, %v317_v35  ;;  %v884_v60 = vpack.c.b16 %v700_v41, %v694_v40  ;;  %v2220_v41 = vld [vmem:[%s3072_s1 + $0x190] sm:$0xff] }
  0x2d   : > { %1406 = vmatpush.bf16.msrb.mxu1 %v2185_v39  ;;  %1493 = vmatpush.bf16.msrb.mxu0 %v2209_v53  ;;  %v340_v39 = vshll.u32 %v2555_v21, 16  ;;  %v2205_v53 = vld [vmem:[%s3072_s1 + $0x118] sm:$0xff]  ;;  %v2691_v35 = vld [vmem:[%s2401_s10 + $0x34] sm:$0x1]  ;;  %v2695_v36 = vpack.c.b16 %v446_v42, %v445_v57 }
  0x2e   : > { %1551 = vmatpush.bf16.msrb.mxu2 %v2225_v54  ;;  %1472 = vmatmul.bf16.vlgmr.msra.gmra.mxu3 %v876_v6  ;;  %v900_v54 = vpack.c.b16 %v327_v34, %v325_v33  ;;  %v2180_v6 = vld [vmem:[%s3072_s1 + $0x50] sm:$0xff] }
  0x2f   : > { %1443 = vmatmul.bf16.vlgmr.msra.gmra.mxu2 %v875_v59  ;;  %1580 = vmatpush.bf16.msrb.mxu3 %v2233_v1  ;;  %v324_v59 = vunpack.c.l.b16 %v2593_v32  ;;  %v342_v1 = vrot.slane %v340_v39, 1  ;;  %v471_v39 = vor.u32 %v470_v8, %v466_v7  ;;  %v2216_v8 = vld [vmem:[%s3072_s1 + $0x170] sm:$0xff] }
  0x31   : > { %1407 = vmatpush.bf16.msrb.mxu1 %v2184_v0  ;;  %1494 = vmatpush.bf16.msrb.mxu0 %v2208_v2  ;;  %v338_v0 = vshrl.u32 %v2555_v21, 16  ;;  %v345_v2 = vshrl.u32 %v2567_v26, 16  ;;  %v2221_v21 = vld [vmem:[%s3072_s1 + $0x198] sm:$0xff]  ;;  %v413_v26 = vpack.c.b16 %v322_v50, %v405_v62  ;;  %v683_v61 = vunpack.c.l.b16 %v471_v39 }
  0x32   : > { %1552 = vmatpush.bf16.msrb.mxu2 %v2224_v3  ;;  %v349_v3 = vrot.slane %v347_v44, 1 }
  0x33   : > { %1581 = vmatpush.bf16.msrb.mxu3 %v2232_v10  ;;  %v477_v10 = vrot.slane %v475_v52, 1  ;;  %v421_v44 = vrot.slane %v413_v26, 1  ;;  %v2178_v52 = vld [vmem:[%s3072_s1 + $0x40] sm:$0xff] }
  0x35   : > { %1408 = vmatpush.bf16.msrb.mxu1 %v2183_v9  ;;  %1495 = vmatpush.bf16.msrb.mxu0 %v2207_v13  ;;  %v473_v9 = vshrl.u32 %v2584_v18, 16  ;;  %v2204_v13 = vld [vmem:[%s3072_s1 + $0x110] sm:$0xff]  ;;  %v343_v18 = vor.u32 %v342_v1, %v338_v0 }
  0x36   : > { %1553 = vmatpush.bf16.msrb.mxu2 %v2223_v16  ;;  %v885_v16 = vpack.c.b16 %v447_v58, %v445_v57  ;;  %v2713_v0 = vld [vmem:[%s2401_s10 + $0x30] sm:$0xf]  ;;  %v354_v57 = vshll.u32 %v2673_v48, 16 }
  0x37   : > { %1582 = vmatpush.bf16.msrb.mxu3 %v2231_v17  ;;  %v2179_v17 = vld [vmem:[%s3072_s1 + $0x48] sm:$0xff]  ;;  %v478_v40 = vor.u32 %v477_v10, %v473_v9  ;;  %v681_v22 = vunpack.c.l.b16 %v343_v18  ;;  %v239_v1 = vld [vmem:[%s2401_s10 + $0x30] sm:$0xe]  ;;  %v451_v10 = vunpack.c.l.b16 %v2713_v0  ;;  %v2775_v0 = vpack.c.b16 %v322_v50, %v321_v37  ;;  %v2789_v37 = vld [vmem:[%s2401_s10 + $0x1c] sm:$0x1] }
  0x38   : > { %v356_v18 = vrot.slane %v354_v57, 1  ;;  %v1847_v57 = vld [vmem:[%s2401_s10 + $0x8] sm:$0xe]  ;;  %v2808_v50 = vld [vmem:[%s2401_s10 + $0x10] sm:$0xf] }
  0x39   : > { %1409 = vmatpush.bf16.msrb.mxu1 %v2182_v11  ;;  %1496 = vmatpush.bf16.msrb.mxu0 %v2206_v27  ;;  %v414_v11 = vpack.c.b16 %v324_v59, %v406_v63  ;;  %v2230_v27 = vld [vmem:[%s3072_s1 + $0x1e0] sm:$0xff]  ;;  %v689_v23 = vunpack.c.l.b16 %v478_v40  ;;  %v2710_v63 = vld [vmem:[%s2401_s10 + $0x28] sm:$0xf] }
  0x3a   : > { %1554 = vmatpush.bf16.msrb.mxu2 %v2222_v30  ;;  %v350_v30 = vor.u32 %v349_v3, %v345_v2  ;;  %v240_v2 = vld [vmem:[%s2401_s10 + $0x38] sm:$0xe]  ;;  %v326_v3 = vunpack.c.l.b16 %v2691_v35  ;;  %v449_v9 = vunpack.c.l.b16 %v2710_v63  ;;  %v2215_v40 = vld [vmem:[%s3072_s1 + $0x168] sm:$0xff]  ;;  %v2214_v63 = vld [vmem:[%s3072_s1 + $0x160] sm:$0xff] }
  0x3b   : > { %1583 = vmatpush.bf16.msrb.mxu3 %v2230_v27  ;;  %v877_v7 = vpack.c.b16 %v689_v23, %v683_v61  ;;  %v2732_v27 = vld [vmem:[%s3072_s1 + $0x230] sm:$0xff] }
  0x3c   : > { %1400 = vmatmul.bf16.gmra.mxu1 %v900_v54  ;;  %1390 = vmatmul.bf16.gmra.mxu0 %v882_v55  ;;  %v687_v46 = vunpack.c.l.b16 %v350_v30  ;;  %v2704_v54 = vld [vmem:[%s3072_s1 + $0x238] sm:$0xff]  ;;  %v359_v30 = vshrl.u32 %v2679_v51, 16 }
  0x3d   : > { %1410 = vmatpush.bf16.msrb.mxu1 %v2181_v45  ;;  %1497 = vmatpush.bf16.msrb.mxu0 %v2205_v53  ;;  %v422_v45 = vrot.slane %v414_v11, 1  ;;  %v2699_v53 = vpack.c.b16 %v448_v43, %v447_v58  ;;  %v2707_v55 = vld [vmem:[%s2401_s10 + $0x3c] sm:$0x1]  ;;  %v361_v58 = vshll.u32 %v2679_v51, 16  ;;  %v407_v11 = vunpack.c.l.b16 %v239_v1 }
  0x3e   : > { %1555 = vmatpush.bf16.msrb.mxu2 %v2221_v21  ;;  %1477 = vmatmul.bf16.gmra.mxu3 %v885_v16  ;;  %v328_v21 = vunpack.c.l.b16 %v2707_v55 }
  0x3f   : > { %1448 = vmatmul.bf16.gmra.mxu2 %v884_v60  ;;  %v706_v60 = vunpack.c.l.b16 %v421_v44  ;;  %v712_v62 = vunpack.c.l.b16 %v422_v45  ;;  %1584 = vmatpush.bf16.msrb.mxu3 %v2229_v47  ;;  %v489_v16 = vshll.u32 %v2699_v53, 16  ;;  %v363_v39 = vrot.slane %v361_v58, 1  ;;  %v2743_v44 = vld [vmem:[%s2401_s10 + $0x34] sm:$0x1]  ;;  %v2219_v47 = vld [vmem:[%s3072_s1 + $0x188] sm:$0xff] }
  0x40   : > { %v480_v45 = vshrl.u32 %v2695_v36, 16  ;;  %v452_v23 = vunpack.c.l.b16 %v2743_v44 }
  0x41   : > { %1411 = vmatpush.bf16.msrb.mxu1 %v2180_v6  ;;  %1498 = vmatpush.bf16.msrb.mxu0 %v2204_v13  ;;  %v874_v6 = vpack.c.b16 %v687_v46, %v681_v22  ;;  %v482_v13 = vshll.u32 %v2695_v36, 16  ;;  %v893_v26 = vpack.c.b16 %v712_v62, %v706_v60  ;;  %v491_v22 = vrot.slane %v489_v16, 1  ;;  %v2218_v36 = vld [vmem:[%s3072_s1 + $0x180] sm:$0xff] }
  0x42   : > { %1556 = vmatpush.bf16.msrb.mxu2 %v2220_v41  ;;  %v2740_v41 = vld [vmem:[%s2401_s10 + $0x2c] sm:$0x1]  ;;  %v415_v46 = vpack.c.b16 %v326_v3, %v407_v11  ;;  %v364_v62 = vor.u32 %v363_v39, %v359_v30  ;;  %v2805_v32 = vpack.c.b16 %v452_v23, %v451_v10 }
  0x43   : > { %v484_v51 = vrot.slane %v482_v13, 1  ;;  %v450_v61 = vunpack.c.l.b16 %v2740_v41 }
  0x44   : > { %v699_v16 = vunpack.c.l.b16 %v364_v62 }
  0x45   : > { %1412 = vmatpush.bf16.msrb.mxu1 %v2179_v17  ;;  %1499 = vmatpush.bf16.msrb.mxu0 %v2203_v12  ;;  %v408_v17 = vunpack.c.l.b16 %v240_v2  ;;  %v352_v12 = vshrl.u32 %v2673_v48, 16  ;;  %v894_v48 = vpack.c.b16 %v451_v10, %v449_v9  ;;  %v485_v58 = vor.u32 %v484_v51, %v480_v45  ;;  %v2779_v2 = vld [vmem:[%s2401_s10 + $0x14] sm:$0x1]  ;;  %v2823_v45 = vld [vmem:[%s2401_s10 + $0x38] sm:$0xf] }
  0x46   : > { %1557 = vmatpush.bf16.msrb.mxu2 %v2219_v47  ;;  %v570_v11 = vunpack.c.l.b16 %v2779_v2  ;;  %v2826_v47 = vld [vmem:[%s2401_s10 + $0x40] sm:$0xf]  ;;  %v453_v4 = vunpack.c.l.b16 %v2823_v45 }
  0x47   : > { %v357_v60 = vor.u32 %v356_v18, %v352_v12  ;;  %v695_v10 = vunpack.c.l.b16 %v485_v58  ;;  %v368_v12 = vshll.u32 %v2775_v0, 16  ;;  %v572_v18 = vunpack.c.l.b16 %v2789_v37 }
  0x49   : > { %1413 = vmatpush.bf16.msrb.mxu1 %v2178_v52  ;;  %1500 = vmatpush.bf16.msrb.mxu0 %v2202_v49  ;;  %v487_v52 = vshrl.u32 %v2699_v53, 16  ;;  %v2758_v49 = vld [vmem:[%s3072_s1 + $0x228] sm:$0xff]  ;;  %v2228_v53 = vld [vmem:[%s3072_s1 + $0x1d0] sm:$0xff]  ;;  %v693_v13 = vunpack.c.l.b16 %v357_v60 }
  0x4a   : > { %1585 = vmatpush.bf16.msrb.mxu3 %v2228_v53  ;;  %1558 = vmatpush.bf16.msrb.mxu2 %v2218_v36  ;;  %v366_v36 = vshrl.u32 %v2775_v0, 16  ;;  %v2212_v53 = vld [vmem:[%s3072_s1 + $0x150] sm:$0xff] }
  0x4b   : > { %v492_v1 = vor.u32 %v491_v22, %v487_v52  ;;  %v503_v52 = vshll.u32 %v2805_v32, 16 }
  0x4c   : > { %1414 = vmatmul.bf16.vlgmr.msrb.gmra.mxu1 %v874_v6  ;;  %1501 = vmatmul.bf16.vlgmr.msrb.gmra.mxu0 %v877_v7  ;;  %v2785_v6 = vpack.c.b16 %v324_v59, %v323_v38  ;;  %v423_v7 = vrot.slane %v415_v46, 1  ;;  %v2801_v38 = vpack.c.b16 %v450_v61, %v449_v9  ;;  %v1848_v59 = vld [vmem:[%s2401_s10 + $0x10] sm:$0xe]  ;;  %v2815_v9 = vld [vmem:[%s2401_s10 + $0x18] sm:$0xf] }
  0x4d   : > { %1522 = vmatpush.bf16.msra.mxu1 %v2217_v56  ;;  %1609 = vmatpush.bf16.msra.mxu0 %v2704_v54  ;;  %v416_v56 = vpack.c.b16 %v328_v21, %v408_v17  ;;  %v701_v17 = vunpack.c.l.b16 %v492_v1  ;;  %v571_v22 = vunpack.c.l.b16 %v2815_v9 }
  0x4e   : > { %1482 = vmatmul.bf16.gmra.mxu3 %v894_v48  ;;  %2273 = vmatpush.bf16.msra.mxu2 %v2704_v54  ;;  %v718_v30 = vunpack.c.l.b16 %v423_v7  ;;  %v569_v48 = vunpack.c.l.b16 %v2808_v50  ;;  %v530_v54 = vunpack.c.l.b16 %v1848_v59  ;;  %v496_v51 = vshll.u32 %v2801_v38, 16  ;;  %v2854_v59 = vld [vmem:[%s2401_s10 + $0x3c] sm:$0x1]  ;;  %v2234_v50 = vld [vmem:[%s3072_s1 + $0x200] sm:$0xff] }
  0x4f   : > { %1453 = vmatmul.bf16.gmra.mxu2 %v893_v26  ;;  %v424_v28 = vrot.slane %v416_v56, 1  ;;  %v2213_v26 = vld [vmem:[%s3072_s1 + $0x158] sm:$0xff]  ;;  %1586 = vmatpush.bf16.msrb.mxu3 %v2227_v29  ;;  %v883_v56 = vpack.c.b16 %v699_v16, %v693_v13  ;;  %v886_v62 = vpack.c.b16 %v701_v17, %v695_v10  ;;  %v373_v58 = vshrl.u32 %v2785_v6, 16 }
  0x50   : > { %v585_v60 = vpack.c.b16 %v570_v11, %v569_v48  ;;  %v494_v7 = vshrl.u32 %v2801_v38, 16  ;;  %v505_v29 = vrot.slane %v503_v52, 1  ;;  %v538_v16 = vpack.c.b16 %v444_v15, %v530_v54  ;;  %v2211_v38 = vld [vmem:[%s3072_s1 + $0x148] sm:$0xff]  ;;  %v2210_v54 = vld [vmem:[%s3072_s1 + $0x140] sm:$0xff] }
  0x51   : > { %1523 = vmatpush.bf16.msra.mxu1 %v2216_v8  ;;  %1610 = vmatpush.bf16.msra.mxu0 %v2732_v27  ;;  %v529_v8 = vunpack.c.l.b16 %v1847_v57  ;;  %v724_v39 = vunpack.c.l.b16 %v424_v28  ;;  %v370_v57 = vrot.slane %v368_v12, 1  ;;  %v498_v28 = vrot.slane %v496_v51, 1 }
  0x52   : > { %2274 = vmatpush.bf16.msra.mxu2 %v2732_v27  ;;  %v501_v27 = vshrl.u32 %v2805_v32, 16  ;;  %v596_v13 = vshll.u32 %v585_v60, 16  ;;  %v2237_v32 = vld [vmem:[%s3072_s1 + $0x218] sm:$0xff]  ;;  %v594_v45 = vshrl.u32 %v585_v60, 16  ;;  %v2891_v60 = vld [vmem:[%s2401_s10 + $0x24] sm:$0x1] }
  0x53   : > { %v537_v46 = vpack.c.b16 %v442_v14, %v529_v8  ;;  %v455_v14 = vunpack.c.l.b16 %v2826_v47  ;;  %v902_v0 = vpack.c.b16 %v724_v39, %v718_v30  ;;  %v2857_v8 = vld [vmem:[%s2401_s10 + $0x44] sm:$0x1]  ;;  %v499_v17 = vor.u32 %v498_v28, %v494_v7  ;;  %v2236_v30 = vld [vmem:[%s3072_s1 + $0x210] sm:$0xff] }
  0x54   : > { %v506_v12 = vor.u32 %v505_v29, %v501_v27  ;;  %v454_v39 = vunpack.c.l.b16 %v2854_v59  ;;  %v598_v47 = vrot.slane %v596_v13, 1 }
  0x55   : > { %1524 = vmatpush.bf16.msra.mxu1 %v2215_v40  ;;  %1611 = vmatpush.bf16.msra.mxu0 %v2758_v49  ;;  %v375_v40 = vshll.u32 %v2785_v6, 16  ;;  %v903_v6 = vpack.c.b16 %v455_v14, %v453_v4  ;;  %v545_v5 = vrot.slane %v537_v46, 1  ;;  %v546_v46 = vrot.slane %v538_v16, 1 }
  0x56   : > { %2275 = vmatpush.bf16.msra.mxu2 %v2758_v49  ;;  %v371_v49 = vor.u32 %v370_v57, %v366_v36  ;;  %v335_v36 = vpack.c.b16 %v326_v3, %v325_v33  ;;  %v463_v20 = vpack.c.b16 %v454_v39, %v453_v4  ;;  %v599_v55 = vor.u32 %v598_v47, %v594_v45  ;;  %v2906_v3 = vld [vmem:[%s2401_s10 + $0x20] sm:$0xf] }
  0x57   : > { %v377_v1 = vrot.slane %v375_v40, 1  ;;  %v456_v40 = vunpack.c.l.b16 %v2857_v8  ;;  %v2899_v35 = vunpack.c.l.b16 %v546_v46 }
  0x58   : > { %v382_v4 = vshll.u32 %v335_v36, 16  ;;  %v510_v16 = vshll.u32 %v463_v20, 16 }
  0x59   : > { %1525 = vmatpush.bf16.msra.mxu1 %v2214_v63  ;;  %1612 = vmatpush.bf16.msra.mxu0 %v2794_v31  ;;  %v586_v63 = vpack.c.b16 %v572_v18, %v571_v22  ;;  %v378_v15 = vor.u32 %v377_v1, %v373_v58  ;;  %v464_v33 = vpack.c.b16 %v456_v40, %v455_v14  ;;  %v574_v58 = vunpack.c.l.b16 %v2891_v60 }
  0x5a   : > { %2276 = vmatpush.bf16.msra.mxu2 %v2794_v31  ;;  %v2894_v31 = vld [vmem:[%s2401_s10 + $0x2c] sm:$0x1]  ;;  %v573_v14 = vunpack.c.l.b16 %v2906_v3  ;;  %v512_v45 = vrot.slane %v510_v16, 1  ;;  %v1871_v16 = vld [vmem:[%s2401_s10 + $0x10] sm:$0xe] }
  0x5b   : > { %v603_v10 = vshll.u32 %v586_v63, 16  ;;  %v601_v51 = vshrl.u32 %v586_v63, 16  ;;  %v711_v63 = vunpack.c.l.b16 %v378_v15  ;;  %v576_v1 = vunpack.c.l.b16 %v2894_v31 }
  0x5c   : > { %1419 = vmatmul.bf16.gmra.mxu1 %v883_v56  ;;  %1506 = vmatmul.bf16.gmra.mxu0 %v886_v62  ;;  %v2880_v56 = vunpack.c.l.b16 %v545_v5  ;;  %v705_v62 = vunpack.c.l.b16 %v371_v49  ;;  %v879_v49 = vpack.c.b16 %v571_v22, %v569_v48  ;;  %v380_v5 = vshrl.u32 %v335_v36, 16 }
  0x5d   : > { %1526 = vmatpush.bf16.msra.mxu1 %v2213_v26  ;;  %v2226_v26 = vld [vmem:[%s3072_s1 + $0x1c0] sm:$0xff]  ;;  %1613 = vmatpush.bf16.msra.mxu0 %v2237_v32  ;;  %v605_v52 = vrot.slane %v603_v10, 1  ;;  %v384_v15 = vrot.slane %v382_v4, 1  ;;  %v515_v47 = vshrl.u32 %v464_v33, 16  ;;  %v1859_v4 = vld [vmem:[%s2401_s10 + $0x30] sm:$0xf] }
  0x5e   : > { %1587 = vmatpush.bf16.msrb.mxu3 %v2226_v26  ;;  %2277 = vmatpush.bf16.msra.mxu2 %v2237_v32  ;;  %v878_v7 = vpack.c.b16 %v2899_v35, %v2880_v56  ;;  %v892_v29 = vpack.c.b16 %v711_v63, %v705_v62  ;;  %v587_v26 = vpack.c.b16 %v574_v58, %v573_v14 }
  0x5f   : > { %1458 = vmatmul.bf16.gmra.mxu2 %v902_v0  ;;  %1487 = vmatmul.bf16.gmra.mxu3 %v903_v6  ;;  %v707_v0 = vunpack.c.l.b16 %v499_v17  ;;  %v606_v57 = vor.u32 %v605_v52, %v601_v51  ;;  %v517_v6 = vshll.u32 %v464_v33, 16  ;;  %v385_v22 = vor.u32 %v384_v15, %v380_v5 }
  0x60   : > { %v610_v9 = vshll.u32 %v587_v26, 16  ;;  %v657_v15 = vunpack.c.l.b16 %v1871_v16 }
  0x61   : > { %1527 = vmatpush.bf16.msra.mxu1 %v2212_v53  ;;  %v336_v53 = vpack.c.b16 %v328_v21, %v327_v34  ;;  %1614 = vmatpush.bf16.msra.mxu0 %v2236_v30  ;;  %v713_v34 = vunpack.c.l.b16 %v506_v12  ;;  %v2909_v21 = vld [vmem:[%s2401_s10 + $0x28] sm:$0xf]  ;;  %v691_v32 = vunpack.c.l.b16 %v606_v57  ;;  %v717_v33 = vunpack.c.l.b16 %v385_v22 }
  0x62   : > { %v575_v27 = vunpack.c.l.b16 %v2909_v21  ;;  %2278 = vmatpush.bf16.msra.mxu2 %v2236_v30  ;;  %v508_v30 = vshrl.u32 %v463_v20, 16  ;;  %v612_v62 = vrot.slane %v610_v9, 1  ;;  %v2936_v20 = vld [vmem:[%s2401_s10 + $0x3c] sm:$0x1] }
  0x63   : > { %v389_v28 = vshll.u32 %v336_v53, 16  ;;  %v895_v13 = vpack.c.b16 %v713_v34, %v707_v0  ;;  %v387_v17 = vshrl.u32 %v336_v53, 16  ;;  %v608_v53 = vshrl.u32 %v587_v26, 16 }
  0x64   : > { %v588_v10 = vpack.c.b16 %v576_v1, %v575_v27  ;;  %v513_v46 = vor.u32 %v512_v45, %v508_v30  ;;  %v577_v26 = vunpack.c.l.b16 %v1859_v4 }
  0x65   : > { %1528 = vmatpush.bf16.msra.mxu1 %v2211_v38  ;;  %1615 = vmatpush.bf16.msra.mxu0 %v2235_v19  ;;  %v685_v38 = vunpack.c.l.b16 %v599_v55  ;;  %v391_v12 = vrot.slane %v389_v28, 1  ;;  %v1860_v28 = vld [vmem:[%s2401_s10 + $0x38] sm:$0xf] }
  0x66   : > { %2279 = vmatpush.bf16.msra.mxu2 %v2235_v19  ;;  %v617_v48 = vshll.u32 %v588_v10, 16  ;;  %v615_v63 = vshrl.u32 %v588_v10, 16  ;;  %v2933_v19 = vld [vmem:[%s2401_s10 + $0x34] sm:$0x1]  ;;  %v719_v55 = vunpack.c.l.b16 %v513_v46  ;;  %v579_v10 = vunpack.c.l.b16 %v1860_v28 }
  0x67   : > { %v880_v51 = vpack.c.b16 %v691_v32, %v685_v38  ;;  %v392_v52 = vor.u32 %v391_v12, %v387_v17  ;;  %v578_v38 = vunpack.c.l.b16 %v2933_v19  ;;  %v580_v32 = vunpack.c.l.b16 %v2936_v20 }
  0x68   : > { %v619_v0 = vrot.slane %v617_v48, 1 }
  0x69   : > { %1529 = vmatpush.bf16.msra.mxu1 %v2210_v54  ;;  %v519_v54 = vrot.slane %v517_v6, 1  ;;  %1616 = vmatpush.bf16.msra.mxu0 %v2234_v50  ;;  %v723_v34 = vunpack.c.l.b16 %v392_v52  ;;  %v1872_v6 = vld [vmem:[%s2401_s10 + $0x18] sm:$0xe]  ;;  %v589_v45 = vpack.c.b16 %v578_v38, %v577_v26 }
  0x6a   : > { %2280 = vmatpush.bf16.msra.mxu2 %v2234_v50  ;;  %v658_v17 = vunpack.c.l.b16 %v1872_v6 }
  0x6b   : > { %v520_v36 = vor.u32 %v519_v54, %v515_v47  ;;  %v590_v47 = vpack.c.b16 %v580_v32, %v579_v10  ;;  %v888_v54 = vpack.c.b16 %v575_v27, %v573_v14  ;;  %v624_v48 = vshll.u32 %v589_v45, 16  ;;  %v2960_v27 = vld [vmem:[%s2401_s10 + $0x4c] sm:$0x1] }
  0x6c   : > { %1424 = vmatmul.bf16.gmra.mxu1 %v892_v29  ;;  %1511 = vmatmul.bf16.gmra.mxu0 %v895_v13  ;;  %v613_v29 = vor.u32 %v612_v62, %v608_v53  ;;  %v620_v13 = vor.u32 %v619_v0, %v615_v63  ;;  %v666_v50 = vpack.c.b16 %v572_v18, %v658_v17  ;;  %v622_v2 = vshrl.u32 %v589_v45, 16  ;;  %v2957_v18 = vld [vmem:[%s2401_s10 + $0x44] sm:$0x1]  ;;  %v2964_v53 = vld [vmem:[%s2401_s10 + $0x40] sm:$0xf] }
  0x6d   : > { %v725_v57 = vunpack.c.l.b16 %v520_v36  ;;  %v631_v22 = vshll.u32 %v590_v47, 16  ;;  %v629_v37 = vshrl.u32 %v590_v47, 16  ;;  %v1849_v36 = vld [vmem:[%s2401_s10 + $0x18] sm:$0xe]  ;;  %v1862_v62 = vld [vmem:[%s2401_s10 + $0x48] sm:$0xf]  ;;  %v584_v4 = vunpack.c.l.b16 %v2960_v27 }
  0x6e   : > { %v697_v12 = vunpack.c.l.b16 %v613_v29  ;;  %v703_v30 = vunpack.c.l.b16 %v620_v13  ;;  %v674_v21 = vrot.slane %v666_v50, 1  ;;  %v1850_v63 = vld [vmem:[%s2401_s10 + $0x20] sm:$0xe]  ;;  %v531_v28 = vunpack.c.l.b16 %v1849_v36 }
  0x6f   : > { %1559 = vmatmul.bf16.vlgmr.msrb.gmra.mxu2 %v879_v49  ;;  %1588 = vmatmul.bf16.vlgmr.msrb.gmra.mxu3 %v880_v51  ;;  %v901_v49 = vpack.c.b16 %v723_v34, %v717_v33  ;;  %v904_v5 = vpack.c.b16 %v725_v57, %v719_v55  ;;  %v665_v51 = vpack.c.b16 %v570_v11, %v657_v15  ;;  %v626_v11 = vrot.slane %v624_v48, 1  ;;  %v1873_v34 = vld [vmem:[%s2401_s10 + $0x20] sm:$0xe]  ;;  %v1874_v55 = vld [vmem:[%s2401_s10 + $0x28] sm:$0xe] }
  0x70   : > { %v889_v9 = vpack.c.b16 %v703_v30, %v697_v12  ;;  %v633_v14 = vrot.slane %v631_v22, 1  ;;  %v692_v46 = vunpack.c.l.b16 %v674_v21  ;;  %v582_v57 = vunpack.c.l.b16 %v2957_v18  ;;  %v1851_v22 = vld [vmem:[%s2401_s10 + $0x28] sm:$0xe] }
  0x71   : > { %v673_v3 = vrot.slane %v665_v51, 1  ;;  %v627_v0 = vor.u32 %v626_v11, %v622_v2  ;;  %v581_v29 = vunpack.c.l.b16 %v2964_v53  ;;  %v583_v13 = vunpack.c.l.b16 %v1862_v62  ;;  %v1875_v11 = vld [vmem:[%s2401_s10 + $0x30] sm:$0xe] }
  0x72   : > { %v634_v33 = vor.u32 %v633_v14, %v629_v37  ;;  %v532_v6 = vunpack.c.l.b16 %v1850_v63  ;;  %v897_v45 = vpack.c.b16 %v579_v10, %v577_v26  ;;  %v539_v47 = vpack.c.b16 %v446_v42, %v531_v28  ;;  %v1876_v37 = vld [vmem:[%s2401_s10 + $0x38] sm:$0xe]  ;;  %v1877_v14 = vld [vmem:[%s2401_s10 + $0x40] sm:$0xe] }
  0x73   : > { %v686_v52 = vunpack.c.l.b16 %v673_v3  ;;  %v709_v15 = vunpack.c.l.b16 %v627_v0  ;;  %v591_v12 = vpack.c.b16 %v582_v57, %v581_v29  ;;  %v592_v30 = vpack.c.b16 %v584_v4, %v583_v13  ;;  %v1852_v3 = vld [vmem:[%s2401_s10 + $0x30] sm:$0xe] }
  0x74   : > { %v715_v17 = vunpack.c.l.b16 %v634_v33  ;;  %v547_v24 = vrot.slane %v539_v47, 1  ;;  %v533_v53 = vunpack.c.l.b16 %v1851_v22  ;;  %v534_v62 = vunpack.c.l.b16 %v1852_v3  ;;  %v1854_v47 = vld [vmem:[%s2401_s10 + $0x40] sm:$0xe] }
  0x75   : > { %v881_v16 = vpack.c.b16 %v692_v46, %v686_v52  ;;  %v638_v48 = vshll.u32 %v591_v12, 16  ;;  %v645_v26 = vshll.u32 %v592_v30, 16  ;;  %v636_v60 = vshrl.u32 %v591_v12, 16  ;;  %v1878_v52 = vld [vmem:[%s2401_s10 + $0x48] sm:$0xe] }
  0x76   : > { %v643_v56 = vshrl.u32 %v592_v30, 16  ;;  %v661_v33 = vunpack.c.l.b16 %v1875_v11  ;;  %v664_v28 = vunpack.c.l.b16 %v1878_v52 }
  0x77   : > { %v640_v31 = vrot.slane %v638_v48, 1  ;;  %v647_v35 = vrot.slane %v645_v26, 1 }
  0x78   : > { %v672_v41 = vpack.c.b16 %v584_v4, %v664_v28 }
  0x79   : > { %v641_v21 = vor.u32 %v640_v31, %v636_v60  ;;  %v648_v2 = vor.u32 %v647_v35, %v643_v56 }
  0x7a   : > { %v680_v19 = vrot.slane %v672_v41, 1 }
  0x7b   : > { %v721_v63 = vunpack.c.l.b16 %v641_v21  ;;  %v727_v0 = vunpack.c.l.b16 %v648_v2 }
  0x7c   : > { %1429 = vmatmul.bf16.gmra.mxu1 %v901_v49  ;;  %1516 = vmatmul.bf16.gmra.mxu0 %v904_v5  ;;  %v659_v49 = vunpack.c.l.b16 %v1873_v34  ;;  %v660_v5 = vunpack.c.l.b16 %v1874_v55  ;;  %v662_v34 = vunpack.c.l.b16 %v1876_v37  ;;  %v663_v55 = vunpack.c.l.b16 %v1877_v14 }
  0x7d   : > { %v728_v18 = vunpack.c.l.b16 %v680_v19 }
  0x7e   : > { %v667_v51 = vpack.c.b16 %v574_v58, %v659_v49  ;;  %v668_v50 = vpack.c.b16 %v576_v1, %v660_v5  ;;  %v696_v58 = vunpack.c.l.b16 %v547_v24  ;;  %v542_v49 = vpack.c.b16 %v452_v23, %v534_v62 }
  0x7f   : > { %1564 = vmatmul.bf16.gmra.mxu2 %v888_v54  ;;  %1593 = vmatmul.bf16.gmra.mxu3 %v889_v9  ;;  %v540_v54 = vpack.c.b16 %v448_v43, %v532_v6  ;;  %v898_v9 = vpack.c.b16 %v715_v17, %v709_v15  ;;  %v541_v6 = vpack.c.b16 %v450_v61, %v533_v53 }
  0x80   : > { %v675_v42 = vrot.slane %v667_v51, 1  ;;  %v676_v43 = vrot.slane %v668_v50, 1  ;;  %v907_v5 = vpack.c.b16 %v727_v0, %v721_v63  ;;  %v669_v15 = vpack.c.b16 %v578_v38, %v661_v33 }
  0x81   : > { %v548_v25 = vrot.slane %v540_v54, 1  ;;  %v670_v17 = vpack.c.b16 %v580_v32, %v662_v34  ;;  %v671_v12 = vpack.c.b16 %v582_v57, %v663_v55  ;;  %v549_v44 = vrot.slane %v541_v6, 1  ;;  %v1853_v57 = vld [vmem:[%s2401_s10 + $0x38] sm:$0xe]  ;;  %s2169_s10 = sshll.u32 %s3080_s12, 5 }
  0x82   : > { %v704_v10 = vunpack.c.l.b16 %v676_v43  ;;  %v550_v61 = vrot.slane %v542_v49, 1  ;;  %v677_v23 = vrot.slane %v669_v15, 1  ;;  %v535_v4 = vunpack.c.l.b16 %v1853_v57  ;;  %s3041_s6 = scalar_lea.vmem %s3073_s2, %s2169_s10 }
  0x83   : > { %v702_v1 = vunpack.c.l.b16 %v548_v25  ;;  %v708_v38 = vunpack.c.l.b16 %v549_v44  ;;  %v536_v51 = vunpack.c.l.b16 %v1854_v47 }
  0x84   : > { %v714_v30 = vunpack.c.l.b16 %v550_v61  ;;  %v710_v20 = vunpack.c.l.b16 %v677_v23  ;;  %v543_v26 = vpack.c.b16 %v454_v39, %v535_v4 }
  0x85   : > { %v887_v46 = vpack.c.b16 %v702_v1, %v696_v58  ;;  %v544_v24 = vpack.c.b16 %v456_v40, %v536_v51 }
  0x86   : > { %v896_v27 = vpack.c.b16 %v714_v30, %v708_v38 }
  0x87   : > { %v552_v43 = vrot.slane %v544_v24, 1 }
  0x89   : > { %v726_v58 = vunpack.c.l.b16 %v552_v43 }
  0x8c   : > { %1530 = vmatmul.bf16.vlgmr.msra.gmra.mxu1 %v878_v7  ;;  %1617 = vmatmul.bf16.vlgmr.msra.gmra.mxu0 %v881_v16  ;;  %v698_v7 = vunpack.c.l.b16 %v675_v42  ;;  %v906_v16 = vpack.c.b16 %v583_v13, %v581_v29  ;;  %v678_v29 = vrot.slane %v670_v17, 1  ;;  %v679_v13 = vrot.slane %v671_v12, 1 }
  0x8d   : > { %v551_v42 = vrot.slane %v543_v26, 1 }
  0x8e   : > { %v890_v36 = vpack.c.b16 %v704_v10, %v698_v7  ;;  %v716_v32 = vunpack.c.l.b16 %v678_v29 }
  0x8f   : > { %1569 = vmatmul.bf16.gmra.mxu2 %v897_v45  ;;  %1598 = vmatmul.bf16.gmra.mxu3 %v898_v9  ;;  %v722_v45 = vunpack.c.l.b16 %v679_v13  ;;  %v720_v35 = vunpack.c.l.b16 %v551_v42 }
  0x90   : > { %v899_v54 = vpack.c.b16 %v716_v32, %v710_v20 }
  0x91   : > { %v908_v48 = vpack.c.b16 %v728_v18, %v722_v45  ;;  %v905_v1 = vpack.c.b16 %v726_v58, %v720_v35 }
  0x9c   : > { %1535 = vmatmul.bf16.gmra.mxu1 %v887_v46  ;;  %1622 = vmatmul.bf16.gmra.mxu0 %v890_v36 }
  0x9f   : > { %1574 = vmatmul.bf16.gmra.mxu2 %v906_v16  ;;  %1603 = vmatmul.bf16.gmra.mxu3 %v907_v5 }
  0xa9   : > { %v1396_v50 = vpop.f32.mrf.mxu1  ;;  %v1386_v9 = vpop.f32.mrf.mxu0 }
  0xac   : > { %1540 = vmatmul.bf16.gmra.mxu1 %v896_v27  ;;  %1627 = vmatmul.bf16.gmra.mxu0 %v899_v54 }
  0xaf   : > { %1632 = vmatmul.bf16.vlgmr.msra.gmra.mxu2 %v908_v48 }
  0xb1   : > { %v1398_v60 = vpop.f32.mrf.mxu1  ;;  %v1388_v31 = vpop.f32.mrf.mxu0 }
  0xb2   : > { %v1444_v25 = vpop.f32.mrf.mxu2  ;;  %v1473_v56 = vpop.f32.mrf.mxu3 }
  0xb9   : > { %v1401_v10 = vpop.f32.mrf.mxu1  ;;  %v1391_v22 = vpop.f32.mrf.mxu0 }
  0xba   : > { %v1446_v7 = vpop.f32.mrf.mxu2  ;;  %v3012_v3 = vpop.f32.mrf.mxu3 }
  0xbc   : > { %1545 = vmatmul.bf16.gmra.mxu1 %v905_v1 }
  0xc1   : > { %v1403_v39 = vpop.f32.mrf.mxu1  ;;  %v1393_v8 = vpop.f32.mrf.mxu0 }
  0xc2   : > { %v1449_v59 = vpop.f32.mrf.mxu2  ;;  %v1478_v40 = vpop.f32.mrf.mxu3 }
  0xc9   : > { %v1415_v2 = vpop.f32.mrf.mxu1  ;;  %v1502_v11 = vpop.f32.mrf.mxu0 }
  0xca   : > { %v1451_v21 = vpop.f32.mrf.mxu2  ;;  %v1416_v37 = vadd.f32 %v1415_v2, %v1386_v9  ;;  %v3014_v52 = vpop.f32.mrf.mxu3 }
  0xcc   : > { %v1445_v14 = vadd.f32 %v1444_v25, %v1416_v37 }
  0xce   : > { %v1474_v46 = vadd.f32 %v1473_v56, %v1445_v14 }
  0xd0   : > { %v1503_v36 = vadd.f32 %v1502_v11, %v1474_v46 }
  0xd1   : > { %v1417_v62 = vpop.f32.mrf.mxu1  ;;  %v1504_v63 = vpop.f32.mrf.mxu0 }
  0xd2   : > { %v1454_v53 = vpop.f32.mrf.mxu2  ;;  %v1418_v0 = vadd.f32 %v1417_v62, %v1388_v31  ;;  %v1483_v34 = vpop.f32.mrf.mxu3 }
  0xd4   : > { %v1447_v33 = vadd.f32 %v1446_v7, %v1418_v0 }
  0xd9   : > { %v1420_v28 = vpop.f32.mrf.mxu1  ;;  %v1507_v16 = vpop.f32.mrf.mxu0 }
  0xda   : > { %v1456_v55 = vpop.f32.mrf.mxu2  ;;  %v1421_v6 = vadd.f32 %v1420_v28, %v1391_v22  ;;  %v3016_v12 = vpop.f32.mrf.mxu3  ;;  %v1476_v22 = vadd.f32 %v3012_v3, %v1447_v33 }
  0xdc   : > { %v1450_v49 = vadd.f32 %v1449_v59, %v1421_v6 }
  0xde   : > { %v1479_v5 = vadd.f32 %v1478_v40, %v1450_v49 }
  0xe0   : > { %v1508_v15 = vadd.f32 %v1507_v16, %v1479_v5 }
  0xe1   : > { %v1422_v41 = vpop.f32.mrf.mxu1  ;;  %v1509_v44 = vpop.f32.mrf.mxu0 }
  0xe2   : > { %v1459_v17 = vpop.f32.mrf.mxu2  ;;  %v1423_v61 = vadd.f32 %v1422_v41, %v1393_v8  ;;  %v3018_v30 = vpop.f32.mrf.mxu3 }
  0xe4   : > { %v1452_v23 = vadd.f32 %v1451_v21, %v1423_v61 }
  0xe9   : > { %v1425_v13 = vpop.f32.mrf.mxu1  ;;  %v1512_v19 = vpop.f32.mrf.mxu0 }
  0xea   : > { %v1461_v29 = vpop.f32.mrf.mxu2  ;;  %v1426_v38 = vadd.f32 %v1425_v13, %v1396_v50  ;;  %v3026_v4 = vpop.f32.mrf.mxu3 }
  0xec   : > { %v1455_v20 = vadd.f32 %v1454_v53, %v1426_v38 }
  0xee   : > { %v1484_v32 = vadd.f32 %v1483_v34, %v1455_v20 }
  0xf0   : > { %v3020_v45 = vadd.f32 %v1512_v19, %v1484_v32 }
  0xf1   : > { %v1427_v57 = vpop.f32.mrf.mxu1  ;;  %v3022_v47 = vpop.f32.mrf.mxu0 }
  0xf2   : > { %v1560_v18 = vpop.f32.mrf.mxu2  ;;  %v1428_v27 = vadd.f32 %v1427_v57, %v1398_v60  ;;  %v1589_v24 = vpop.f32.mrf.mxu3 }
  0xf4   : > { %v3024_v54 = vadd.f32 %v1456_v55, %v1428_v27  ;;  %v1481_v55 = vadd.f32 %v3014_v52, %v1452_v23 }
  0xf9   : > { %v1430_v9 = vpop.f32.mrf.mxu1  ;;  %v3028_v48 = vpop.f32.mrf.mxu0 }
  0xfa   : > { %v1562_v51 = vpop.f32.mrf.mxu2  ;;  %v1431_v50 = vadd.f32 %v1430_v9, %v1401_v10  ;;  %v1591_v60 = vpop.f32.mrf.mxu3  ;;  %v1505_v10 = vadd.f32 %v1504_v63, %v1476_v22 }
  0xfc   : > { %v3030_v26 = vadd.f32 %v1459_v17, %v1431_v50  ;;  %v1510_v17 = vadd.f32 %v1509_v44, %v1481_v55 }
 0x101   : > { %v1432_v42 = vpop.f32.mrf.mxu1  ;;  %v3032_v43 = vpop.f32.mrf.mxu0 }
 0x102   : > { %v1565_v25 = vpop.f32.mrf.mxu2  ;;  %v1433_v31 = vadd.f32 %v1432_v42, %v1403_v39  ;;  %v1594_v11 = vpop.f32.mrf.mxu3 }
 0x104   : > { %v3034_v56 = vadd.f32 %v1461_v29, %v1433_v31 }
 0x109   : > { %v1531_v35 = vpop.f32.mrf.mxu1  ;;  %v1618_v58 = vpop.f32.mrf.mxu0 }
 0x10a   : > { %v1532_v1 = vadd.f32 %v1531_v35, %v1503_v36  ;;  %v1567_v7 = vpop.f32.mrf.mxu2  ;;  %v1596_v6 = vpop.f32.mrf.mxu3 }
 0x10c   : > { %v1561_v59 = vadd.f32 %v1560_v18, %v1532_v1 }
 0x10e   : > { %v1590_v8 = vadd.f32 %v1589_v24, %v1561_v59  ;;  %v1486_v24 = vadd.f32 %v3016_v12, %v3024_v54 }
 0x110   : > { %v1619_v14 = vadd.f32 %v1618_v58, %v1590_v8 }
 0x111   : > { %v1533_v40 = vpop.f32.mrf.mxu1  ;;  %v1620_v21 = vpop.f32.mrf.mxu0 }
 0x112   : > { %v1534_v2 = vadd.f32 %v1533_v40, %v1505_v10  ;;  %v1570_v39 = vpop.f32.mrf.mxu2  ;;  %v1668_v62 = vmul.f32 %v1619_v14, %v1619_v14 }
 0x114   : > { %v1563_v37 = vadd.f32 %v1562_v51, %v1534_v2 }
 0x116   : > { %v1592_v46 = vadd.f32 %v1591_v60, %v1563_v37  ;;  %v1515_v60 = vadd.f32 %v3022_v47, %v1486_v24 }
 0x118   : > { %v1621_v53 = vadd.f32 %v1620_v21, %v1592_v46 }
 0x119   : > { %v1536_v3 = vpop.f32.mrf.mxu1  ;;  %v1623_v36 = vpop.f32.mrf.mxu0 }
 0x11a   : > { %v2245_v63 = vpack.c.bf16 %v1621_v53, %v1619_v14  ;;  %v1654_v0 = vadd.f32 %v1621_v53, %v1619_v14  ;;  %v1669_v33 = vmul.f32 %v1621_v53, %v1621_v53  ;;  %v1537_v34 = vadd.f32 %v1536_v3, %v1508_v15  ;;  %v1572_v5 = vpop.f32.mrf.mxu2  ;;  %v1599_v15 = vpop.f32.mrf.mxu3 }
 0x11b   : > { %v1491_v53 = vadd.f32 %v3026_v4, %v3034_v56 }
 0x11c   : > { %2246 = vst [vmem:[%s3041_s6] sm:$0xff] %v2245_v63   ;;  %v1676_v28 = vadd.f32 %v1669_v33, %v1668_v62  ;;  %v1566_v16 = vadd.f32 %v1565_v25, %v1537_v34 }
 0x11e   : > { %v1595_v49 = vadd.f32 %v1594_v11, %v1566_v16 }
 0x120   : > { %v1624_v41 = vadd.f32 %v1623_v36, %v1595_v49  ;;  %v1520_v36 = vadd.f32 %v3032_v43, %v1491_v53 }
 0x121   : > { %v1538_v61 = vpop.f32.mrf.mxu1  ;;  %v1625_v29 = vpop.f32.mrf.mxu0 }
 0x122   : > { %v1655_v13 = vadd.f32 %v1654_v0, %v1624_v41  ;;  %v1670_v19 = vmul.f32 %v1624_v41, %v1624_v41  ;;  %v1539_v38 = vadd.f32 %v1538_v61, %v1510_v17  ;;  %v1575_v52 = vpop.f32.mrf.mxu2  ;;  %v1601_v58 = vpop.f32.mrf.mxu3 }
 0x124   : > { %v1677_v20 = vadd.f32 %v1676_v28, %v1670_v19  ;;  %v1568_v32 = vadd.f32 %v1567_v7, %v1539_v38 }
 0x126   : > { %v1597_v18 = vadd.f32 %v1596_v6, %v1568_v32 }
 0x128   : > { %v1626_v57 = vadd.f32 %v1625_v29, %v1597_v18 }
 0x129   : > { %v1541_v23 = vpop.f32.mrf.mxu1  ;;  %v1628_v44 = vpop.f32.mrf.mxu0 }
 0x12a   : > { %v2250_v27 = vpack.c.bf16 %v1626_v57, %v1624_v41  ;;  %v1656_v51 = vadd.f32 %v1655_v13, %v1626_v57  ;;  %v1671_v9 = vmul.f32 %v1626_v57, %v1626_v57  ;;  %v1542_v50 = vadd.f32 %v1541_v23, %v3020_v45  ;;  %v1577_v10 = vpop.f32.mrf.mxu2  ;;  %v1604_v46 = vpop.f32.mrf.mxu3 }
 0x12b   : > { %v1489_v45 = vadd.f32 %v3018_v30, %v3030_v26 }
 0x12c   : > { %2262 = vst [vmem:[%s3041_s6 + $0x8] sm:$0xff] %v2250_v27   ;;  %v1678_v25 = vadd.f32 %v1677_v20, %v1671_v9  ;;  %v1571_v42 = vadd.f32 %v1570_v39, %v1542_v50 }
 0x12d   : > { %v1518_v21 = vadd.f32 %v3028_v48, %v1489_v45 }
 0x12e   : > { %v1600_v31 = vadd.f32 %v1599_v15, %v1571_v42 }
 0x130   : > { %v1629_v35 = vadd.f32 %v1628_v44, %v1600_v31 }
 0x131   : > { %v1543_v1 = vpop.f32.mrf.mxu1  ;;  %v1630_v12 = vpop.f32.mrf.mxu0 }
 0x132   : > { %v1657_v7 = vadd.f32 %v1656_v51, %v1629_v35  ;;  %v1672_v22 = vmul.f32 %v1629_v35, %v1629_v35  ;;  %v1544_v59 = vadd.f32 %v1543_v1, %v1515_v60  ;;  %v1633_v30 = vpop.f32.mrf.mxu2  ;;  %v1606_v16 = vpop.f32.mrf.mxu3 }
 0x134   : > { %v1679_v8 = vadd.f32 %v1678_v25, %v1672_v22  ;;  %v1573_v40 = vadd.f32 %v1572_v5, %v1544_v59 }
 0x136   : > { %v1602_v54 = vadd.f32 %v1601_v58, %v1573_v40 }
 0x138   : > { %v1631_v2 = vadd.f32 %v1630_v12, %v1602_v54 }
 0x139   : > { %v1546_v11 = vpop.f32.mrf.mxu1 }
 0x13a   : > { %v2255_v47 = vpack.c.bf16 %v1631_v2, %v1629_v35  ;;  %v1658_v37 = vadd.f32 %v1657_v7, %v1631_v2  ;;  %v1673_v14 = vmul.f32 %v1631_v2, %v1631_v2  ;;  %v1547_v39 = vadd.f32 %v1546_v11, %v1518_v21  ;;  %v1635_v49 = vpop.f32.mrf.mxu2 }
 0x13c   : > { %2263 = vst [vmem:[%s3041_s6 + $0x10] sm:$0xff] %v2255_v47   ;;  %v1680_v62 = vadd.f32 %v1679_v8, %v1673_v14  ;;  %v1576_v3 = vadd.f32 %v1575_v52, %v1547_v39 }
 0x13e   : > { %v1605_v26 = vadd.f32 %v1604_v46, %v1576_v3 }
 0x140   : > { %v1634_v63 = vadd.f32 %v1633_v30, %v1605_v26 }
 0x141   : > { %v1548_v48 = vpop.f32.mrf.mxu1 }
 0x142   : > { %v1659_v0 = vadd.f32 %v1658_v37, %v1634_v63  ;;  %v1674_v33 = vmul.f32 %v1634_v63, %v1634_v63  ;;  %v1549_v34 = vadd.f32 %v1548_v48, %v1520_v36 }
 0x144   : > { %v1681_v55 = vadd.f32 %v1680_v62, %v1674_v33  ;;  %v1578_v28 = vadd.f32 %v1577_v10, %v1549_v34 }
 0x146   : > { %v1607_v6 = vadd.f32 %v1606_v16, %v1578_v28 }
 0x148   : > { %v1636_v4 = vadd.f32 %v1635_v49, %v1607_v6 }
 0x14a   : > { %v2260_v56 = vpack.c.bf16 %v1636_v4, %v1634_v63  ;;  %v1660_v5 = vadd.f32 %v1659_v0, %v1636_v4  ;;  %v1675_v17 = vmul.f32 %v1636_v4, %v1636_v4 }
 0x14c   : > { %2264 = vst [vmem:[%s3041_s6 + $0x18] sm:$0xff] %v2260_v56   ;;  %v1661_v41 = vrot.slane %v1660_v5, 4  ;;  %v1682_v61 = vadd.f32 %v1681_v55, %v1675_v17 }
 0x14e   : > { %v1662_v29 = vadd.f32 %v1661_v41, %v1660_v5  ;;  %v1683_v43 = vrot.slane %v1682_v61, 4 }
 0x150   : > { %v1663_v13 = vrot.slane %v1662_v29, 2  ;;  %v1684_v19 = vadd.f32 %v1683_v43, %v1682_v61 }
 0x152   : > { %v1664_v38 = vadd.f32 %v1663_v13, %v1662_v29  ;;  %v1685_v20 = vrot.slane %v1684_v19, 2 }
 0x154   : > { %v1665_v32 = vrot.slane %v1664_v38, 1  ;;  %v1686_v18 = vadd.f32 %v1685_v20, %v1684_v19 }
 0x156   : > { %v1666_v15 = vadd.f32 %v1665_v32, %v1664_v38  ;;  %v1687_v57 = vrot.slane %v1686_v18, 1 }
 0x158   : > { %1667 = vst [vmem:[%s212_s11] sm:$0x1] %v1666_v15  ;;  %v1688_v52 = vadd.f32 %v1687_v57, %v1686_v18 }
 0x15a   : > { %1689 = vst [vmem:[%s212_s11 + $0x1] sm:$0x1] %v1688_v52 }
 0x15b PF: > { %s14_s14 = sadd.s32 1, %s2328_s14   ;;  %s3075_s12 = smov %s2324_s13 }
 0x15c   : > { %p11_p5 = scmp.ge.s32.totalorder %s14_s14, 4   ;;  %s3076_s13 = smov %s3078_s15 }
 0x15e   :  { %13 = sbr.rel (!%p11_p5) target bundleno = 2 (0x2), region = 73 }

</bundles_post_ra>
